<compile_context>
chip_gen: v7x
topology: tpu7x:2x2x1
jax: 0.10.0
libtpu: 0.0.40
codegen_flags: <defaults>
</compile_context>

<pallas_src>
import jax
import jax.numpy as jnp
from jax import lax
from jax.experimental import pallas as pl
from jax.experimental.pallas import tpu as pltpu


def inverted_residual_kernel(x_ref, w1_ref, b1_ref, wdw_ref,
                             se_w1_ref, se_b1_ref, se_w2_ref, se_b2_ref,
                             cmap_ref, w2_ref, b3_ref, out_ref):
    B, H, WCin = x_ref.shape
    BH = B * H
    L = w1_ref.shape[1]            # W * Cmid
    Cmid = cmap_ref.shape[0]
    WCout = w2_ref.shape[1]        # W * Cout
    f32 = jnp.float32
    bf16 = jnp.bfloat16

    # ---- conv_pw: 1x1 expansion (BN1 scale folded into the bf16 block-diag weight).
    # (B, H, W*Cin) -> (B*H, W*Cin) is a sublane-only reshape; big M fills the MXU rows.
    xb = x_ref[...].reshape(BH, WCin).astype(bf16)
    h = jnp.dot(xb, w1_ref[...], preferred_element_type=f32)
    h = jnp.maximum(h + b1_ref[...], 0.0)                       # (BH, L) f32

    # ---- conv_dw: 3x3 depthwise, stride 1, pad 1 (BN2 folded), f32 VPU math.
    # Lane (W) shifts go through the XLU via pltpu.roll + iota edge mask; row (H) shifts
    # are a sublane shift plus a per-image boundary mask so rows never leak across the
    # B images fused into this block.
    wdw = wdw_ref[...]                                          # (10, L): 9 taps + shift
    lane = lax.broadcasted_iota(jnp.int32, (1, L), 1)
    m_shl = lane >= Cmid                                        # valid x-1 neighbour
    m_shr = lane < (L - Cmid)                                   # valid x+1 neighbour
    ridx = lax.broadcasted_iota(jnp.int32, (BH, 1), 0)
    m_up = (ridx % H) != 0                                      # valid y-1 neighbour
    m_dn = (ridx % H) != (H - 1)                                # valid y+1 neighbour

    def shl(a):                                                 # value at (., x-1)
        return jnp.where(m_shl, pltpu.roll(a, Cmid, 1), 0.0)

    def shr(a):                                                 # value at (., x+1)
        return jnp.where(m_shr, pltpu.roll(a, L - Cmid, 1), 0.0)

    zrow = jnp.zeros((1, L), f32)
    # Center band -> up band -> down band, so at most one row-shifted (BH, L) operand is
    # live at a time (64-vreg file guard).
    acc = h * wdw[4:5, :] + wdw[9:10, :]
    acc = acc + shl(h) * wdw[3:4, :] + shr(h) * wdw[5:6, :]
    h_up = jnp.where(m_up, jnp.concatenate([zrow, h[:BH - 1, :]], axis=0), 0.0)
    acc = acc + h_up * wdw[1:2, :] + shl(h_up) * wdw[0:1, :] + shr(h_up) * wdw[2:3, :]
    h_dn = jnp.where(m_dn, jnp.concatenate([h[1:, :], zrow], axis=0), 0.0)
    acc = acc + h_dn * wdw[7:8, :] + shl(h_dn) * wdw[6:7, :] + shr(h_dn) * wdw[8:9, :]
    hdw = jnp.maximum(acc, 0.0)                                 # (BH, L)
    # TODO(synk): for much larger B*H, band this 9-tap accumulation over row chunks with
    # lax.fori_loop(unroll=True) to stay inside the 64-vreg file.

    # ---- SE (per image): avg pool -> fc1 -> ReLU -> fc2 -> sigmoid -> channel gate.
    # Pure VPU/XLU; 1/(H*W) is folded into se_w1 host-side; cmap[c, l] = (l % Cmid == c)
    # both pools per channel and re-tiles the gate across W.
    cmap = cmap_ref[...]
    se_w1 = se_w1_ref[...]
    se_b1 = se_b1_ref[...]
    se_w2 = se_w2_ref[...]
    se_b2 = se_b2_ref[...]
    gated = []
    for b in range(B):                                          # B static & tiny: unrolled
        hb = hdw[b * H:(b + 1) * H, :]                          # (H, L)
        colsum = jnp.sum(hb, axis=0, keepdims=True)             # (1, L)
        pooled = jnp.sum(cmap * colsum, axis=1, keepdims=True)  # (Cmid, 1) raw sums
        se1 = jnp.maximum(
            jnp.sum(pooled * se_w1, axis=0, keepdims=True) + se_b1, 0.0)   # (1, red)
        pre = jnp.sum(se_w2 * se1, axis=1, keepdims=True) + se_b2          # (Cmid, 1)
        gate = jax.nn.sigmoid(pre)                              # (Cmid, 1)
        gate_l = jnp.sum(cmap * gate, axis=0, keepdims=True)    # (1, L), lane-tiled
        gated.append(hb * gate_l)
    hg = jnp.concatenate(gated, axis=0)                         # (BH, L)

    # ---- conv_pw1: 1x1 projection (BN3 scale folded, bf16 MXU) + shift + residual.
    y = jnp.dot(hg.astype(bf16), w2_ref[...], preferred_element_type=f32)
    y = y + b3_ref[...]                                         # (BH, W*Cout)
    # has_residual (Cin == Cout, stride 1, not noskip); keep_prob=1 -> DropConnect is
    # Identity in eval.  Residual re-read from the ref (f32) keeps its live range out of
    # the matmul region; store is lane-dense (W*Cout multiple of 128).
    res = x_ref[...].reshape(BH, WCin)
    out_ref[...] = (y + res).reshape(B, H, WCout).astype(out_ref.dtype)


def pack_params(p, H, W):
    """Host-side re-layout, run ONCE (inference constants): fold BN scale/shift into the
    convs, expand the 1x1 convs to block-diagonal (kron) bf16 form, pre-tile per-channel
    depthwise rows across W, and fold the 1/(H*W) pooling scale into se_w1."""
    f32, bf16 = jnp.float32, jnp.bfloat16
    Cin, Cmid = p['w_pw'].shape
    eye_w = jnp.eye(W, dtype=f32)

    w_pw = (p['w_pw'] * p['bn1_s']).astype(f32)                 # BN1 scale folded
    w1_big = jnp.kron(eye_w, w_pw).astype(bf16)                 # (W*Cin, W*Cmid) bf16
    b1 = jnp.tile(p['bn1_b'], (1, W)).astype(f32)               # (1, W*Cmid) f32

    w_dw = (p['w_dw'] * p['bn2_s'][0]).reshape(9, Cmid)         # BN2 scale folded
    wdw = jnp.concatenate([jnp.tile(w_dw, (1, W)),
                           jnp.tile(p['bn2_b'], (1, W))], axis=0).astype(f32)  # (10, L)

    w_pw1 = (p['w_pw1'] * p['bn3_s']).astype(f32)               # BN3 scale folded
    w2_big = jnp.kron(eye_w, w_pw1).astype(bf16)                # (W*Cmid, W*Cout) bf16
    b3 = jnp.tile(p['bn3_b'], (1, W)).astype(f32)               # (1, W*Cout) f32

    cmap = jnp.tile(jnp.eye(Cmid, dtype=f32), (1, W))           # (Cmid, W*Cmid) 0/1 map

    # TODO(synk): for realistic MBConv sizes (e.g. W=14, Cmid=672) the kron form exceeds
    # v7x's 64 MiB VMEM -- build the block-diagonal weight on-chip from the compact
    # (Cin, Cmid) tensor instead of shipping it expanded.
    return dict(
        w1_big=w1_big, b1=b1, wdw=wdw, w2_big=w2_big, b3=b3, cmap=cmap,
        se_w1=(p['se_w1'] / float(H * W)).astype(f32),          # pooling scale folded
        se_b1=p['se_b1'].astype(f32),                           # (1, red)
        se_w2=p['se_w2'].T.astype(f32),                         # (Cmid, red)
        se_b2=p['se_b2'].T.astype(f32))                         # (Cmid, 1)


def _pick_block_batch(N, H):
    """Fill the MXU M dimension (~256 rows on v6e/v7x) but keep >= 2 grid blocks (v7x:
    batch shards across its 2 TensorCores) when each block would still have M >= 128."""
    B = max(1, min(N, max(1, 256 // H)))
    while N % B:
        B -= 1
    if N // B < 2 and N % 2 == 0 and (N // 2) * H >= 128:
        B = N // 2
    return B


def inverted_residual(x_nhwc, packed):
    N, H, W, Cin = x_nhwc.shape
    WCout = packed['w2_big'].shape[1]
    B = _pick_block_batch(N, H)

    x2 = x_nhwc.reshape(N, H, W * Cin)              # lane-dense view; free in HBM

    def const_spec(a):                               # grid-invariant -> single-buffered
        nd = a.ndim
        return pl.BlockSpec(a.shape, lambda n, _nd=nd: (0,) * _nd,
                            pipeline_mode=pl.Buffered(1))

    out = pl.pallas_call(
        inverted_residual_kernel,
        out_shape=jax.ShapeDtypeStruct((N, H, WCout), x_nhwc.dtype),
        grid_spec=pltpu.PrefetchScalarGridSpec(
            num_scalar_prefetch=0,
            grid=(N // B,),
            in_specs=[
                pl.BlockSpec((B, H, W * Cin), lambda n: (n, 0, 0)),
                const_spec(packed['w1_big']), const_spec(packed['b1']),
                const_spec(packed['wdw']),
                const_spec(packed['se_w1']), const_spec(packed['se_b1']),
                const_spec(packed['se_w2']), const_spec(packed['se_b2']),
                const_spec(packed['cmap']),
                const_spec(packed['w2_big']), const_spec(packed['b3']),
            ],
            out_specs=pl.BlockSpec((B, H, WCout), lambda n: (n, 0, 0))),
        compiler_params=pltpu.CompilerParams(
            dimension_semantics=("parallel",)),      # v7x: grid blocks shard across TCs
    )(x2, packed['w1_big'], packed['b1'], packed['wdw'],
      packed['se_w1'], packed['se_b1'], packed['se_w2'], packed['se_b2'],
      packed['cmap'], packed['w2_big'], packed['b3'])

    return out.reshape(N, H, W, WCout // W)


def ref_forward(x, p, mxu_dtype=jnp.float32):
    """Pure-JAX NHWC reference.  mxu_dtype selects the operand precision of the two 1x1
    convs so the kernel's bf16 MXU operands can also be checked at matched precision."""
    Cmid = p['w_pw'].shape[1]
    w1 = (p['w_pw'] * p['bn1_s']).astype(mxu_dtype)
    h = jnp.einsum('nhwc,cd->nhwd', x.astype(mxu_dtype), w1,
                   preferred_element_type=jnp.float32)
    h = jnp.maximum(h + p['bn1_b'], 0.0)
    wdw = (p['w_dw'] * p['bn2_s'][0])[:, :, None, :]             # (3, 3, 1, Cmid) HWIO
    h = lax.conv_general_dilated(
        h, wdw, window_strides=(1, 1), padding=((1, 1), (1, 1)),
        dimension_numbers=('NHWC', 'HWIO', 'NHWC'), feature_group_count=Cmid)
    h = jnp.maximum(h + p['bn2_b'], 0.0)
    se = jnp.mean(h, axis=(1, 2))                                # (N, Cmid)
    se = jnp.maximum(se @ p['se_w1'] + p['se_b1'], 0.0)
    se = jax.nn.sigmoid(se @ p['se_w2'] + p['se_b2'])
    h = h * se[:, None, None, :]
    w2 = (p['w_pw1'] * p['bn3_s']).astype(mxu_dtype)
    y = jnp.einsum('nhwc,cd->nhwd', h.astype(mxu_dtype), w2,
                   preferred_element_type=jnp.float32)
    y = y + p['bn3_b']
    return y + x


if __name__ == "__main__":
    N, H, W = 2, 16, 16
    in_channels = 16
    out_channels = 16
    expand_ratio = 2.0
    eps = 1e-5

    # make_divisible(in_channels * expand_ratio), divisor=8
    v = in_channels * expand_ratio
    mid_chs = max(8, int(v + 4) // 8 * 8)
    if mid_chs < 0.9 * v:
        mid_chs += 8
    red_chs = in_channels // 4

    key = jax.random.PRNGKey(0)
    ks = list(jax.random.split(key, 20))

    def nrm(k, shape, scale=0.1):
        return (scale * jax.random.normal(k, shape)).astype(jnp.float32)

    def fold_bn(kg, kb, km, kv, c):
        gamma = 1.0 + 0.1 * jax.random.normal(kg, (c,))
        beta = 0.1 * jax.random.normal(kb, (c,))
        mean = 0.1 * jax.random.normal(km, (c,))
        var = jnp.abs(0.5 + 0.1 * jax.random.normal(kv, (c,)))
        scale = gamma / jnp.sqrt(var + eps)
        shift = beta - mean * scale
        return (scale.reshape(1, c).astype(jnp.float32),
                shift.reshape(1, c).astype(jnp.float32))

    bn1_s, bn1_b = fold_bn(ks[1], ks[2], ks[3], ks[4], mid_chs)
    bn2_s, bn2_b = fold_bn(ks[6], ks[7], ks[8], ks[9], mid_chs)
    bn3_s, bn3_b = fold_bn(ks[15], ks[16], ks[17], ks[18], out_channels)

    params = {
        # conv_pw: torch weight (mid, in, 1, 1) -> stored (in, mid)
        'w_pw': nrm(ks[0], (in_channels, mid_chs)),
        'bn1_s': bn1_s, 'bn1_b': bn1_b,
        # conv_dw: torch weight (mid, 1, 3, 3) -> stored (3, 3, mid)
        'w_dw': nrm(ks[5], (3, 3, mid_chs)),
        'bn2_s': bn2_s, 'bn2_b': bn2_b,
        # SE fc1: torch (red, mid, 1, 1)+bias -> (mid, red), (1, red)
        'se_w1': nrm(ks[10], (mid_chs, red_chs)),
        'se_b1': nrm(ks[11], (1, red_chs)),
        # SE fc2: torch (mid, red, 1, 1)+bias -> (red, mid), (1, mid)
        'se_w2': nrm(ks[12], (red_chs, mid_chs)),
        'se_b2': nrm(ks[13], (1, mid_chs)),
        # conv_pw1: torch (out, mid, 1, 1) -> (mid, out)
        'w_pw1': nrm(ks[14], (mid_chs, out_channels)),
        'bn3_s': bn3_s, 'bn3_b': bn3_b,
    }

    # PyTorch forward takes NCHW; build NCHW then transpose to NHWC for the kernel.
    x_nchw = jax.random.normal(ks[19], (N, in_channels, H, W), dtype=jnp.float32)
    x_nhwc = jnp.transpose(x_nchw, (0, 2, 3, 1))

    # Pack once (inference constants) -- hoisted out of the per-call path.
    packed = pack_params(params, H, W)

    out = jax.block_until_ready(inverted_residual(x_nhwc, packed))
    assert out.shape == (N, H, W, out_channels)

    # Matched-precision check (reference also uses bf16 operands for the two 1x1 convs).
    ref_m = jax.block_until_ready(ref_forward(x_nhwc, params, jnp.bfloat16))
    assert jnp.allclose(out, ref_m, atol=2e-3, rtol=2e-3), \
        f"matched-precision max abs err {jnp.max(jnp.abs(out - ref_m))}"
    # Loose check against the full-f32 module semantics (bf16 MXU operand rounding).
    ref_f = jax.block_until_ready(ref_forward(x_nhwc, params, jnp.float32))
    assert jnp.allclose(out, ref_f, atol=3e-2, rtol=3e-2), \
        f"f32-reference max abs err {jnp.max(jnp.abs(out - ref_f))}"

    print("KERNEL_OK")
</pallas_src>

<mosaic_0001>
module attributes {stable_mosaic.version = 11 : i64} {
  func.func @inverted_residual_kernel(%arg0: i32, %arg1: memref<2x16x256xf32, #tpu.memory_space<vmem>>, %arg2: memref<256x512xbf16, #tpu.memory_space<vmem>>, %arg3: memref<1x512xf32, #tpu.memory_space<vmem>>, %arg4: memref<10x512xf32, #tpu.memory_space<vmem>>, %arg5: memref<32x4xf32, #tpu.memory_space<vmem>>, %arg6: memref<1x4xf32, #tpu.memory_space<vmem>>, %arg7: memref<32x4xf32, #tpu.memory_space<vmem>>, %arg8: memref<32x1xf32, #tpu.memory_space<vmem>>, %arg9: memref<32x512xf32, #tpu.memory_space<vmem>>, %arg10: memref<512x256xbf16, #tpu.memory_space<vmem>>, %arg11: memref<1x256xf32, #tpu.memory_space<vmem>>, %arg12: memref<2x16x256xf32, #tpu.memory_space<vmem>>) attributes {dimension_semantics = [#tpu.dimension_semantics<parallel>], iteration_bounds = array<i64: 1>, scalar_prefetch = 0 : i64, scratch_operands = 0 : i64, tpu.core_type = #tpu.core_type<tc>, window_params = [{transform_indices = @transform_0, window_bounds = array<i64: 2, 16, 256>}, {pipeline_mode = #tpu.pipeline_mode<synchronous>, transform_indices = @transform_1, window_bounds = array<i64: 256, 512>}, {pipeline_mode = #tpu.pipeline_mode<synchronous>, transform_indices = @transform_2, window_bounds = array<i64: 1, 512>}, {pipeline_mode = #tpu.pipeline_mode<synchronous>, transform_indices = @transform_3, window_bounds = array<i64: 10, 512>}, {pipeline_mode = #tpu.pipeline_mode<synchronous>, transform_indices = @transform_4, window_bounds = array<i64: 32, 4>}, {pipeline_mode = #tpu.pipeline_mode<synchronous>, transform_indices = @transform_5, window_bounds = array<i64: 1, 4>}, {pipeline_mode = #tpu.pipeline_mode<synchronous>, transform_indices = @transform_6, window_bounds = array<i64: 32, 4>}, {pipeline_mode = #tpu.pipeline_mode<synchronous>, transform_indices = @transform_7, window_bounds = array<i64: 32, 1>}, {pipeline_mode = #tpu.pipeline_mode<synchronous>, transform_indices = @transform_8, window_bounds = array<i64: 32, 512>}, {pipeline_mode = #tpu.pipeline_mode<synchronous>, transform_indices = @transform_9, window_bounds = array<i64: 512, 256>}, {pipeline_mode = #tpu.pipeline_mode<synchronous>, transform_indices = @transform_10, window_bounds = array<i64: 1, 256>}, {transform_indices = @transform_11, window_bounds = array<i64: 2, 16, 256>}]} {
    %c0 = arith.constant 0 : index
    %c0_0 = arith.constant 0 : index
    %c0_1 = arith.constant 0 : index
    %0 = vector.load %arg1[%c0, %c0_0, %c0_1] : memref<2x16x256xf32, #tpu.memory_space<vmem>>, vector<2x16x256xf32>
    %1 = vector.shape_cast %0 : vector<2x16x256xf32> to vector<32x256xf32>
    %2 = arith.truncf %1 : vector<32x256xf32> to vector<32x256xbf16>
    %c0_2 = arith.constant 0 : index
    %c0_3 = arith.constant 0 : index
    %3 = vector.load %arg2[%c0_2, %c0_3] : memref<256x512xbf16, #tpu.memory_space<vmem>>, vector<256x512xbf16>
    %cst = arith.constant dense<0.000000e+00> : vector<32x512xf32>
    %4 = tpu.matmul %2, %3, %cst {dimension_numbers = #tpu.dot_dimension_numbers<[1], [0], [0], [1], [0, 0, 1, 1], [], []>} : vector<32x256xbf16>, vector<256x512xbf16>, vector<32x512xf32> -> vector<32x512xf32>
    %c0_4 = arith.constant 0 : index
    %c0_5 = arith.constant 0 : index
    %5 = vector.load %arg3[%c0_4, %c0_5] : memref<1x512xf32, #tpu.memory_space<vmem>>, vector<1x512xf32>
    %6 = vector.broadcast %5 : vector<1x512xf32> to vector<32x512xf32>
    %7 = arith.addf %4, %6 : vector<32x512xf32>
    %cst_6 = arith.constant 0.000000e+00 : f32
    %8 = vector.broadcast %cst_6 : f32 to vector<32x512xf32>
    %9 = arith.maximumf %7, %8 : vector<32x512xf32>
    %c0_7 = arith.constant 0 : index
    %c0_8 = arith.constant 0 : index
    %10 = vector.load %arg4[%c0_7, %c0_8] : memref<10x512xf32, #tpu.memory_space<vmem>>, vector<10x512xf32>
    %11 = tpu.iota {dimensions = array<i32: 1>} : vector<1x512xi32>
    %c32_i32 = arith.constant 32 : i32
    %12 = vector.broadcast %c32_i32 : i32 to vector<1x512xi32>
    %13 = arith.cmpi sge, %11, %12 : vector<1x512xi32>
    %c480_i32 = arith.constant 480 : i32
    %14 = vector.broadcast %c480_i32 : i32 to vector<1x512xi32>
    %15 = arith.cmpi slt, %11, %14 : vector<1x512xi32>
    %16 = tpu.iota {dimensions = array<i32: 0>} : vector<32x1xi32>
    %c16_i32 = arith.constant 16 : i32
    %c0_i32 = arith.constant 0 : i32
    %17 = arith.cmpi eq, %c16_i32, %c0_i32 : i32
    %c1_i32 = arith.constant 1 : i32
    %18 = arith.select %17, %c1_i32, %c16_i32 : i32
    %19 = vector.broadcast %18 : i32 to vector<32x1xi32>
    %20 = arith.remsi %16, %19 : vector<32x1xi32>
    %c0_i32_9 = arith.constant 0 : i32
    %21 = vector.broadcast %c0_i32_9 : i32 to vector<32x1xi32>
    %22 = arith.cmpi ne, %20, %21 : vector<32x1xi32>
    %c0_i32_10 = arith.constant 0 : i32
    %23 = vector.broadcast %c0_i32_10 : i32 to vector<32x1xi32>
    %24 = arith.cmpi slt, %20, %23 : vector<32x1xi32>
    %c0_i32_11 = arith.constant 0 : i32
    %25 = arith.cmpi slt, %18, %c0_i32_11 : i32
    %26 = vector.broadcast %25 : i1 to vector<32x1xi1>
    %27 = vector.broadcast %26 : vector<32x1xi1> to vector<32x1xi1>
    %28 = arith.xori %24, %27 : vector<32x1xi1>
    %29 = arith.andi %28, %22 : vector<32x1xi1>
    %30 = vector.broadcast %18 : i32 to vector<32x1xi32>
    %31 = arith.addi %20, %30 : vector<32x1xi32>
    %32 = arith.select %29, %31, %20 : vector<32x1xi1>, vector<32x1xi32>
    %c0_i32_12 = arith.constant 0 : i32
    %33 = vector.broadcast %c0_i32_12 : i32 to vector<32x1xi32>
    %34 = arith.cmpi ne, %32, %33 : vector<32x1xi32>
    %c16_i32_13 = arith.constant 16 : i32
    %c0_i32_14 = arith.constant 0 : i32
    %35 = arith.cmpi eq, %c16_i32_13, %c0_i32_14 : i32
    %c1_i32_15 = arith.constant 1 : i32
    %36 = arith.select %35, %c1_i32_15, %c16_i32_13 : i32
    %37 = vector.broadcast %36 : i32 to vector<32x1xi32>
    %38 = arith.remsi %16, %37 : vector<32x1xi32>
    %c0_i32_16 = arith.constant 0 : i32
    %39 = vector.broadcast %c0_i32_16 : i32 to vector<32x1xi32>
    %40 = arith.cmpi ne, %38, %39 : vector<32x1xi32>
    %c0_i32_17 = arith.constant 0 : i32
    %41 = vector.broadcast %c0_i32_17 : i32 to vector<32x1xi32>
    %42 = arith.cmpi slt, %38, %41 : vector<32x1xi32>
    %c0_i32_18 = arith.constant 0 : i32
    %43 = arith.cmpi slt, %36, %c0_i32_18 : i32
    %44 = vector.broadcast %43 : i1 to vector<32x1xi1>
    %45 = vector.broadcast %44 : vector<32x1xi1> to vector<32x1xi1>
    %46 = arith.xori %42, %45 : vector<32x1xi1>
    %47 = arith.andi %46, %40 : vector<32x1xi1>
    %48 = vector.broadcast %36 : i32 to vector<32x1xi32>
    %49 = arith.addi %38, %48 : vector<32x1xi32>
    %50 = arith.select %47, %49, %38 : vector<32x1xi1>, vector<32x1xi32>
    %c15_i32 = arith.constant 15 : i32
    %51 = vector.broadcast %c15_i32 : i32 to vector<32x1xi32>
    %52 = arith.cmpi ne, %50, %51 : vector<32x1xi32>
    %cst_19 = arith.constant 0.000000e+00 : f32
    %53 = vector.broadcast %cst_19 : f32 to vector<1x512xf32>
    %54 = vector.extract_strided_slice %10 {offsets = [4, 0], sizes = [1, 512], strides = [1, 1]} : vector<10x512xf32> to vector<1x512xf32>
    %55 = vector.broadcast %54 : vector<1x512xf32> to vector<32x512xf32>
    %56 = arith.mulf %9, %55 : vector<32x512xf32>
    %57 = vector.extract_strided_slice %10 {offsets = [9, 0], sizes = [1, 512], strides = [1, 1]} : vector<10x512xf32> to vector<1x512xf32>
    %58 = vector.broadcast %57 : vector<1x512xf32> to vector<32x512xf32>
    %59 = arith.addf %56, %58 : vector<32x512xf32>
    %c32_i32_20 = arith.constant 32 : i32
    %60 = tpu.dynamic_rotate %9 by %c32_i32_20 dim 1 : vector<32x512xf32>, i32 -> vector<32x512xf32>
    %cst_21 = arith.constant 0.000000e+00 : f32
    %61 = vector.shape_cast %13 : vector<1x512xi1> to vector<1x512xi1>
    %62 = vector.broadcast %61 : vector<1x512xi1> to vector<32x512xi1>
    %63 = vector.broadcast %cst_21 : f32 to vector<32x512xf32>
    %64 = arith.select %62, %60, %63 : vector<32x512xi1>, vector<32x512xf32>
    %65 = vector.extract_strided_slice %10 {offsets = [3, 0], sizes = [1, 512], strides = [1, 1]} : vector<10x512xf32> to vector<1x512xf32>
    %66 = vector.broadcast %65 : vector<1x512xf32> to vector<32x512xf32>
    %67 = arith.mulf %64, %66 : vector<32x512xf32>
    %68 = arith.addf %59, %67 : vector<32x512xf32>
    %c480_i32_22 = arith.constant 480 : i32
    %69 = tpu.dynamic_rotate %9 by %c480_i32_22 dim 1 : vector<32x512xf32>, i32 -> vector<32x512xf32>
    %cst_23 = arith.constant 0.000000e+00 : f32
    %70 = vector.shape_cast %15 : vector<1x512xi1> to vector<1x512xi1>
    %71 = vector.broadcast %70 : vector<1x512xi1> to vector<32x512xi1>
    %72 = vector.broadcast %cst_23 : f32 to vector<32x512xf32>
    %73 = arith.select %71, %69, %72 : vector<32x512xi1>, vector<32x512xf32>
    %74 = vector.extract_strided_slice %10 {offsets = [5, 0], sizes = [1, 512], strides = [1, 1]} : vector<10x512xf32> to vector<1x512xf32>
    %75 = vector.broadcast %74 : vector<1x512xf32> to vector<32x512xf32>
    %76 = arith.mulf %73, %75 : vector<32x512xf32>
    %77 = arith.addf %68, %76 : vector<32x512xf32>
    %78 = vector.extract_strided_slice %9 {offsets = [0, 0], sizes = [31, 512], strides = [1, 1]} : vector<32x512xf32> to vector<31x512xf32>
    %79 = tpu.concatenate %53, %78 in 0 : vector<1x512xf32>, vector<31x512xf32> -> vector<32x512xf32>
    %cst_24 = arith.constant 0.000000e+00 : f32
    %80 = vector.shape_cast %34 : vector<32x1xi1> to vector<32x1xi1>
    %81 = vector.broadcast %80 : vector<32x1xi1> to vector<32x512xi1>
    %82 = vector.broadcast %cst_24 : f32 to vector<32x512xf32>
    %83 = arith.select %81, %79, %82 : vector<32x512xi1>, vector<32x512xf32>
    %84 = vector.extract_strided_slice %10 {offsets = [1, 0], sizes = [1, 512], strides = [1, 1]} : vector<10x512xf32> to vector<1x512xf32>
    %85 = vector.broadcast %84 : vector<1x512xf32> to vector<32x512xf32>
    %86 = arith.mulf %83, %85 : vector<32x512xf32>
    %87 = arith.addf %77, %86 : vector<32x512xf32>
    %c32_i32_25 = arith.constant 32 : i32
    %88 = tpu.dynamic_rotate %83 by %c32_i32_25 dim 1 : vector<32x512xf32>, i32 -> vector<32x512xf32>
    %cst_26 = arith.constant 0.000000e+00 : f32
    %89 = vector.shape_cast %13 : vector<1x512xi1> to vector<1x512xi1>
    %90 = vector.broadcast %89 : vector<1x512xi1> to vector<32x512xi1>
    %91 = vector.broadcast %cst_26 : f32 to vector<32x512xf32>
    %92 = arith.select %90, %88, %91 : vector<32x512xi1>, vector<32x512xf32>
    %93 = vector.extract_strided_slice %10 {offsets = [0, 0], sizes = [1, 512], strides = [1, 1]} : vector<10x512xf32> to vector<1x512xf32>
    %94 = vector.broadcast %93 : vector<1x512xf32> to vector<32x512xf32>
    %95 = arith.mulf %92, %94 : vector<32x512xf32>
    %96 = arith.addf %87, %95 : vector<32x512xf32>
    %c480_i32_27 = arith.constant 480 : i32
    %97 = tpu.dynamic_rotate %83 by %c480_i32_27 dim 1 : vector<32x512xf32>, i32 -> vector<32x512xf32>
    %cst_28 = arith.constant 0.000000e+00 : f32
    %98 = vector.shape_cast %15 : vector<1x512xi1> to vector<1x512xi1>
    %99 = vector.broadcast %98 : vector<1x512xi1> to vector<32x512xi1>
    %100 = vector.broadcast %cst_28 : f32 to vector<32x512xf32>
    %101 = arith.select %99, %97, %100 : vector<32x512xi1>, vector<32x512xf32>
    %102 = vector.extract_strided_slice %10 {offsets = [2, 0], sizes = [1, 512], strides = [1, 1]} : vector<10x512xf32> to vector<1x512xf32>
    %103 = vector.broadcast %102 : vector<1x512xf32> to vector<32x512xf32>
    %104 = arith.mulf %101, %103 : vector<32x512xf32>
    %105 = arith.addf %96, %104 : vector<32x512xf32>
    %106 = vector.extract_strided_slice %9 {offsets = [1, 0], sizes = [31, 512], strides = [1, 1]} : vector<32x512xf32> to vector<31x512xf32>
    %107 = tpu.concatenate %106, %53 in 0 : vector<31x512xf32>, vector<1x512xf32> -> vector<32x512xf32>
    %cst_29 = arith.constant 0.000000e+00 : f32
    %108 = vector.shape_cast %52 : vector<32x1xi1> to vector<32x1xi1>
    %109 = vector.broadcast %108 : vector<32x1xi1> to vector<32x512xi1>
    %110 = vector.broadcast %cst_29 : f32 to vector<32x512xf32>
    %111 = arith.select %109, %107, %110 : vector<32x512xi1>, vector<32x512xf32>
    %112 = vector.extract_strided_slice %10 {offsets = [7, 0], sizes = [1, 512], strides = [1, 1]} : vector<10x512xf32> to vector<1x512xf32>
    %113 = vector.broadcast %112 : vector<1x512xf32> to vector<32x512xf32>
    %114 = arith.mulf %111, %113 : vector<32x512xf32>
    %115 = arith.addf %105, %114 : vector<32x512xf32>
    %c32_i32_30 = arith.constant 32 : i32
    %116 = tpu.dynamic_rotate %111 by %c32_i32_30 dim 1 : vector<32x512xf32>, i32 -> vector<32x512xf32>
    %cst_31 = arith.constant 0.000000e+00 : f32
    %117 = vector.shape_cast %13 : vector<1x512xi1> to vector<1x512xi1>
    %118 = vector.broadcast %117 : vector<1x512xi1> to vector<32x512xi1>
    %119 = vector.broadcast %cst_31 : f32 to vector<32x512xf32>
    %120 = arith.select %118, %116, %119 : vector<32x512xi1>, vector<32x512xf32>
    %121 = vector.extract_strided_slice %10 {offsets = [6, 0], sizes = [1, 512], strides = [1, 1]} : vector<10x512xf32> to vector<1x512xf32>
    %122 = vector.broadcast %121 : vector<1x512xf32> to vector<32x512xf32>
    %123 = arith.mulf %120, %122 : vector<32x512xf32>
    %124 = arith.addf %115, %123 : vector<32x512xf32>
    %c480_i32_32 = arith.constant 480 : i32
    %125 = tpu.dynamic_rotate %111 by %c480_i32_32 dim 1 : vector<32x512xf32>, i32 -> vector<32x512xf32>
    %cst_33 = arith.constant 0.000000e+00 : f32
    %126 = vector.shape_cast %15 : vector<1x512xi1> to vector<1x512xi1>
    %127 = vector.broadcast %126 : vector<1x512xi1> to vector<32x512xi1>
    %128 = vector.broadcast %cst_33 : f32 to vector<32x512xf32>
    %129 = arith.select %127, %125, %128 : vector<32x512xi1>, vector<32x512xf32>
    %130 = vector.extract_strided_slice %10 {offsets = [8, 0], sizes = [1, 512], strides = [1, 1]} : vector<10x512xf32> to vector<1x512xf32>
    %131 = vector.broadcast %130 : vector<1x512xf32> to vector<32x512xf32>
    %132 = arith.mulf %129, %131 : vector<32x512xf32>
    %133 = arith.addf %124, %132 : vector<32x512xf32>
    %cst_34 = arith.constant 0.000000e+00 : f32
    %134 = vector.broadcast %cst_34 : f32 to vector<32x512xf32>
    %135 = arith.maximumf %133, %134 : vector<32x512xf32>
    %c0_35 = arith.constant 0 : index
    %c0_36 = arith.constant 0 : index
    %136 = vector.load %arg9[%c0_35, %c0_36] : memref<32x512xf32, #tpu.memory_space<vmem>>, vector<32x512xf32>
    %c0_37 = arith.constant 0 : index
    %c0_38 = arith.constant 0 : index
    %137 = vector.load %arg5[%c0_37, %c0_38] : memref<32x4xf32, #tpu.memory_space<vmem>>, vector<32x4xf32>
    %c0_39 = arith.constant 0 : index
    %c0_40 = arith.constant 0 : index
    %138 = vector.load %arg6[%c0_39, %c0_40] : memref<1x4xf32, #tpu.memory_space<vmem>>, vector<1x4xf32>
    %c0_41 = arith.constant 0 : index
    %c0_42 = arith.constant 0 : index
    %139 = vector.load %arg7[%c0_41, %c0_42] : memref<32x4xf32, #tpu.memory_space<vmem>>, vector<32x4xf32>
    %c0_43 = arith.constant 0 : index
    %c0_44 = arith.constant 0 : index
    %140 = vector.load %arg8[%c0_43, %c0_44] : memref<32x1xf32, #tpu.memory_space<vmem>>, vector<32x1xf32>
    %141 = vector.extract_strided_slice %135 {offsets = [0, 0], sizes = [16, 512], strides = [1, 1]} : vector<32x512xf32> to vector<16x512xf32>
    %cst_45 = arith.constant dense<0.000000e+00> : vector<512xf32>
    %142 = vector.multi_reduction <add>, %141, %cst_45 [0] : vector<16x512xf32> to vector<512xf32>
    %143 = vector.shape_cast %142 : vector<512xf32> to vector<1x512xf32>
    %144 = vector.broadcast %143 : vector<1x512xf32> to vector<32x512xf32>
    %145 = arith.mulf %136, %144 : vector<32x512xf32>
    %cst_46 = arith.constant dense<0.000000e+00> : vector<32xf32>
    %146 = vector.multi_reduction <add>, %145, %cst_46 [1] : vector<32x512xf32> to vector<32xf32>
    %147 = vector.shape_cast %146 : vector<32xf32> to vector<32x1xf32>
    %148 = vector.broadcast %147 : vector<32x1xf32> to vector<32x4xf32>
    %149 = arith.mulf %148, %137 : vector<32x4xf32>
    %cst_47 = arith.constant dense<0.000000e+00> : vector<4xf32>
    %150 = vector.multi_reduction <add>, %149, %cst_47 [0] : vector<32x4xf32> to vector<4xf32>
    %151 = vector.shape_cast %150 : vector<4xf32> to vector<1x4xf32>
    %152 = arith.addf %151, %138 : vector<1x4xf32>
    %cst_48 = arith.constant 0.000000e+00 : f32
    %153 = vector.broadcast %cst_48 : f32 to vector<1x4xf32>
    %154 = arith.maximumf %152, %153 : vector<1x4xf32>
    %155 = vector.broadcast %154 : vector<1x4xf32> to vector<32x4xf32>
    %156 = arith.mulf %139, %155 : vector<32x4xf32>
    %cst_49 = arith.constant dense<0.000000e+00> : vector<32xf32>
    %157 = vector.multi_reduction <add>, %156, %cst_49 [1] : vector<32x4xf32> to vector<32xf32>
    %158 = vector.shape_cast %157 : vector<32xf32> to vector<32x1xf32>
    %159 = arith.addf %158, %140 : vector<32x1xf32>
    %160 = arith.negf %159 : vector<32x1xf32>
    %161 = math.exp %160 : vector<32x1xf32>
    %cst_50 = arith.constant 1.000000e+00 : f32
    %162 = vector.broadcast %cst_50 : f32 to vector<32x1xf32>
    %163 = arith.addf %162, %161 : vector<32x1xf32>
    %164 = arith.divf %162, %163 : vector<32x1xf32>
    %165 = vector.broadcast %164 : vector<32x1xf32> to vector<32x512xf32>
    %166 = arith.mulf %136, %165 : vector<32x512xf32>
    %cst_51 = arith.constant dense<0.000000e+00> : vector<512xf32>
    %167 = vector.multi_reduction <add>, %166, %cst_51 [0] : vector<32x512xf32> to vector<512xf32>
    %168 = vector.shape_cast %167 : vector<512xf32> to vector<1x512xf32>
    %169 = vector.broadcast %168 : vector<1x512xf32> to vector<16x512xf32>
    %170 = arith.mulf %141, %169 : vector<16x512xf32>
    %171 = vector.extract_strided_slice %135 {offsets = [16, 0], sizes = [16, 512], strides = [1, 1]} : vector<32x512xf32> to vector<16x512xf32>
    %cst_52 = arith.constant dense<0.000000e+00> : vector<512xf32>
    %172 = vector.multi_reduction <add>, %171, %cst_52 [0] : vector<16x512xf32> to vector<512xf32>
    %173 = vector.shape_cast %172 : vector<512xf32> to vector<1x512xf32>
    %174 = vector.broadcast %173 : vector<1x512xf32> to vector<32x512xf32>
    %175 = arith.mulf %136, %174 : vector<32x512xf32>
    %cst_53 = arith.constant dense<0.000000e+00> : vector<32xf32>
    %176 = vector.multi_reduction <add>, %175, %cst_53 [1] : vector<32x512xf32> to vector<32xf32>
    %177 = vector.shape_cast %176 : vector<32xf32> to vector<32x1xf32>
    %178 = vector.broadcast %177 : vector<32x1xf32> to vector<32x4xf32>
    %179 = arith.mulf %178, %137 : vector<32x4xf32>
    %cst_54 = arith.constant dense<0.000000e+00> : vector<4xf32>
    %180 = vector.multi_reduction <add>, %179, %cst_54 [0] : vector<32x4xf32> to vector<4xf32>
    %181 = vector.shape_cast %180 : vector<4xf32> to vector<1x4xf32>
    %182 = arith.addf %181, %138 : vector<1x4xf32>
    %cst_55 = arith.constant 0.000000e+00 : f32
    %183 = vector.broadcast %cst_55 : f32 to vector<1x4xf32>
    %184 = arith.maximumf %182, %183 : vector<1x4xf32>
    %185 = vector.broadcast %184 : vector<1x4xf32> to vector<32x4xf32>
    %186 = arith.mulf %139, %185 : vector<32x4xf32>
    %cst_56 = arith.constant dense<0.000000e+00> : vector<32xf32>
    %187 = vector.multi_reduction <add>, %186, %cst_56 [1] : vector<32x4xf32> to vector<32xf32>
    %188 = vector.shape_cast %187 : vector<32xf32> to vector<32x1xf32>
    %189 = arith.addf %188, %140 : vector<32x1xf32>
    %190 = arith.negf %189 : vector<32x1xf32>
    %191 = math.exp %190 : vector<32x1xf32>
    %cst_57 = arith.constant 1.000000e+00 : f32
    %192 = vector.broadcast %cst_57 : f32 to vector<32x1xf32>
    %193 = arith.addf %192, %191 : vector<32x1xf32>
    %194 = arith.divf %192, %193 : vector<32x1xf32>
    %195 = vector.broadcast %194 : vector<32x1xf32> to vector<32x512xf32>
    %196 = arith.mulf %136, %195 : vector<32x512xf32>
    %cst_58 = arith.constant dense<0.000000e+00> : vector<512xf32>
    %197 = vector.multi_reduction <add>, %196, %cst_58 [0] : vector<32x512xf32> to vector<512xf32>
    %198 = vector.shape_cast %197 : vector<512xf32> to vector<1x512xf32>
    %199 = vector.broadcast %198 : vector<1x512xf32> to vector<16x512xf32>
    %200 = arith.mulf %171, %199 : vector<16x512xf32>
    %201 = tpu.concatenate %170, %200 in 0 : vector<16x512xf32>, vector<16x512xf32> -> vector<32x512xf32>
    %202 = arith.truncf %201 : vector<32x512xf32> to vector<32x512xbf16>
    %c0_59 = arith.constant 0 : index
    %c0_60 = arith.constant 0 : index
    %203 = vector.load %arg10[%c0_59, %c0_60] : memref<512x256xbf16, #tpu.memory_space<vmem>>, vector<512x256xbf16>
    %cst_61 = arith.constant dense<0.000000e+00> : vector<32x256xf32>
    %204 = tpu.matmul %202, %203, %cst_61 {dimension_numbers = #tpu.dot_dimension_numbers<[1], [0], [0], [1], [0, 0, 1, 1], [], []>} : vector<32x512xbf16>, vector<512x256xbf16>, vector<32x256xf32> -> vector<32x256xf32>
    %c0_62 = arith.constant 0 : index
    %c0_63 = arith.constant 0 : index
    %205 = vector.load %arg11[%c0_62, %c0_63] : memref<1x256xf32, #tpu.memory_space<vmem>>, vector<1x256xf32>
    %206 = vector.broadcast %205 : vector<1x256xf32> to vector<32x256xf32>
    %207 = arith.addf %204, %206 : vector<32x256xf32>
    %c0_64 = arith.constant 0 : index
    %c0_65 = arith.constant 0 : index
    %c0_66 = arith.constant 0 : index
    %208 = vector.load %arg1[%c0_64, %c0_65, %c0_66] : memref<2x16x256xf32, #tpu.memory_space<vmem>>, vector<2x16x256xf32>
    %209 = vector.shape_cast %208 : vector<2x16x256xf32> to vector<32x256xf32>
    %210 = arith.addf %207, %209 : vector<32x256xf32>
    %211 = vector.shape_cast %210 : vector<32x256xf32> to vector<2x16x256xf32>
    %c0_67 = arith.constant 0 : index
    %c0_68 = arith.constant 0 : index
    %c0_69 = arith.constant 0 : index
    %212 = vector.load %arg12[%c0_67, %c0_68, %c0_69] : memref<2x16x256xf32, #tpu.memory_space<vmem>>, vector<2x16x256xf32>
    tpu.vector_store %arg12[%c0_67, %c0_68, %c0_69], %211 {strides = array<i32>} : memref<2x16x256xf32, #tpu.memory_space<vmem>>, vector<2x16x256xf32>,
    return
  }
  func.func @transform_0(%arg0: i32) -> (i32, i32, i32) {
    %c0_i32 = arith.constant 0 : i32
    %c0_i32_0 = arith.constant 0 : i32
    %c0_i32_1 = arith.constant 0 : i32
    return %arg0, %c0_i32, %c0_i32_0 : i32, i32, i32
  }
  func.func @transform_1(%arg0: i32) -> (i32, i32) {
    %c0_i32 = arith.constant 0 : i32
    %c0_i32_0 = arith.constant 0 : i32
    %c0_i32_1 = arith.constant 0 : i32
    return %c0_i32, %c0_i32_0 : i32, i32
  }
  func.func @transform_2(%arg0: i32) -> (i32, i32) {
    %c0_i32 = arith.constant 0 : i32
    %c0_i32_0 = arith.constant 0 : i32
    %c0_i32_1 = arith.constant 0 : i32
    return %c0_i32, %c0_i32_0 : i32, i32
  }
  func.func @transform_3(%arg0: i32) -> (i32, i32) {
    %c0_i32 = arith.constant 0 : i32
    %c0_i32_0 = arith.constant 0 : i32
    %c0_i32_1 = arith.constant 0 : i32
    return %c0_i32, %c0_i32_0 : i32, i32
  }
  func.func @transform_4(%arg0: i32) -> (i32, i32) {
    %c0_i32 = arith.constant 0 : i32
    %c0_i32_0 = arith.constant 0 : i32
    %c0_i32_1 = arith.constant 0 : i32
    return %c0_i32, %c0_i32_0 : i32, i32
  }
  func.func @transform_5(%arg0: i32) -> (i32, i32) {
    %c0_i32 = arith.constant 0 : i32
    %c0_i32_0 = arith.constant 0 : i32
    %c0_i32_1 = arith.constant 0 : i32
    return %c0_i32, %c0_i32_0 : i32, i32
  }
  func.func @transform_6(%arg0: i32) -> (i32, i32) {
    %c0_i32 = arith.constant 0 : i32
    %c0_i32_0 = arith.constant 0 : i32
    %c0_i32_1 = arith.constant 0 : i32
    return %c0_i32, %c0_i32_0 : i32, i32
  }
  func.func @transform_7(%arg0: i32) -> (i32, i32) {
    %c0_i32 = arith.constant 0 : i32
    %c0_i32_0 = arith.constant 0 : i32
    %c0_i32_1 = arith.constant 0 : i32
    return %c0_i32, %c0_i32_0 : i32, i32
  }
  func.func @transform_8(%arg0: i32) -> (i32, i32) {
    %c0_i32 = arith.constant 0 : i32
    %c0_i32_0 = arith.constant 0 : i32
    %c0_i32_1 = arith.constant 0 : i32
    return %c0_i32, %c0_i32_0 : i32, i32
  }
  func.func @transform_9(%arg0: i32) -> (i32, i32) {
    %c0_i32 = arith.constant 0 : i32
    %c0_i32_0 = arith.constant 0 : i32
    %c0_i32_1 = arith.constant 0 : i32
    return %c0_i32, %c0_i32_0 : i32, i32
  }
  func.func @transform_10(%arg0: i32) -> (i32, i32) {
    %c0_i32 = arith.constant 0 : i32
    %c0_i32_0 = arith.constant 0 : i32
    %c0_i32_1 = arith.constant 0 : i32
    return %c0_i32, %c0_i32_0 : i32, i32
  }
  func.func @transform_11(%arg0: i32) -> (i32, i32, i32) {
    %c0_i32 = arith.constant 0 : i32
    %c0_i32_0 = arith.constant 0 : i32
    %c0_i32_1 = arith.constant 0 : i32
    return %arg0, %c0_i32, %c0_i32_0 : i32, i32, i32
  }
}

</mosaic_0001>

<bundles_post_ra>
// kernel: tpu_custom_call.1
= control target key start
LH: loop header
LB: loop body
LE: loop exit
PB: predicated region body
PF: predicated region fallthrough
CT: control target
= control target key end

     0   :  { %16 = vsyncpa [#allocation3], 0  ;;  %s5240_s0 = inlined_call_operand.hbm [shape: f32[2,16,256], index: 0, kind: input, shape index: {}]   ;;  %s5241_s1 = inlined_call_operand.hbm [shape: bf16[256,512], index: 1, kind: input, shape index: {}]   ;;  %s5242_s2 = inlined_call_operand.vmem [shape: f32[1,512], index: 2, kind: input, shape index: {}]   ;;  %s5243_s3 = inlined_call_operand.hbm [shape: f32[10,512], index: 3, kind: input, shape index: {}]   ;;  %s5244_s4 = inlined_call_operand.vmem [shape: f32[32,4], index: 4, kind: input, shape index: {}]   ;;  %s5245_s5 = inlined_call_operand.vmem [shape: f32[1,4], index: 5, kind: input, shape index: {}]   ;;  %s5246_s6 = inlined_call_operand.vmem [shape: f32[32,4], index: 6, kind: input, shape index: {}]   ;;  %s5247_s7 = inlined_call_operand.vmem [shape: f32[32,1], index: 7, kind: input, shape index: {}]   ;;  %s5248_s8 = inlined_call_operand.vmem [shape: f32[32,512], index: 8, kind: input, shape index: {}]   ;;  %s5249_s9 = inlined_call_operand.hbm [shape: bf16[512,256], index: 9, kind: input, shape index: {}]   ;;  %s5250_s10 = inlined_call_operand.vmem [shape: f32[1,256], index: 10, kind: input, shape index: {}]   ;;  %s5251_s11 = inlined_call_operand.hbm [shape: f32[2,16,256], index: 11, kind: output, shape index: {}]  }
   0x1   :  { %17 = vsyncpa [#allocation6], 0 }
   0x2   :  { %18 = vsyncpa [#allocation9], 0 }
   0x3   :  { %19 = vsyncpa [#allocation4], 0  ;;  %s3274_s17 = smov [#allocation5]   ;;  %s3275_s19 = smov [#allocation2]  }
   0x4   :  { %s37_s18 = sshll.u32 %s3274_s17, 4  ;;  %s25_s20 = sshll.u32 %s3275_s19, 4  ;;  %s38_s18 = int_to_ptr.vmem [resolvable:$true] %s37_s18  ;;  %s3347_s20 = int_to_ptr.vmem [resolvable:$true] %s25_s20 }
   0x5   :  { %s3156_s23 = scalar_lea.hbm %s5241_s1, 8192 }
   0x6   :  { %p3157_p0 = scmp.ne.s32.totalorder %s5241_s1, %s3156_s23  ;;  %p3160_p1 = scmp.lt.u32.totalorder %s3156_s23, %s5241_s1 }
   0x8   :  { %p3162_p2 = pnand %p3160_p1, %p3157_p0 }
   0xa   :  { %3165 = shalt.err (!%p3162_p2)
}
   0xb   :  { %s3166_s28 = scalar_lea.vmem %s38_s18, 8192  ;;  %p3171_p4 = scmp.lt.s32.totalorder %s38_s18, %s38_s18 }
   0xc   :  { %p3167_p3 = scmp.ne.s32.totalorder %s38_s18, %s3166_s28  ;;  %p3172_p5 = scmp.lt.s32.totalorder %s3166_s28, %s3166_s28 }
   0xe   :  { %p3173_p6 = por %p3172_p5, %p3171_p4 }
  0x10   :  { %p3174_p7 = pnand %p3173_p6, %p3167_p3 }
  0x12   :  { %3177 = shalt.err (!%p3174_p7)
}
  0x13   :  { %s3276_s29 = smov 256   ;;  %s3277_s30 = smov 16  }
  0x14   :  { %43 = dma.hbm_to_vmem [thread:$0]  %s5241_s1, 8192, %s38_s18, [#allocation6], %s3276_s29, %s3276_s29, %s3277_s30  }
  0x15   :  { %s3178_s16 = scalar_lea.hbm %s5240_s0, 1024 }
  0x16   :  { %p3179_p8 = scmp.ne.s32.totalorder %s5240_s0, %s3178_s16  ;;  %p3182_p9 = scmp.lt.u32.totalorder %s3178_s16, %s5240_s0 }
  0x18   :  { %p3184_p10 = pnand %p3182_p9, %p3179_p8 }
  0x1a   :  { %3187 = shalt.err (!%p3184_p10)
}
  0x1b   :  { %s3188_s23 = scalar_lea.vmem %s3347_s20, 1024  ;;  %p3193_p12 = scmp.lt.s32.totalorder %s3347_s20, %s3347_s20 }
  0x1c   :  { %p3189_p11 = scmp.ne.s32.totalorder %s3347_s20, %s3188_s23  ;;  %p3194_p13 = scmp.lt.s32.totalorder %s3188_s23, %s3188_s23 }
  0x1e   :  { %p3195_p0 = por %p3194_p13, %p3193_p12 }
  0x20   :  { %p3196_p1 = pnand %p3195_p0, %p3189_p11 }
  0x22   :  { %3199 = shalt.err (!%p3196_p1)
}
  0x23   :  { %31 = dma.hbm_to_vmem [thread:$0]  %s5240_s0, 1024, %s3347_s20, [#allocation3], %s3276_s29, %s3276_s29, %s3277_s30  }
  0x24   :  { %s3278_s24 = smov [#allocation7]   ;;  %s3200_s28 = scalar_lea.hbm %s5243_s3, 1024 }
  0x25   :  { %s51_s25 = sshll.u32 %s3278_s24, 4  ;;  %p3201_p2 = scmp.ne.s32.totalorder %s5243_s3, %s3200_s28  ;;  %s52_s25 = int_to_ptr.vmem [resolvable:$true] %s51_s25 }
  0x26   :  { %p3204_p3 = scmp.lt.u32.totalorder %s3200_s28, %s5243_s3 }
  0x28   :  { %p3206_p4 = pnand %p3204_p3, %p3201_p2 }
  0x2a   :  { %3209 = shalt.err (!%p3206_p4)
}
  0x2b   :  { %s3210_s16 = scalar_lea.vmem %s52_s25, 1024  ;;  %p3215_p6 = scmp.lt.s32.totalorder %s52_s25, %s52_s25 }
  0x2c   :  { %p3211_p5 = scmp.ne.s32.totalorder %s52_s25, %s3210_s16  ;;  %p3216_p7 = scmp.lt.s32.totalorder %s3210_s16, %s3210_s16 }
  0x2e   :  { %p3217_p8 = por %p3216_p7, %p3215_p6 }
  0x30   :  { %p3218_p9 = pnand %p3217_p8, %p3211_p5 }
  0x32   :  { %3221 = shalt.err (!%p3218_p9)
}
  0x33   :  { %s3279_s0 = smov 512   ;;  %s3280_s20 = smov 32  }
  0x34   :  { %57 = dma.hbm_to_vmem [thread:$0]  %s5243_s3, 1024, %s52_s25, [#allocation6], %s3279_s0, %s3279_s0, %s3280_s20  }
  0x35   :  { %s3281_s21 = smov [#allocation8]   ;;  %s3222_s18 = scalar_lea.hbm %s5249_s9, 8192 }
  0x36   :  { %s73_s22 = sshll.u32 %s3281_s21, 4  ;;  %p3223_p10 = scmp.ne.s32.totalorder %s5249_s9, %s3222_s18  ;;  %s74_s22 = int_to_ptr.vmem [resolvable:$true] %s73_s22 }
  0x37   :  { %p3226_p11 = scmp.lt.u32.totalorder %s3222_s18, %s5249_s9 }
  0x39   :  { %p3228_p12 = pnand %p3226_p11, %p3223_p10 }
  0x3b   :  { %3231 = shalt.err (!%p3228_p12)
}
  0x3c   :  { %s3232_s12 = scalar_lea.vmem %s74_s22, 8192  ;;  %p3237_p0 = scmp.lt.s32.totalorder %s74_s22, %s74_s22 }
  0x3d   :  { %p3233_p13 = scmp.ne.s32.totalorder %s74_s22, %s3232_s12  ;;  %p3238_p1 = scmp.lt.s32.totalorder %s3232_s12, %s3232_s12 }
  0x3f   :  { %p3239_p2 = por %p3238_p1, %p3237_p0 }
  0x41   :  { %p3240_p3 = pnand %p3239_p2, %p3233_p13 }
  0x43   :  { %3243 = shalt.err (!%p3240_p3)
}
  0x44   :  { %s3282_s3 = smov 128   ;;  %s3283_s25 = smov 8  }
  0x45   :  { %79 = dma.hbm_to_vmem [thread:$0]  %s5249_s9, 8192, %s74_s22, [#allocation9], %s3282_s3, %s3282_s3, %s3283_s25  }
  0x46   :  { %3266 = dma.done.wait [#allocation3], 1024  }
  0x47   :  { %3267 = vsyncadd [#allocation3], 4294966272 }
  0x48   :  { %3268 = dma.done.wait [#allocation6], 9216  }
  0x49   :  { %3269 = vsyncadd [#allocation6], 4294958080 }
  0x4a   :  { %3270 = dma.done.wait [#allocation9], 8192  }
  0x4b   :  { %3271 = vsyncadd [#allocation9], 4294959104  ;;  %v2908_v0 = vld [vmem:[#allocation5 + $0x4] ss:$16 sps:$4 sm:$0xff]   ;;  %v2910_v1 = vld [vmem:[#allocation5] ss:$16 sps:$4 sm:$0xff]  }
  0x4c   :  { %512 = vmatprep.subr.bf16.mxu1 %v2908_v0  ;;  %v2911_v2 = vld [vmem:[#allocation5 + $0x24] ss:$16 sps:$4 sm:$0xff]   ;;  %v2913_v3 = vld [vmem:[#allocation5 + $0x20] ss:$16 sps:$4 sm:$0xff]   ;;  %v95_v13 = vld [vmem:[#allocation2 + $0x8] sm:$0xff]  ;;  %vm1038_vm0 = vcmask 1040384  }
  0x4d   :  { %513 = vmatpush1.bf16.msra.mxu1 %v2910_v1  ;;  %v2914_v4 = vld [vmem:[#allocation5 + $0x44] ss:$16 sps:$4 sm:$0xff]   ;;  %v2916_v5 = vld [vmem:[#allocation5 + $0x40] ss:$16 sps:$4 sm:$0xff]   ;;  %v97_v14 = vld [vmem:[#allocation2 + $0x18] sm:$0xff]  ;;  %vm1383_vm1 = vcmask 1046528  }
  0x4e   :  { %514 = vmatprep.subr.bf16.mxu1 %v2911_v2  ;;  %v2917_v6 = vld [vmem:[#allocation5 + $0x64] ss:$16 sps:$4 sm:$0xff]   ;;  %v2919_v7 = vld [vmem:[#allocation5 + $0x60] ss:$16 sps:$4 sm:$0xff]   ;;  %v3409_v15 = vpack.c.bf16 %v97_v14, %v95_v13  ;;  %v2958_v37 = vld [vmem:[#allocation5 + $0xc] ss:$16 sps:$4 sm:$0xff]  }
  0x4f   :  { %v2920_v8 = vld [vmem:[#allocation5 + $0x84] ss:$16 sps:$4 sm:$0xff]   ;;  %v2922_v9 = vld [vmem:[#allocation5 + $0x80] ss:$16 sps:$4 sm:$0xff]   ;;  %v99_v38 = vld [vmem:[#allocation2 + $0x28] sm:$0xff]  ;;  %vm1841_vm10 = vcmask 31744  }
  0x50   :  { %v2923_v10 = vld [vmem:[#allocation5 + $0xa4] ss:$16 sps:$4 sm:$0xff]   ;;  %v2925_v11 = vld [vmem:[#allocation5 + $0xa0] ss:$16 sps:$4 sm:$0xff]   ;;  %544 = vmatprep.mubr.bf16.mxu1 %v3409_v15  ;;  %v101_v39 = vld [vmem:[#allocation2 + $0x38] sm:$0xff] }
  0x51   :  { %515 = vmatpush1.bf16.msra.mxu1 %v2913_v3  ;;  %v2926_v12 = vld [vmem:[#allocation5 + $0xc4] ss:$16 sps:$4 sm:$0xff]   ;;  %v2928_v16 = vld [vmem:[#allocation5 + $0xc0] ss:$16 sps:$4 sm:$0xff]   ;;  %v2956_v40 = vld [vmem:[#allocation5 + $0x8] ss:$16 sps:$4 sm:$0xff]   ;;  %v3414_v43 = vpack.c.bf16 %v101_v39, %v99_v38 }
  0x52   :  { %516 = vmatprep.subr.bf16.mxu1 %v2914_v4  ;;  %v2929_v17 = vld [vmem:[#allocation5 + $0xe4] ss:$16 sps:$4 sm:$0xff]   ;;  %v2931_v18 = vld [vmem:[#allocation5 + $0xe0] ss:$16 sps:$4 sm:$0xff]   ;;  %v2961_v42 = vld [vmem:[#allocation5 + $0x2c] ss:$16 sps:$4 sm:$0xff]  }
  0x53   :  { %v2932_v19 = vld [vmem:[#allocation5 + $0x104] ss:$16 sps:$4 sm:$0xff]   ;;  %v2934_v20 = vld [vmem:[#allocation5 + $0x100] ss:$16 sps:$4 sm:$0xff]   ;;  %v2959_v44 = vld [vmem:[#allocation5 + $0x28] ss:$16 sps:$4 sm:$0xff]  }
  0x54   :  { %v2935_v21 = vld [vmem:[#allocation5 + $0x124] ss:$16 sps:$4 sm:$0xff]   ;;  %v2937_v22 = vld [vmem:[#allocation5 + $0x120] ss:$16 sps:$4 sm:$0xff]   ;;  %v2964_v47 = vld [vmem:[#allocation5 + $0x4c] ss:$16 sps:$4 sm:$0xff]  }
  0x55   :  { %517 = vmatpush1.bf16.msra.mxu1 %v2916_v5  ;;  %v2938_v23 = vld [vmem:[#allocation5 + $0x144] ss:$16 sps:$4 sm:$0xff]   ;;  %v2940_v24 = vld [vmem:[#allocation5 + $0x140] ss:$16 sps:$4 sm:$0xff]   ;;  %v2962_v49 = vld [vmem:[#allocation5 + $0x48] ss:$16 sps:$4 sm:$0xff]  }
  0x56   :  { %518 = vmatprep.subr.bf16.mxu1 %v2917_v6  ;;  %v2941_v25 = vld [vmem:[#allocation5 + $0x164] ss:$16 sps:$4 sm:$0xff]   ;;  %v2943_v26 = vld [vmem:[#allocation5 + $0x160] ss:$16 sps:$4 sm:$0xff]   ;;  %v2967_v50 = vld [vmem:[#allocation5 + $0x6c] ss:$16 sps:$4 sm:$0xff]  }
  0x57   :  { %v2944_v27 = vld [vmem:[#allocation5 + $0x184] ss:$16 sps:$4 sm:$0xff]   ;;  %v2946_v28 = vld [vmem:[#allocation5 + $0x180] ss:$16 sps:$4 sm:$0xff]   ;;  %v2965_v51 = vld [vmem:[#allocation5 + $0x68] ss:$16 sps:$4 sm:$0xff]  }
  0x58   :  { %v2947_v29 = vld [vmem:[#allocation5 + $0x1a4] ss:$16 sps:$4 sm:$0xff]   ;;  %v2949_v30 = vld [vmem:[#allocation5 + $0x1a0] ss:$16 sps:$4 sm:$0xff]   ;;  %v2970_v52 = vld [vmem:[#allocation5 + $0x8c] ss:$16 sps:$4 sm:$0xff]  }
  0x59   :  { %519 = vmatpush1.bf16.msra.mxu1 %v2919_v7  ;;  %v2950_v31 = vld [vmem:[#allocation5 + $0x1c4] ss:$16 sps:$4 sm:$0xff]   ;;  %v2952_v32 = vld [vmem:[#allocation5 + $0x1c0] ss:$16 sps:$4 sm:$0xff]   ;;  %v2968_v53 = vld [vmem:[#allocation5 + $0x88] ss:$16 sps:$4 sm:$0xff]  }
  0x5a   :  { %520 = vmatprep.subr.bf16.mxu1 %v2920_v8  ;;  %v2953_v33 = vld [vmem:[#allocation5 + $0x1e4] ss:$16 sps:$4 sm:$0xff]   ;;  %v2955_v34 = vld [vmem:[#allocation5 + $0x1e0] ss:$16 sps:$4 sm:$0xff]   ;;  %v2973_v54 = vld [vmem:[#allocation5 + $0xac] ss:$16 sps:$4 sm:$0xff]  }
  0x5b   :  { %v94_v35 = vld [vmem:[#allocation2] sm:$0xff]  ;;  %v96_v36 = vld [vmem:[#allocation2 + $0x10] sm:$0xff]  ;;  %v2971_v55 = vld [vmem:[#allocation5 + $0xa8] ss:$16 sps:$4 sm:$0xff]  }
  0x5c   :  { %v3412_v41 = vpack.c.bf16 %v96_v36, %v94_v35  ;;  %v98_v45 = vld [vmem:[#allocation2 + $0x20] sm:$0xff]  ;;  %v100_v46 = vld [vmem:[#allocation2 + $0x30] sm:$0xff]  ;;  %v2976_v56 = vld [vmem:[#allocation5 + $0xcc] ss:$16 sps:$4 sm:$0xff]  }
  0x5d   :  { %521 = vmatpush1.bf16.msra.mxu1 %v2922_v9  ;;  %v104_v48 = vpack.c.bf16 %v100_v46, %v98_v45  ;;  %v2974_v57 = vld [vmem:[#allocation5 + $0xc8] ss:$16 sps:$4 sm:$0xff]   ;;  %v2979_v58 = vld [vmem:[#allocation5 + $0xec] ss:$16 sps:$4 sm:$0xff]  }
  0x5e   :  { %522 = vmatprep.subr.bf16.mxu1 %v2923_v10  ;;  %v2977_v59 = vld [vmem:[#allocation5 + $0xe8] ss:$16 sps:$4 sm:$0xff]   ;;  %v2982_v60 = vld [vmem:[#allocation5 + $0x10c] ss:$16 sps:$4 sm:$0xff]  }
  0x5f   :  { %v2980_v61 = vld [vmem:[#allocation5 + $0x108] ss:$16 sps:$4 sm:$0xff]   ;;  %v2985_v62 = vld [vmem:[#allocation5 + $0x12c] ss:$16 sps:$4 sm:$0xff]  }
  0x60   :  { %v2983_v63 = vld [vmem:[#allocation5 + $0x128] ss:$16 sps:$4 sm:$0xff]   ;;  %v2988_v0 = vld [vmem:[#allocation5 + $0x14c] ss:$16 sps:$4 sm:$0xff]  }
  0x61   :  { %523 = vmatpush1.bf16.msra.mxu1 %v2925_v11  ;;  %v2986_v1 = vld [vmem:[#allocation5 + $0x148] ss:$16 sps:$4 sm:$0xff]   ;;  %v2991_v2 = vld [vmem:[#allocation5 + $0x16c] ss:$16 sps:$4 sm:$0xff]  }
  0x62   :  { %524 = vmatprep.subr.bf16.mxu1 %v2926_v12  ;;  %v2989_v3 = vld [vmem:[#allocation5 + $0x168] ss:$16 sps:$4 sm:$0xff]   ;;  %v2994_v4 = vld [vmem:[#allocation5 + $0x18c] ss:$16 sps:$4 sm:$0xff]   ;;  %v5254_v12 = vlaneseq }
  0x63   :  { %v2992_v5 = vld [vmem:[#allocation5 + $0x188] ss:$16 sps:$4 sm:$0xff]   ;;  %v2997_v6 = vld [vmem:[#allocation5 + $0x1ac] ss:$16 sps:$4 sm:$0xff]  }
  0x64   :  { %v2995_v7 = vld [vmem:[#allocation5 + $0x1a8] ss:$16 sps:$4 sm:$0xff]   ;;  %v3000_v8 = vld [vmem:[#allocation5 + $0x1cc] ss:$16 sps:$4 sm:$0xff]   ;;  %v3422_v13 = vshrl.u32 %v5254_v12, 7 }
  0x65   :  { %525 = vmatpush1.bf16.msra.mxu1 %v2928_v16  ;;  %v2998_v9 = vld [vmem:[#allocation5 + $0x1c8] ss:$16 sps:$4 sm:$0xff]   ;;  %v3003_v10 = vld [vmem:[#allocation5 + $0x1ec] ss:$16 sps:$4 sm:$0xff]  }
  0x66   :  { %526 = vmatprep.subr.bf16.mxu1 %v2929_v17  ;;  %v3001_v11 = vld [vmem:[#allocation5 + $0x1e8] ss:$16 sps:$4 sm:$0xff]   ;;  %v3425_v14 = vsub.s32 0, %v3422_v13  ;;  %v3433_v16 = vsub.s32 1, %v3422_v13 }
  0x68   :  { %5426 = vst [vmem:[#allocation15_spill] sm:$0xff] %v3425_v14  ;;  %5427 = vst [vmem:[#allocation16_spill] sm:$0xff] %v3433_v16 }
  0x69   :  { %527 = vmatpush1.bf16.msra.mxu1 %v2931_v18 }
  0x6a   :  { %528 = vmatprep.subr.bf16.mxu1 %v2932_v19 }
  0x6d   :  { %529 = vmatpush1.bf16.msra.mxu1 %v2934_v20 }
  0x6e   :  { %530 = vmatprep.subr.bf16.mxu1 %v2935_v21 }
  0x71   :  { %531 = vmatpush1.bf16.msra.mxu1 %v2937_v22 }
  0x72   :  { %532 = vmatprep.subr.bf16.mxu1 %v2938_v23 }
  0x75   :  { %533 = vmatpush1.bf16.msra.mxu1 %v2940_v24 }
  0x76   :  { %534 = vmatprep.subr.bf16.mxu1 %v2941_v25 }
  0x79   :  { %535 = vmatpush1.bf16.msra.mxu1 %v2943_v26 }
  0x7a   :  { %536 = vmatprep.subr.bf16.mxu1 %v2944_v27 }
  0x7d   :  { %537 = vmatpush1.bf16.msra.mxu1 %v2946_v28 }
  0x7e   :  { %538 = vmatprep.subr.bf16.mxu1 %v2947_v29 }
  0x81   :  { %539 = vmatpush1.bf16.msra.mxu1 %v2949_v30 }
  0x82   :  { %540 = vmatprep.subr.bf16.mxu1 %v2950_v31 }
  0x85   :  { %541 = vmatpush1.bf16.msra.mxu1 %v2952_v32 }
  0x86   :  { %542 = vmatprep.subr.bf16.mxu1 %v2953_v33 }
  0x89   :  { %543 = vmatpush1.bf16.msra.mxu1 %v2955_v34 }
  0x8a   :  { %565 = vmatprep.subr.bf16.mxu1 %v2958_v37 }
  0x8c   :  { %545 = vmatmul.mubr.bf16.vlgmr.msra.gmra.mrb[0].mxu1 %v3412_v41 }
  0x8d   :  { %566 = vmatpush1.bf16.msra.mxu1 %v2956_v40  ;;  %554 = vmatprep.mubr.bf16.mxu1 %v3414_v43 }
  0x8e   :  { %567 = vmatprep.subr.bf16.mxu1 %v2961_v42 }
  0x91   :  { %568 = vmatpush1.bf16.msra.mxu1 %v2959_v44 }
  0x92   :  { %569 = vmatprep.subr.bf16.mxu1 %v2964_v47 }
  0x94   :  { %555 = vmatmul.mubr.bf16.gmra.mrb[4].mxu1 %v104_v48 }
  0x95   :  { %570 = vmatpush1.bf16.msra.mxu1 %v2962_v49  ;;  %597 = vmatprep.mubr.bf16.mxu1 %v3409_v15  ;;  %v3430_v15 = vld [vmem:[%s5242_s2] sm:$0xf]  ;;  %s3284_s2 = smov 96  }
  0x96   :  { %571 = vmatprep.subr.bf16.mxu1 %v2967_v50  ;;  %v175_v17 = vrot.slane %v3430_v15, %v3425_v14  ;;  %v179_v18 = vrot.slane %v3430_v15, %v3433_v16 }
  0x99   :  { %572 = vmatpush1.bf16.msra.mxu1 %v2965_v51 }
  0x9a   :  { %573 = vmatprep.subr.bf16.mxu1 %v2970_v52 }
  0x9d   :  { %574 = vmatpush1.bf16.msra.mxu1 %v2968_v53 }
  0x9e   :  { %575 = vmatprep.subr.bf16.mxu1 %v2973_v54 }
  0xa1   :  { %576 = vmatpush1.bf16.msra.mxu1 %v2971_v55 }
  0xa2   :  { %577 = vmatprep.subr.bf16.mxu1 %v2976_v56 }
  0xa5   :  { %578 = vmatpush1.bf16.msra.mxu1 %v2974_v57 }
  0xa6   :  { %579 = vmatprep.subr.bf16.mxu1 %v2979_v58 }
  0xa9   :  { %580 = vmatpush1.bf16.msra.mxu1 %v2977_v59 }
  0xaa   :  { %581 = vmatprep.subr.bf16.mxu1 %v2982_v60 }
  0xad   :  { %582 = vmatpush1.bf16.msra.mxu1 %v2980_v61 }
  0xae   :  { %583 = vmatprep.subr.bf16.mxu1 %v2985_v62 }
  0xb1   :  { %584 = vmatpush1.bf16.msra.mxu1 %v2983_v63 }
  0xb2   :  { %585 = vmatprep.subr.bf16.mxu1 %v2988_v0  ;;  %v664_v0 = vand.u32 15, %v3422_v13 }
  0xb4   :  { %vm3516_vm2 = vcmp.ne.s32.totalorder %v664_v0, 0 }
  0xb5   :  { %586 = vmatpush1.bf16.msra.mxu1 %v2986_v1 }
  0xb6   :  { %587 = vmatprep.subr.bf16.mxu1 %v2991_v2 }
  0xb9   :  { %588 = vmatpush1.bf16.msra.mxu1 %v2989_v3 }
  0xba   :  { %589 = vmatprep.subr.bf16.mxu1 %v2994_v4 }
  0xbd   :  { %590 = vmatpush1.bf16.msra.mxu1 %v2992_v5 }
  0xbe   :  { %591 = vmatprep.subr.bf16.mxu1 %v2997_v6 }
  0xc1   :  { %592 = vmatpush1.bf16.msra.mxu1 %v2995_v7 }
  0xc2   :  { %593 = vmatprep.subr.bf16.mxu1 %v3000_v8 }
  0xc5   :  { %594 = vmatpush1.bf16.msra.mxu1 %v2998_v9 }
  0xc6   :  { %595 = vmatprep.subr.bf16.mxu1 %v3003_v10 }
  0xc9   :  { %596 = vmatpush1.bf16.msra.mxu1 %v3001_v11 }
  0xcc   :  { %598 = vmatmul.mubr.bf16.vlgmr.msra.gmra.mrb[8].mxu1 %v3412_v41 }
  0xcd   :  { %607 = vmatprep.mubr.bf16.mxu1 %v3414_v43 }
  0xd4   :  { %608 = vmatmul.mubr.bf16.gmra.mrb[12].mxu1 %v104_v48 }
 0x15f   :  { %v546_v19 = vpop.f32.mrb[0].mxu1 }
 0x160   :  { %v547_v20 = vadd.f32 %v546_v19, %v175_v17  ;;  %v548_v21 = vpop.f32.mrb[1].mxu1 }
 0x161   :  { %v549_v22 = vadd.f32 %v548_v21, %v179_v18  ;;  %v550_v23 = vpop.f32.mrb[2].mxu1 }
 0x162   :  { %v3439_v24 = vmax.f32 %v547_v20, 0.0  ;;  %v551_v25 = vadd.f32 %v550_v23, %v175_v17  ;;  %v552_v26 = vpop.f32.mrb[3].mxu1 }
 0x163   :  { %v3441_v27 = vmax.f32 %v549_v22, 0.0  ;;  %v553_v28 = vadd.f32 %v552_v26, %v179_v18  ;;  %v3586_v22 = vsub.s32 2, %v3422_v13 }
 0x164   :  { %v3443_v29 = vmax.f32 %v551_v25, 0.0  ;;  %780 = vrot.lane.b32.xlu0 %v3439_v24, %s3280_s20  ;;  %v1039_v31 = vrot.slane %v3439_v24, 7  ;;  %v1384_v41 = vrot.slane %v3439_v24, 1  ;;  %v3593_v25 = vsub.s32 3, %v3422_v13 }
 0x165   :  { %v3447_v30 = vmax.f32 %v553_v28, 0.0  ;;  %v1040_v35 = vrot.slane %v3441_v27, 7  ;;  %v1387_v45 = vrot.slane %v3441_v27, 1  ;;  %v183_v26 = vrot.slane %v3430_v15, %v3586_v22 }
 0x166   :  { %903 = vrot.lane.b32.xlu1 %v3443_v29, %s3284_s2  ;;  %v1043_v32 = vrot.slane %v3443_v29, 7  ;;  %v1385_v33 = vrot.slane %v3443_v29, 1  ;;  %v1083_v7 = vsel %vm1038_vm0, 0.0, %v1039_v31  ;;  %v658_v28 = vadd.s32 16, %v3422_v13 }
 0x167   :  { %v556_v34 = vpop.f32.mrb[4].mxu1  ;;  %v1045_v36 = vrot.slane %v3447_v30, 7  ;;  %v1388_v37 = vrot.slane %v3447_v30, 1  ;;  %v3535_v10 = vsel %vm3516_vm2, %v1083_v7, 0.0  ;;  %v1084_v11 = vsel %vm1038_vm0, 0.0, %v1040_v35 }
 0x168   :  { %v557_v38 = vadd.f32 %v556_v34, %v175_v17  ;;  %v558_v39 = vpop.f32.mrb[5].mxu1  ;;  %901 = vrot.lane.b32.xlu0 %v3439_v24, %s3284_s2  ;;  %v3460_v40 = vsel %vm1038_vm0, %v1039_v31, %v1043_v32  ;;  %v3472_v49 = vsel %vm1383_vm1, %v1384_v41, %v1385_v33  ;;  %v187_v31 = vrot.slane %v3430_v15, %v3593_v25 }
 0x169   :  { %v559_v42 = vadd.f32 %v558_v39, %v179_v18  ;;  %v560_v43 = vpop.f32.mrb[6].mxu1  ;;  %v3464_v44 = vsel %vm1038_vm0, %v1040_v35, %v1045_v36  ;;  %v3477_v52 = vsel %vm1383_vm1, %v1387_v45, %v1388_v37  ;;  %v678_v35 = vand.u32 15, %v658_v28 }
 0x16a   :  { %v3467_v46 = vmax.f32 %v557_v38, 0.0  ;;  %790 = vrot.lane.b32.xlu1 %v3447_v30, %s3280_s20  ;;  %v561_v47 = vadd.f32 %v560_v43, %v175_v17  ;;  %v562_v48 = vpop.f32.mrb[7].mxu1  ;;  %v3548_v17 = vsel %vm3516_vm2, %v1084_v11, 0.0 }
 0x16b   :  { %v3474_v50 = vmax.f32 %v559_v42, 0.0  ;;  %v563_v51 = vadd.f32 %v562_v48, %v179_v18  ;;  %v657_v18 = vadd.s32 8, %v3422_v13  ;;  %vm3618_vm4 = vcmp.ne.s32.totalorder %v678_v35, 0 }
 0x16c   :  { %5428 = vst [vmem:[#allocation17_spill] sm:$0xff] %v3467_v46  ;;  %788 = vrot.lane.b32.xlu0 %v3441_v27, %s3280_s20  ;;  %v3481_v53 = vmax.f32 %v561_v47, 0.0  ;;  %v1396_v54 = vrot.slane %v3467_v46, 1  ;;  %v1051_v55 = vrot.slane %v3467_v46, 7 }
 0x16d   :  { %v3485_v56 = vmax.f32 %v563_v51, 0.0  ;;  %v1398_v57 = vrot.slane %v3474_v50, 1  ;;  %v1053_v58 = vrot.slane %v3474_v50, 7  ;;  %v671_v19 = vand.u32 15, %v657_v18 }
 0x16e   :  { %5429 = vst [vmem:[#allocation18_spill] sm:$0xff] %v3481_v53  ;;  %911 = vrot.lane.b32.xlu1 %v3447_v30, %s3284_s2  ;;  %v1397_v59 = vsel %vm1383_vm1, %v1385_v33, %v1396_v54  ;;  %v1059_v60 = vrot.slane %v3481_v53, 7  ;;  %v3494_v61 = vsel %vm1038_vm0, %v1043_v32, %v1051_v55  ;;  %v5256_v4 = vrot.slane %v3481_v53, 1 }
 0x16f   :  { %v1399_v62 = vsel %vm1383_vm1, %v1388_v37, %v1398_v57  ;;  %v1061_v63 = vrot.slane %v3485_v56, 7  ;;  %v3508_v3 = vsel %vm1038_vm0, %v1045_v36, %v1053_v58  ;;  %v5255_v5 = vrot.slane %v3485_v56, 1 }
 0x170   :  { %909 = vrot.lane.b32.xlu0 %v3441_v27, %s3284_s2  ;;  %v3502_v1 = vsel %vm1038_vm0, %v1051_v55, %v1059_v60  ;;  %v3524_v8 = vsel %vm1383_vm1, %v1396_v54, %v5256_v4  ;;  %vm3567_vm3 = vcmp.ne.s32.totalorder %v671_v19, 15  ;;  %v659_v4 = vadd.s32 24, %v3422_v13 }
 0x171   :  { %5430 = vst [vmem:[#allocation19_spill] sm:$0xff] %v3502_v1  ;;  %v3505_v2 = vsel %vm1038_vm0, %v1053_v58, %v1061_v63  ;;  %5434 = vst [vmem:[#allocation21_spill] sm:$0xff] %v3524_v8  ;;  %v3529_v9 = vsel %vm1383_vm1, %v1398_v57, %v5255_v5  ;;  %v3575_v21 = vsel %vm3567_vm3, %v1397_v59, 0.0  ;;  %v3590_v23 = vsel %vm3567_vm3, %v1399_v62, 0.0 }
 0x172   :  { %5431 = vst [vmem:[#allocation20_spill] sm:$0xff] %v3505_v2  ;;  %1161 = vrot.lane.b32.xlu1 %v3460_v40, %s3280_s20  ;;  %5435 = vst [vmem:[#allocation22_spill] sm:$0xff] %v3529_v9  ;;  %v3634_v59 = vsel %vm3618_vm4, %v3494_v61, 0.0 }
 0x173   :  { %5441 = vst [vmem:[#allocation24_spill] sm:$0xff] %v3634_v59 }
 0x174   :  { %782 = vrot.lane.b32.xlu0 %v3443_v29, %s3280_s20 }
 0x176   :  { %1273 = vrot.lane.b32.xlu1 %v3460_v40, %s3284_s2 }
 0x178   :  { %1159 = vrot.lane.b32.xlu0 %v3535_v10, %s3280_s20 }
 0x17a   :  { %1169 = vrot.lane.b32.xlu1 %v3464_v44, %s3280_s20 }
 0x17c   :  { %1271 = vrot.lane.b32.xlu0 %v3535_v10, %s3284_s2 }
 0x17e   :  { %1281 = vrot.lane.b32.xlu1 %v3464_v44, %s3284_s2 }
 0x180   :  { %1167 = vrot.lane.b32.xlu0 %v3548_v17, %s3280_s20 }
 0x182   :  { %786 = vrot.lane.b32.xlu1 %v3481_v53, %s3280_s20 }
 0x184   :  { %1279 = vrot.lane.b32.xlu0 %v3548_v17, %s3284_s2 }
 0x186   :  { %907 = vrot.lane.b32.xlu1 %v3481_v53, %s3284_s2 }
 0x188   :  { %1504 = vrot.lane.b32.xlu0 %v3472_v49, %s3280_s20 }
 0x18a   :  { %794 = vrot.lane.b32.xlu1 %v3485_v56, %s3280_s20 }
 0x18c   :  { %1616 = vrot.lane.b32.xlu0 %v3472_v49, %s3284_s2 }
 0x18e   :  { %915 = vrot.lane.b32.xlu1 %v3485_v56, %s3284_s2 }
 0x190   :  { %1512 = vrot.lane.b32.xlu0 %v3477_v52, %s3280_s20 }
 0x192   :  { %1506 = vrot.lane.b32.xlu1 %v3575_v21, %s3280_s20 }
 0x194   :  { %1624 = vrot.lane.b32.xlu0 %v3477_v52, %s3284_s2 }
 0x196   :  { %1618 = vrot.lane.b32.xlu1 %v3575_v21, %s3284_s2 }
 0x198   :  { %784 = vrot.lane.b32.xlu0 %v3467_v46, %s3280_s20 }
 0x19a   :  { %1514 = vrot.lane.b32.xlu1 %v3590_v23, %s3280_s20 }
 0x19c   :  { %905 = vrot.lane.b32.xlu0 %v3467_v46, %s3284_s2 }
 0x19e   :  { %1626 = vrot.lane.b32.xlu1 %v3590_v23, %s3284_s2 }
 0x19f   :  { %v599_v32 = vpop.f32.mrb[8].mxu1 }
 0x1a0   :  { %792 = vrot.lane.b32.xlu0 %v3474_v50, %s3280_s20  ;;  %v600_v33 = vadd.f32 %v599_v32, %v183_v26  ;;  %v601_v34 = vpop.f32.mrb[9].mxu1 }
 0x1a1   :  { %v602_v36 = vadd.f32 %v601_v34, %v187_v31  ;;  %v603_v37 = vpop.f32.mrb[10].mxu1 }
 0x1a2   :  { %v3608_v38 = vmax.f32 %v600_v33, 0.0  ;;  %1165 = vrot.lane.b32.xlu1 %v3502_v1, %s3280_s20  ;;  %v604_v39 = vadd.f32 %v603_v37, %v183_v26  ;;  %v605_v41 = vpop.f32.mrb[11].mxu1 }
 0x1a3   :  { %v3612_v15 = vmax.f32 %v602_v36, 0.0  ;;  %v606_v42 = vadd.f32 %v605_v41, %v187_v31 }
 0x1a4   :  { %v3614_v43 = vmax.f32 %v604_v39, 0.0  ;;  %913 = vrot.lane.b32.xlu0 %v3474_v50, %s3284_s2  ;;  %v1041_v47 = vrot.slane %v3608_v38, 7  ;;  %v1390_v55 = vrot.slane %v3608_v38, 1 }
 0x1a5   :  { %v3623_v48 = vmax.f32 %v606_v42, 0.0  ;;  %v1042_v51 = vrot.slane %v3612_v15, 7  ;;  %v1393_v62 = vrot.slane %v3612_v15, 1 }
 0x1a6   :  { %1173 = vrot.lane.b32.xlu1 %v3505_v2, %s3280_s20  ;;  %v1047_v54 = vrot.slane %v3614_v43, 7  ;;  %v1391_v57 = vrot.slane %v3614_v43, 1 }
 0x1a7   :  { %5440 = vst [vmem:[#allocation23_spill] sm:$0xff] %v3623_v48  ;;  %v609_v58 = vpop.f32.mrb[12].mxu1  ;;  %v1049_v60 = vrot.slane %v3623_v48, 7  ;;  %v1394_v63 = vrot.slane %v3623_v48, 1 }
 0x1a8   :  { %v610_v0 = vadd.f32 %v609_v58, %v183_v26  ;;  %v611_v7 = vpop.f32.mrb[13].mxu1  ;;  %1163 = vrot.lane.b32.xlu0 %v3634_v59, %s3280_s20  ;;  %v3642_v11 = vsel %vm1038_vm0, %v1041_v47, %v1047_v54  ;;  %v3652_v34 = vsel %vm1383_vm1, %v1390_v55, %v1391_v57 }
 0x1a9   :  { %v612_v18 = vadd.f32 %v611_v7, %v187_v31  ;;  %v613_v19 = vpop.f32.mrb[14].mxu1  ;;  %v3645_v28 = vsel %vm1038_vm0, %v1042_v51, %v1049_v60  ;;  %5443 = vst [vmem:[#allocation26_spill] sm:$0xff] %v3652_v34  ;;  %v3657_v37 = vsel %vm1383_vm1, %v1393_v62, %v1394_v63 }
 0x1aa   :  { %v3647_v61 = vmax.f32 %v610_v0, 0.0  ;;  %804 = vrot.lane.b32.xlu1 %v3612_v15, %s3280_s20  ;;  %v614_v32 = vadd.f32 %v613_v19, %v183_v26  ;;  %v615_v33 = vpop.f32.mrb[15].mxu1  ;;  %5445 = vst [vmem:[#allocation28_spill] sm:$0xff] %v3657_v37 }
 0x1ab   :  { %v3654_v35 = vmax.f32 %v612_v18, 0.0  ;;  %v616_v36 = vadd.f32 %v615_v33, %v187_v31  ;;  %v3680_v18 = vsel %vm3618_vm4, %v3508_v3, 0.0 }
 0x1ac   :  { %5442 = vst [vmem:[#allocation25_spill] sm:$0xff] %v3647_v61  ;;  %1275 = vrot.lane.b32.xlu0 %v3634_v59, %s3284_s2  ;;  %v3661_v39 = vmax.f32 %v614_v32, 0.0  ;;  %v1400_v41 = vrot.slane %v3647_v61, 1  ;;  %v1055_v42 = vrot.slane %v3647_v61, 7  ;;  %5447 = vst [vmem:[#allocation30_spill] sm:$0xff] %v3680_v18  ;;  %v685_v59 = vand.u32 15, %v659_v4 }
 0x1ad   :  { %5444 = vst [vmem:[#allocation27_spill] sm:$0xff] %v3654_v35  ;;  %v3665_v26 = vmax.f32 %v616_v36, 0.0  ;;  %v1402_v55 = vrot.slane %v3654_v35, 1  ;;  %v1057_v58 = vrot.slane %v3654_v35, 7  ;;  %v1085_v36 = vsel %vm1038_vm0, 0.0, %v1041_v47 }
 0x1ae   :  { %798 = vrot.lane.b32.xlu1 %v3614_v43, %s3280_s20  ;;  %v1401_v31 = vsel %vm1383_vm1, %v1391_v57, %v1400_v41  ;;  %v3673_v62 = vsel %vm1038_vm0, %v1047_v54, %v1055_v42  ;;  %v1063_v0 = vrot.slane %v3661_v39, 7  ;;  %v5253_v7 = vrot.slane %v3661_v39, 1 }
 0x1af   :  { %5446 = vst [vmem:[#allocation29_spill] sm:$0xff] %v3665_v26  ;;  %v1403_v19 = vsel %vm1383_vm1, %v1394_v63, %v1402_v55  ;;  %v3684_v32 = vsel %vm1038_vm0, %v1049_v60, %v1057_v58  ;;  %v1065_v57 = vrot.slane %v3665_v26, 7  ;;  %v5252_v63 = vrot.slane %v3665_v26, 1 }
 0x1b0   :  { %1171 = vrot.lane.b32.xlu0 %v3680_v18, %s3280_s20  ;;  %v3689_v54 = vsel %vm1038_vm0, %v1055_v42, %v1063_v0  ;;  %v3697_v3 = vsel %vm1383_vm1, %v1400_v41, %v5253_v7  ;;  %v3723_v41 = vsel %vm3516_vm2, %v1085_v36, 0.0  ;;  %v1086_v42 = vsel %vm1038_vm0, 0.0, %v1042_v51 }
 0x1b1   :  { %5448 = vst [vmem:[#allocation31_spill] sm:$0xff] %v3689_v54  ;;  %5449 = vst [vmem:[#allocation32_spill] sm:$0xff] %v3697_v3  ;;  %v3701_v60 = vsel %vm1038_vm0, %v1057_v58, %v1065_v57  ;;  %v3708_v33 = vsel %vm1383_vm1, %v1402_v55, %v5252_v63  ;;  %v3736_v47 = vsel %vm3516_vm2, %v1086_v42, 0.0  ;;  %v3770_v0 = vsel %vm3567_vm3, %v1401_v31, 0.0 }
 0x1b2   :  { %919 = vrot.lane.b32.xlu1 %v3614_v43, %s3284_s2  ;;  %5450 = vst [vmem:[#allocation33_spill] sm:$0xff] %v3701_v60  ;;  %5451 = vst [vmem:[#allocation34_spill] sm:$0xff] %v3708_v33  ;;  %v3790_v63 = vsel %vm3567_vm3, %v1403_v19, 0.0  ;;  %vm3826_vm5 = vcmp.ne.s32.totalorder %v685_v59, 15  ;;  %v5470_v4 = vrot.slane %v3481_v53, 1  ;;  %v5474_v59 = vrot.slane %v3485_v56, 1 }
 0x1b3   :  { %5452 = vst [vmem:[#allocation35_spill] sm:$0xff] %v3736_v47  ;;  %5455 = vst [vmem:[#allocation38_spill] sm:$0xff] %v3770_v0 }
 0x1b4   :  { %796 = vrot.lane.b32.xlu0 %v3608_v38, %s3280_s20  ;;  %5459 = vst [vmem:[#allocation42_spill] sm:$0xff] %v3790_v63 }
 0x1b6   :  { %806 = vrot.lane.b32.xlu1 %v3623_v48, %s3280_s20 }
 0x1b8   :  { %917 = vrot.lane.b32.xlu0 %v3608_v38, %s3284_s2 }
 0x1ba   :  { %927 = vrot.lane.b32.xlu1 %v3623_v48, %s3284_s2 }
 0x1bc   :  { %925 = vrot.lane.b32.xlu0 %v3612_v15, %s3284_s2 }
 0x1be   :  { %1177 = vrot.lane.b32.xlu1 %v3642_v11, %s3280_s20 }
 0x1c0   :  { %1175 = vrot.lane.b32.xlu0 %v3723_v41, %s3280_s20 }
 0x1c2   :  { %1289 = vrot.lane.b32.xlu1 %v3642_v11, %s3284_s2 }
 0x1c4   :  { %1287 = vrot.lane.b32.xlu0 %v3723_v41, %s3284_s2 }
 0x1c6   :  { %1185 = vrot.lane.b32.xlu1 %v3645_v28, %s3280_s20 }
 0x1c8   :  { %1183 = vrot.lane.b32.xlu0 %v3736_v47, %s3280_s20 }
 0x1ca   :  { %1297 = vrot.lane.b32.xlu1 %v3645_v28, %s3284_s2 }
 0x1cc   :  { %1295 = vrot.lane.b32.xlu0 %v3736_v47, %s3284_s2 }
 0x1ce   :  { %802 = vrot.lane.b32.xlu1 %v3661_v39, %s3280_s20 }
 0x1d0   :  { %1520 = vrot.lane.b32.xlu0 %v3652_v34, %s3280_s20 }
 0x1d2   :  { %923 = vrot.lane.b32.xlu1 %v3661_v39, %s3284_s2 }
 0x1d4   :  { %1632 = vrot.lane.b32.xlu0 %v3652_v34, %s3284_s2 }
 0x1d6   :  { %v3752_v6 = vpop.permute.xlu0 %780  ;;  %810 = vrot.lane.b32.xlu1 %v3665_v26, %s3280_s20 }
 0x1d8   :  { %v3756_v51 = vpop.permute.xlu1 %903  ;;  %1528 = vrot.lane.b32.xlu0 %v3657_v37, %s3280_s20 }
 0x1d9   :  { %5453 = vst [vmem:[#allocation36_spill] sm:$0xff] %v3756_v51 }
 0x1da   :  { %v3760_v55 = vpop.permute.xlu0 %901  ;;  %931 = vrot.lane.b32.xlu1 %v3665_v26, %s3284_s2 }
 0x1dc   :  { %v3764_v58 = vpop.permute.xlu1 %790  ;;  %1640 = vrot.lane.b32.xlu0 %v3657_v37, %s3284_s2 }
 0x1dd   :  { %5454 = vst [vmem:[#allocation37_spill] sm:$0xff] %v3764_v58 }
 0x1de   :  { %v3772_v57 = vpop.permute.xlu0 %788  ;;  %1522 = vrot.lane.b32.xlu1 %v3770_v0, %s3280_s20 }
 0x1df   :  { %5456 = vst [vmem:[#allocation39_spill] sm:$0xff] %v3772_v57  ;;  %v3956_v57 = vsub.s32 5, %v3422_v13 }
 0x1e0   :  { %v3776_v36 = vpop.permute.xlu1 %911  ;;  %800 = vrot.lane.b32.xlu0 %v3647_v61, %s3280_s20 }
 0x1e1   :  { %5457 = vst [vmem:[#allocation40_spill] sm:$0xff] %v3776_v36 }
 0x1e2   :  { %v3780_v42 = vpop.permute.xlu0 %909  ;;  %1634 = vrot.lane.b32.xlu1 %v3770_v0, %s3284_s2 }
 0x1e4   :  { %921 = vrot.lane.b32.xlu0 %v3647_v61, %s3284_s2  ;;  %v3786_v31 = vpop.permute.xlu1 %1161  ;;  %v3816_v61 = vsel %vm3618_vm4, %v3673_v62, 0.0 }
 0x1e5   :  { %5458 = vst [vmem:[#allocation41_spill] sm:$0xff] %v3786_v31  ;;  %5465 = vst [vmem:[#allocation48_spill] sm:$0xff] %v3816_v61 }
 0x1e6   :  { %v3792_v7 = vpop.permute.xlu0 %782  ;;  %1530 = vrot.lane.b32.xlu1 %v3790_v63, %s3280_s20 }
 0x1e7   :  { %5460 = vst [vmem:[#allocation43_spill] sm:$0xff] %v3792_v7 }
 0x1e8   :  { %808 = vrot.lane.b32.xlu0 %v3654_v35, %s3280_s20  ;;  %v3798_v12 = vpop.permute.xlu1 %1273 }
 0x1e9   :  { %5461 = vst [vmem:[#allocation44_spill] sm:$0xff] %v3798_v12 }
 0x1ea   :  { %v3800_v5 = vpop.permute.xlu0 %1159  ;;  %1642 = vrot.lane.b32.xlu1 %v3790_v63, %s3284_s2 }
 0x1eb   :  { %5462 = vst [vmem:[#allocation45_spill] sm:$0xff] %v3800_v5 }
 0x1ec   :  { %929 = vrot.lane.b32.xlu0 %v3654_v35, %s3284_s2  ;;  %v3807_v20 = vpop.permute.xlu1 %1169 }
 0x1ed   :  { %5463 = vst [vmem:[#allocation46_spill] sm:$0xff] %v3807_v20 }
 0x1ee   :  { %v3809_v19 = vpop.permute.xlu0 %1271  ;;  %1277 = vrot.lane.b32.xlu1 %v3502_v1, %s3284_s2  ;;  %v1428_v1 = vsel %vm1383_vm1, %v5470_v4, 0.0 }
 0x1ef   :  { %5464 = vst [vmem:[#allocation47_spill] sm:$0xff] %v3809_v19  ;;  %v3839_v19 = vsel %vm3826_vm5, %v1428_v1, 0.0 }
 0x1f0   :  { %1179 = vrot.lane.b32.xlu0 %v3816_v61, %s3280_s20  ;;  %v3820_v46 = vpop.permute.xlu1 %1281  ;;  %5472 = vst [vmem:[#allocation52_spill] sm:$0xff] %v3839_v19 }
 0x1f1   :  { %5466 = vst [vmem:[#allocation49_spill] sm:$0xff] %v3820_v46 }
 0x1f2   :  { %v3822_v12 = vpop.permute.xlu0 %1167  ;;  %1285 = vrot.lane.b32.xlu1 %v3505_v2, %s3284_s2  ;;  %v1429_v2 = vsel %vm1383_vm1, %v5474_v59, 0.0 }
 0x1f3   :  { %5467 = vst [vmem:[#allocation50_spill] sm:$0xff] %v3822_v12  ;;  %v3854_v53 = vsel %vm3826_vm5, %v1429_v2, 0.0  ;;  %v3937_v12 = vld [vmem:[#allocation7 + $0x18] sm:$0xff] }
 0x1f4   :  { %1283 = vrot.lane.b32.xlu0 %v3680_v18, %s3284_s2  ;;  %v3835_v62 = vpop.permute.xlu1 %786  ;;  %5476 = vst [vmem:[#allocation55_spill] sm:$0xff] %v3854_v53  ;;  %v3953_v36 = vrot.slane %v3937_v12, %v3433_v16 }
 0x1f5   :  { %5471 = vst [vmem:[#allocation51_spill] sm:$0xff] %v3835_v62 }
 0x1f6   :  { %v3841_v46 = vpop.permute.xlu0 %1279  ;;  %1510 = vrot.lane.b32.xlu1 %v3839_v19, %s3280_s20  ;;  %5500 = vst [vmem:[#allocation78_spill] sm:$0xff] %v3953_v36 }
 0x1f7   :  { %5473 = vst [vmem:[#allocation53_spill] sm:$0xff] %v3841_v46 }
 0x1f8   :  { %1291 = vrot.lane.b32.xlu0 %v3816_v61, %s3284_s2  ;;  %v3850_v4 = vpop.permute.xlu1 %907 }
 0x1f9   :  { %5475 = vst [vmem:[#allocation54_spill] sm:$0xff] %v3850_v4 }
 0x1fa   :  { %v3856_v1 = vpop.permute.xlu0 %1504  ;;  %1518 = vrot.lane.b32.xlu1 %v3854_v53, %s3280_s20 }
 0x1fb   :  { %5477 = vst [vmem:[#allocation56_spill] sm:$0xff] %v3856_v1 }
 0x1fc   :  { %1508 = vrot.lane.b32.xlu0 %v3524_v8, %s3280_s20  ;;  %v3862_v18 = vpop.permute.xlu1 %794 }
 0x1fd   :  { %5478 = vst [vmem:[#allocation57_spill] sm:$0xff] %v3862_v18  ;;  %v3913_v18 = vld [vmem:[#allocation7 + $0x20] sm:$0x3] }
 0x1fe   :  { %v3864_v59 = vpop.permute.xlu0 %1616  ;;  %1622 = vrot.lane.b32.xlu1 %v3839_v19, %s3284_s2  ;;  %5491 = vst [vmem:[#allocation69_spill] sm:$0xff] %v3913_v18 }
 0x1ff   :  { %5479 = vst [vmem:[#allocation58_spill] sm:$0xff] %v3864_v59  ;;  %v718_v59 = vsub.s32 4, %v3422_v13 }
 0x200   :  { %1516 = vrot.lane.b32.xlu0 %v3529_v9, %s3280_s20  ;;  %v3870_v2 = vpop.permute.xlu1 %915 }
 0x201   :  { %5480 = vst [vmem:[#allocation59_spill] sm:$0xff] %v3870_v2  ;;  %v3992_v58 = vrot.slane %v3937_v12, %v718_v59 }
 0x202   :  { %v3872_v4 = vpop.permute.xlu0 %1512  ;;  %1630 = vrot.lane.b32.xlu1 %v3854_v53, %s3284_s2  ;;  %v3898_v53 = vsel %vm3618_vm4, %v3684_v32, 0.0 }
 0x203   :  { %5481 = vst [vmem:[#allocation60_spill] sm:$0xff] %v3872_v4  ;;  %5486 = vst [vmem:[#allocation65_spill] sm:$0xff] %v3898_v53  ;;  %v5490_v4 = vlaneseq }
 0x204   :  { %1620 = vrot.lane.b32.xlu0 %v3524_v8, %s3284_s2  ;;  %v3878_v61 = vpop.permute.xlu1 %1506  ;;  %v3893_v8 = vld [vmem:[#allocation7 + $0x8] sm:$0xff]  ;;  %5509 = vst [vmem:[#allocation86_spill] sm:$0xff] %v3992_v58 }
 0x205   :  { %5482 = vst [vmem:[#allocation61_spill] sm:$0xff] %v3878_v61  ;;  %v1458_v61 = vsub.s32 7, %v3422_v13  ;;  %v723_v62 = vrot.slane %v3893_v8, %v718_v59  ;;  %v3972_v63 = vrot.slane %v3893_v8, %v3593_v25 }
 0x206   :  { %v3880_v1 = vpop.permute.xlu0 %1624  ;;  %1181 = vrot.lane.b32.xlu1 %v3689_v54, %s3280_s20 }
 0x207   :  { %5483 = vst [vmem:[#allocation62_spill] sm:$0xff] %v3880_v1  ;;  %v3901_v1 = vld [vmem:[#allocation7 + $0x28] sm:$0x3]  ;;  %v3933_v5 = vrot.slane %v3893_v8, %v1458_v61  ;;  %v741_v20 = vmul.f32 %v723_v62, %v3474_v50  ;;  %v3964_v50 = vld [vmem:[#allocation7 + $0x38] sm:$0x3]  ;;  %v3982_v34 = vrot.slane %v3937_v12, %v1458_v61 }
 0x208   :  { %1628 = vrot.lane.b32.xlu0 %v3529_v9, %s3284_s2  ;;  %v3886_v19 = vpop.permute.xlu1 %1618  ;;  %5487 = vst [vmem:[#allocation66_spill] sm:$0xff] %v3901_v1  ;;  %5503 = vst [vmem:[#allocation81_spill] sm:$0xff] %v3964_v50 }
 0x209   :  { %5484 = vst [vmem:[#allocation63_spill] sm:$0xff] %v3886_v19  ;;  %v3907_v19 = vld [vmem:[#allocation7] sm:$0xff]  ;;  %5496 = vst [vmem:[#allocation74_spill] sm:$0xff] %v3933_v5 }
 0x20a   :  { %v3889_v2 = vpop.permute.xlu0 %784  ;;  %1293 = vrot.lane.b32.xlu1 %v3689_v54, %s3284_s2  ;;  %5489 = vst [vmem:[#allocation68_spill] sm:$0xff] %v3907_v19  ;;  %v3910_v54 = vand.u32 127, %v5490_v4  ;;  %v3921_v32 = vrot.slane %v3907_v19, %v3433_v16  ;;  %v755_v4 = vrot.slane %v3901_v1, %v3433_v16  ;;  %v3930_v46 = vrot.slane %v3907_v19, %v1458_v61 }
 0x20b   :  { %5485 = vst [vmem:[#allocation64_spill] sm:$0xff] %v3889_v2  ;;  %v3945_v51 = vrot.slane %v3907_v19, %v718_v59  ;;  %5507 = vst [vmem:[#allocation84_spill] sm:$0xff] %v3982_v34 }
 0x20c   :  { %1187 = vrot.lane.b32.xlu0 %v3898_v53, %s3280_s20  ;;  %v3905_v9 = vpop.permute.xlu1 %1514  ;;  %5493 = vst [vmem:[#allocation71_spill] sm:$0xff] %v3921_v32  ;;  %5495 = vst [vmem:[#allocation73_spill] sm:$0xff] %v3930_v46  ;;  %vm812_vm6 = vcmp.lt.s32.totalorder %v3910_v54, 32  ;;  %v773_v47 = vadd.f32 %v755_v4, %v741_v20  ;;  %vm933_vm7 = vcmp.lt.s32.totalorder %v3910_v54, 96  ;;  %vm647_vm8 = vcmp.ge.s32.totalorder %v3910_v54, 32 }
 0x20d   :  { %5488 = vst [vmem:[#allocation67_spill] sm:$0xff] %v3905_v9  ;;  %v3925_v9 = vrot.slane %v3893_v8, %v3433_v16  ;;  %5498 = vst [vmem:[#allocation76_spill] sm:$0xff] %v3945_v51 }
 0x20e   :  { %v3915_v45 = vpop.permute.xlu0 %905  ;;  %1189 = vrot.lane.b32.xlu1 %v3701_v60, %s3280_s20 }
 0x20f   :  { %5492 = vst [vmem:[#allocation70_spill] sm:$0xff] %v3915_v45  ;;  %5494 = vst [vmem:[#allocation72_spill] sm:$0xff] %v3925_v9  ;;  %v3935_v45 = vld [vmem:[#allocation7 + $0x10] sm:$0xff] }
 0x210   :  { %1299 = vrot.lane.b32.xlu0 %v3898_v53, %s3284_s2  ;;  %v3941_v31 = vpop.permute.xlu1 %1626  ;;  %v3949_v1 = vrot.slane %v3935_v45, %v3433_v16  ;;  %v3960_v53 = vrot.slane %v3913_v18, %v3433_v16  ;;  %v3967_v48 = vrot.slane %v3935_v45, %v1458_v61  ;;  %v5506_v18 = vrot.slane %v3661_v39, 1 }
 0x211   :  { %5497 = vst [vmem:[#allocation75_spill] sm:$0xff] %v3941_v31  ;;  %v3962_v31 = vld [vmem:[#allocation7 + $0x30] sm:$0x3]  ;;  %v3989_v7 = vrot.slane %v3935_v45, %v718_v59  ;;  %v737_v59 = vmul.f32 %v723_v62, %v3447_v30  ;;  %v4035_v30 = vmul.f32 %v3921_v32, %v3535_v10 }
 0x212   :  { %5499 = vst [vmem:[#allocation77_spill] sm:$0xff] %v3949_v1  ;;  %5501 = vst [vmem:[#allocation79_spill] sm:$0xff] %v3960_v53  ;;  %v3974_v0 = vpop.permute.xlu0 %792  ;;  %1301 = vrot.lane.b32.xlu1 %v3701_v60, %s3284_s2  ;;  %v1430_v37 = vsel %vm1383_vm1, %v5506_v18, 0.0  ;;  %v4001_v61 = vrot.slane %v3962_v31, %v3433_v16 }
 0x213   :  { %5502 = vst [vmem:[#allocation80_spill] sm:$0xff] %v3962_v31  ;;  %5504 = vst [vmem:[#allocation82_spill] sm:$0xff] %v3967_v48  ;;  %v823_v48 = vsel %vm812_vm6, %v3889_v2, %v3974_v0  ;;  %v4005_v2 = vrot.slane %v3964_v50, %v3433_v16  ;;  %v4015_v20 = vsel %vm3826_vm5, %v1430_v37, 0.0  ;;  %v732_v50 = vmul.f32 %v3945_v51, %v3439_v24 }
 0x214   :  { %5505 = vst [vmem:[#allocation83_spill] sm:$0xff] %v3974_v0  ;;  %5508 = vst [vmem:[#allocation85_spill] sm:$0xff] %v3989_v7  ;;  %v878_v60 = vmul.f32 %v3972_v63, %v823_v48  ;;  %1524 = vrot.lane.b32.xlu0 %v3697_v3, %s3280_s20  ;;  %v3997_v18 = vpop.permute.xlu1 %1165  ;;  %v733_v0 = vmul.f32 %v723_v62, %v3441_v27  ;;  %v4011_v48 = vrot.slane %v3907_v19, %v3956_v57 }
 0x215   :  { %5510 = vst [vmem:[#allocation87_spill] sm:$0xff] %v3997_v18  ;;  %5511 = vst [vmem:[#allocation88_spill] sm:$0xff] %v4001_v61  ;;  %v5517_v27 = vrot.slane %v3665_v26, 1  ;;  %v4031_v37 = vmul.f32 %v3921_v32, %v3460_v40  ;;  %v4048_v24 = vmul.f32 %v3930_v46, %v3472_v49  ;;  %v4051_v40 = vsub.s32 6, %v3422_v13 }
 0x216   :  { %5512 = vst [vmem:[#allocation89_spill] sm:$0xff] %v4005_v2  ;;  %5513 = vst [vmem:[#allocation90_spill] sm:$0xff] %v4011_v48  ;;  %v4018_v18 = vadd.f32 %v878_v60, %v773_v47  ;;  %v4020_v31 = vpop.permute.xlu0 %913  ;;  %1526 = vrot.lane.b32.xlu1 %v4015_v20, %s3280_s20  ;;  %v4039_v60 = vmul.f32 %v3925_v9, %v3548_v17  ;;  %v745_v47 = vmul.f32 %v723_v62, %v3485_v56 }
 0x217   :  { %5514 = vst [vmem:[#allocation91_spill] sm:$0xff] %v4015_v20  ;;  %5516 = vst [vmem:[#allocation93_spill] sm:$0xff] %v4020_v31  ;;  %v1431_v16 = vsel %vm1383_vm1, %v5517_v27, 0.0  ;;  %v4044_v27 = vmul.f32 %v3925_v9, %v3464_v44  ;;  %v736_v17 = vmul.f32 %v3945_v51, %v3443_v29  ;;  %v4061_v56 = vmul.f32 %v3933_v5, %v3477_v52  ;;  %v5532_v9 = vld [vmem:[#allocation26_spill] sm:$0xff] }
 0x218   :  { %5515 = vst [vmem:[#allocation92_spill] sm:$0xff] %v4018_v18  ;;  %5518 = vst [vmem:[#allocation94_spill] sm:$0xff] %v4048_v24  ;;  %1532 = vrot.lane.b32.xlu0 %v3708_v33, %s3280_s20  ;;  %v4055_v10 = vpop.permute.xlu1 %1173  ;;  %v4065_v44 = vmul.f32 %v3930_v46, %v3575_v21  ;;  %v4067_v49 = vadd.f32 %v755_v4, %v733_v0  ;;  %v4071_v13 = vsel %vm3826_vm5, %v1431_v16, 0.0  ;;  %v5539_v24 = vld [vmem:[#allocation23_spill] sm:$0xff] }
 0x219   :  { %5519 = vst [vmem:[#allocation95_spill] sm:$0xff] %v4055_v10  ;;  %5521 = vst [vmem:[#allocation97_spill] sm:$0xff] %v4071_v13  ;;  %v4075_v62 = vmul.f32 %v3933_v5, %v3590_v23  ;;  %v769_v10 = vadd.f32 %v755_v4, %v737_v59  ;;  %v4079_v29 = vrot.slane %v3893_v8, %v3425_v14 }
 0x21a   :  { %5520 = vst [vmem:[#allocation96_spill] sm:$0xff] %v4065_v44  ;;  %v4083_v52 = vrot.slane %v3907_v19, %v3586_v22  ;;  %v4085_v21 = vpop.permute.xlu0 %1163  ;;  %1534 = vrot.lane.b32.xlu1 %v4071_v13, %s3280_s20  ;;  %v4089_v16 = vadd.f32 %v755_v4, %v745_v47  ;;  %v4094_v23 = vrot.slane %v3907_v19, %v3593_v25  ;;  %v5538_v44 = vld [vmem:[#allocation42_spill] sm:$0xff] }
 0x21b   :  { %5522 = vst [vmem:[#allocation98_spill] sm:$0xff] %v4079_v29  ;;  %5524 = vst [vmem:[#allocation100_spill] sm:$0xff] %v4085_v21  ;;  %v764_v35 = vadd.f32 %v3960_v53, %v732_v50  ;;  %v4099_v0 = vrot.slane %v3893_v8, %v4051_v40  ;;  %v738_v4 = vmul.f32 %v3989_v7, %v3614_v43  ;;  %v5529_v21 = vld [vmem:[#allocation35_spill] sm:$0xff] }
 0x21c   :  { %5523 = vst [vmem:[#allocation99_spill] sm:$0xff] %v4083_v52  ;;  %5525 = vst [vmem:[#allocation101_spill] sm:$0xff] %v4089_v16  ;;  %1636 = vrot.lane.b32.xlu0 %v3697_v3, %s3284_s2  ;;  %v805_v59 = vpop.permute.xlu1 %804  ;;  %v4107_v47 = vrot.slane %v3935_v45, %v3593_v25  ;;  %v4110_v5 = vadd.f32 %v3960_v53, %v736_v17  ;;  %v4114_v50 = vmul.f32 %v3949_v1, %v3723_v41  ;;  %v5530_v53 = vld [vmem:[#allocation37_spill] sm:$0xff] }
 0x21d   :  { %5526 = vst [vmem:[#allocation102_spill] sm:$0xff] %v4094_v23  ;;  %5527 = vst [vmem:[#allocation103_spill] sm:$0xff] %v4099_v0  ;;  %v825_v46 = vsel %vm812_vm6, %v805_v59, %v3752_v6  ;;  %v4121_v3 = vrot.slane %v3893_v8, %v3956_v57  ;;  %v734_v43 = vmul.f32 %v3989_v7, %v3608_v38 }
 0x21e   :  { %v4127_v32 = vmul.f32 %v3949_v1, %v3642_v11  ;;  %v942_v41 = vsel %vm933_vm7, %v3760_v55, %v3780_v42  ;;  %v837_v17 = vsel %vm647_vm8, %v825_v46, 0.0  ;;  %v4135_v18 = vpop.permute.xlu0 %1275  ;;  %1638 = vrot.lane.b32.xlu1 %v4015_v20, %s3284_s2  ;;  %v735_v38 = vmul.f32 %v3992_v58, %v3612_v15  ;;  %v5531_v1 = vld [vmem:[#allocation43_spill] sm:$0xff]  ;;  %v5533_v20 = vld [vmem:[#allocation82_spill] sm:$0xff]  ;;  %v5535_v15 = vld [vmem:[#allocation28_spill] sm:$0xff] }
 0x21f   :  { %5528 = vst [vmem:[#allocation104_spill] sm:$0xff] %v4135_v18  ;;  %v4143_v11 = vmul.f32 %v3953_v36, %v3645_v28  ;;  %v4147_v31 = vmul.f32 %v3953_v36, %v5529_v21  ;;  %v822_v46 = vsel %vm812_vm6, %v5531_v1, %v5530_v53  ;;  %v869_v18 = vmul.f32 %v4094_v23, %v837_v17  ;;  %v5537_v28 = vld [vmem:[#allocation38_spill] sm:$0xff] }
 0x220   :  { %v4156_v51 = vmul.f32 %v5533_v20, %v5532_v9  ;;  %v4160_v16 = vmul.f32 %v3982_v34, %v5535_v15  ;;  %v4164_v26 = vmul.f32 %v5533_v20, %v5537_v28  ;;  %1644 = vrot.lane.b32.xlu0 %v3708_v33, %s3284_s2  ;;  %v770_v21 = vadd.f32 %v4001_v61, %v738_v4  ;;  %v799_v36 = vpop.permute.xlu1 %798 }
 0x221   :  { %v990_v17 = vmul.f32 %v4011_v48, %v942_v41  ;;  %v4172_v9 = vmul.f32 %v3982_v34, %v5538_v44  ;;  %v739_v15 = vmul.f32 %v3992_v58, %v5539_v24  ;;  %v766_v4 = vadd.f32 %v4001_v61, %v734_v43  ;;  %v5541_v44 = vld [vmem:[#allocation39_spill] sm:$0xff] }
 0x222   :  { %5534 = vst [vmem:[#allocation35_spill] sm:$0xff] %v4156_v51  ;;  %5536 = vst [vmem:[#allocation37_spill] sm:$0xff] %v4160_v16  ;;  %v885_v51 = vadd.f32 %v869_v18, %v764_v35  ;;  %v874_v16 = vmul.f32 %v3972_v63, %v822_v46  ;;  %v4177_v28 = vpop.permute.xlu0 %1171  ;;  %1646 = vrot.lane.b32.xlu1 %v4071_v13, %s3284_s2  ;;  %v4183_v33 = vadd.f32 %v4005_v2, %v735_v38 }
 0x223   :  { %5540 = vst [vmem:[#allocation43_spill] sm:$0xff] %v4177_v28  ;;  %v4186_v41 = vadd.s32 384, %v3910_v54  ;;  %v821_v18 = vsel %vm812_vm6, %v3752_v6, %v5541_v44  ;;  %v4194_v35 = vrot.slane %v3937_v12, %v3593_v25  ;;  %v746_v46 = vmul.f32 %v3989_v7, %v3661_v39 }
 0x224   :  { %v1006_v24 = vadd.f32 %v990_v17, %v885_v51  ;;  %v920_v43 = vpop.permute.xlu1 %919  ;;  %v4200_v38 = vrot.slane %v3935_v45, %v3956_v57  ;;  %v4204_v13 = vrot.slane %v3937_v12, %v3956_v57  ;;  %v4208_v6 = vrot.slane %v3935_v45, %v3425_v14  ;;  %v5544_v51 = vld [vmem:[#allocation40_spill] sm:$0xff] }
 0x225   :  { %v4212_v25 = vrot.slane %v3893_v8, %v3586_v22  ;;  %v818_v39 = vsel %vm812_vm6, %v5530_v53, %v799_v36  ;;  %v939_v17 = vsel %vm933_vm7, %v5544_v51, %v920_v43  ;;  %v771_v34 = vadd.f32 %v4005_v2, %v739_v15 }
 0x226   :  { %5542 = vst [vmem:[#allocation26_spill] sm:$0xff] %v4204_v13  ;;  %v4222_v57 = vadd.f32 %v4035_v30, %v1006_v24  ;;  %v870_v20 = vmul.f32 %v3972_v63, %v821_v18  ;;  %v890_v28 = vadd.f32 %v874_v16, %v769_v10  ;;  %v995_v7 = vmul.f32 %v4121_v3, %v939_v17  ;;  %v797_v8 = vpop.permute.xlu0 %796  ;;  %v5547_v10 = vld [vmem:[#allocation36_spill] sm:$0xff] }
 0x227   :  { %5543 = vst [vmem:[#allocation28_spill] sm:$0xff] %v4212_v25  ;;  %vm654_vm9 = vcmp.lt.s32.totalorder %v4186_v41, 480  ;;  %v817_v53 = vsel %vm812_vm6, %v5541_v44, %v797_v8  ;;  %v4232_v58 = vrot.slane %v3907_v19, %v3425_v14  ;;  %v4236_v30 = vrot.slane %v3937_v12, %v3425_v14 }
 0x228   :  { %v4239_v15 = vadd.f32 %v4001_v61, %v746_v46  ;;  %v943_v16 = vsel %vm933_vm7, %v5547_v10, %v5544_v51  ;;  %v875_v18 = vmul.f32 %v4107_v47, %v818_v39  ;;  %v1011_v24 = vadd.f32 %v995_v7, %v890_v28  ;;  %v807_v44 = vpop.permute.xlu1 %806 }
 0x229   :  { %5545 = vst [vmem:[#allocation38_spill] sm:$0xff] %v4232_v58  ;;  %5546 = vst [vmem:[#allocation42_spill] sm:$0xff] %v4236_v30  ;;  %v4248_v17 = vrot.slane %v3935_v45, %v3586_v22  ;;  %v813_v2 = vsel %vm812_vm6, %v797_v8, %v805_v59  ;;  %v871_v19 = vmul.f32 %v4107_v47, %v817_v53 }
 0x22a   :  { %v814_v46 = vsel %vm812_vm6, %v799_v36, %v807_v44  ;;  %v826_v51 = vsel %vm812_vm6, %v807_v44, %v5531_v1  ;;  %v886_v39 = vadd.f32 %v870_v20, %v4067_v49  ;;  %v1148_v7 = vadd.f32 %v4044_v27, %v1011_v24  ;;  %v918_v61 = vpop.permute.xlu0 %917  ;;  %v5550_v20 = vld [vmem:[#allocation46_spill] sm:$0xff]  ;;  %v5551_v27 = vld [vmem:[#allocation41_spill] sm:$0xff] }
 0x22b   :  { %5548 = vst [vmem:[#allocation23_spill] sm:$0xff] %v4248_v17  ;;  %v841_v28 = vsel %vm647_vm8, %v826_v51, 0.0  ;;  %v4264_v59 = vrot.slane %v3937_v12, %v3586_v22  ;;  %v994_v8 = vmul.f32 %v4011_v48, %v943_v16  ;;  %v876_v53 = vmul.f32 %v4194_v35, %v814_v46 }
 0x22c   :  { %v873_v36 = vmul.f32 %v4094_v23, %v841_v28  ;;  %v938_v1 = vsel %vm933_vm7, %v3780_v42, %v918_v61  ;;  %v1200_v49 = vsel %vm812_vm6, %v5551_v27, %v5550_v20  ;;  %v891_v24 = vadd.f32 %v875_v18, %v770_v21  ;;  %v928_v51 = vpop.permute.xlu1 %927 }
 0x22d   :  { %5549 = vst [vmem:[#allocation39_spill] sm:$0xff] %v4264_v59  ;;  %v872_v44 = vmul.f32 %v4194_v35, %v813_v2  ;;  %v991_v22 = vmul.f32 %v4121_v3, %v938_v1  ;;  %v887_v16 = vadd.f32 %v871_v19, %v766_v4  ;;  %v935_v46 = vsel %vm933_vm7, %v920_v43, %v928_v51 }
 0x22e   :  { %v889_v28 = vadd.f32 %v873_v36, %v4110_v5  ;;  %v947_v42 = vsel %vm933_vm7, %v928_v51, %v5547_v10  ;;  %v892_v23 = vadd.f32 %v876_v53, %v771_v34  ;;  %v996_v2 = vmul.f32 %v4200_v38, %v935_v46  ;;  %v926_v18 = vpop.permute.xlu0 %925  ;;  %v5552_v51 = vld [vmem:[#allocation50_spill] sm:$0xff] }
 0x22f   :  { %v1007_v48 = vadd.f32 %v991_v22, %v886_v39  ;;  %v965_v21 = vsel %vm654_vm9, %v947_v42, 0.0  ;;  %v934_v5 = vsel %vm933_vm7, %v918_v61, %v926_v18  ;;  %v946_v4 = vsel %vm933_vm7, %v926_v18, %v3760_v55  ;;  %v5560_v18 = vld [vmem:[#allocation47_spill] sm:$0xff] }
 0x230   :  { %v1010_v1 = vadd.f32 %v994_v8, %v889_v28  ;;  %v997_v19 = vmul.f32 %v4204_v13, %v965_v21  ;;  %v1012_v34 = vadd.f32 %v996_v2, %v891_v24  ;;  %v961_v10 = vsel %vm654_vm9, %v946_v4, 0.0  ;;  %v1178_v36 = vpop.permute.xlu1 %1177  ;;  %v5553_v28 = vld [vmem:[#allocation45_spill] sm:$0xff]  ;;  %v5558_v2 = vld [vmem:[#allocation44_spill] sm:$0xff] }
 0x231   :  { %v1144_v43 = vadd.f32 %v4039_v60, %v1007_v48  ;;  %v992_v39 = vmul.f32 %v4200_v38, %v934_v5  ;;  %v888_v8 = vadd.f32 %v872_v44, %v4183_v33  ;;  %v993_v22 = vmul.f32 %v4204_v13, %v961_v10  ;;  %v5557_v21 = vld [vmem:[#allocation49_spill] sm:$0xff] }
 0x232   :  { %v1013_v53 = vadd.f32 %v997_v19, %v892_v23  ;;  %v1147_v61 = vadd.f32 %v4031_v37, %v1010_v1  ;;  %v1199_v55 = vsel %vm812_vm6, %v5553_v28, %v5552_v51  ;;  %v1149_v60 = vadd.f32 %v4127_v32, %v1012_v34  ;;  %v1176_v24 = vpop.permute.xlu0 %1175  ;;  %v5555_v37 = vld [vmem:[#allocation66_spill] sm:$0xff]  ;;  %v5559_v32 = vld [vmem:[#allocation53_spill] sm:$0xff] }
 0x233   :  { %v1008_v48 = vadd.f32 %v992_v39, %v887_v16  ;;  %v4307_v46 = vrot.slane %v3935_v45, %v4051_v40  ;;  %v1244_v33 = vmul.f32 %v4079_v29, %v1200_v49  ;;  %v1009_v23 = vadd.f32 %v993_v22, %v888_v8  ;;  %v5561_v10 = vld [vmem:[#allocation57_spill] sm:$0xff]  ;;  %v5562_v39 = vld [vmem:[#allocation51_spill] sm:$0xff]  ;;  %v5563_v8 = vld [vmem:[#allocation60_spill] sm:$0xff] }
 0x234   :  { %v1150_v44 = vadd.f32 %v4143_v11, %v1013_v53  ;;  %v4313_v42 = vrot.slane %v5555_v37, %v3425_v14  ;;  %v1312_v16 = vsel %vm933_vm7, %v5558_v2, %v5557_v21  ;;  %v1311_v45 = vsel %vm933_vm7, %v5560_v18, %v5559_v32  ;;  %v1290_v1 = vpop.permute.xlu1 %1289 }
 0x235   :  { %5554 = vst [vmem:[#allocation40_spill] sm:$0xff] %v4307_v46  ;;  %v1196_v49 = vsel %vm812_vm6, %v5550_v20, %v1178_v36  ;;  %v1145_v11 = vadd.f32 %v4114_v50, %v1008_v48  ;;  %v1240_v19 = vmul.f32 %v4079_v29, %v1199_v55  ;;  %v1195_v5 = vsel %vm812_vm6, %v5552_v51, %v1176_v24  ;;  %v5564_v50 = vld [vmem:[#allocation56_spill] sm:$0xff] }
 0x236   :  { %5556 = vst [vmem:[#allocation36_spill] sm:$0xff] %v4313_v42  ;;  %v1308_v4 = vsel %vm933_vm7, %v5557_v21, %v1290_v1  ;;  %v1146_v34 = vadd.f32 %v4147_v31, %v1009_v23  ;;  %v824_v20 = vsel %vm812_vm6, %v5562_v39, %v5561_v10  ;;  %v1544_v53 = vsel %vm812_vm6, %v5564_v50, %v5563_v8  ;;  %v1288_v51 = vpop.permute.xlu0 %1287 }
 0x237   :  { %v1260_v22 = vadd.f32 %v1244_v33, %v1148_v7  ;;  %v1356_v55 = vmul.f32 %v4212_v25, %v1308_v4  ;;  %v1355_v48 = vmul.f32 %v4083_v52, %v1312_v16  ;;  %v1351_v37 = vmul.f32 %v4083_v52, %v1311_v45 }
 0x238   :  { %v1245_v31 = vmul.f32 %v4208_v6, %v1196_v49  ;;  %v1307_v23 = vsel %vm933_vm7, %v5559_v32, %v1288_v51  ;;  %v1241_v21 = vmul.f32 %v4208_v6, %v1195_v5  ;;  %v1256_v39 = vadd.f32 %v1240_v19, %v1144_v43  ;;  %v1186_v7 = vpop.permute.xlu1 %1185 }
 0x239   :  { %v1372_v13 = vadd.f32 %v1356_v55, %v1260_v22  ;;  %v1352_v29 = vmul.f32 %v4212_v25, %v1307_v23  ;;  %v882_v33 = vmul.f32 %v3972_v63, %v824_v20  ;;  %v1585_v4 = vmul.f32 %v4099_v0, %v1544_v53  ;;  %v5607_v25 = vld [vmem:[#allocation90_spill] sm:$0xff] }
 0x23a   :  { %v1192_v16 = vsel %vm812_vm6, %v1178_v36, %v1186_v7  ;;  %v1204_v45 = vsel %vm812_vm6, %v1186_v7, %v5551_v27  ;;  %v1184_v5 = vpop.permute.xlu0 %1183  ;;  %v1261_v63 = vadd.f32 %v1245_v31, %v1149_v60  ;;  %v1257_v53 = vadd.f32 %v1241_v21, %v1145_v11 }
 0x23b   :  { %v4360_v32 = vadd.f32 %v4075_v62, %v1372_v13  ;;  %v1368_v49 = vadd.f32 %v1352_v29, %v1256_v39  ;;  %v1211_v43 = vsel %vm647_vm8, %v1204_v45, 0.0  ;;  %v1246_v19 = vmul.f32 %v4236_v30, %v1192_v16 }
 0x23c   :  { %v1243_v20 = vmul.f32 %v4232_v58, %v1211_v43  ;;  %v1191_v36 = vsel %vm812_vm6, %v1176_v24, %v1184_v5  ;;  %v1203_v27 = vsel %vm812_vm6, %v1184_v5, %v5553_v28  ;;  %v1298_v39 = vpop.permute.xlu1 %1297 }
 0x23d   :  { %v1489_v13 = vadd.f32 %v4061_v56, %v1368_v49  ;;  %v1207_v62 = vsel %vm647_vm8, %v1203_v27, 0.0  ;;  %v1242_v29 = vmul.f32 %v4236_v30, %v1191_v36  ;;  %v1304_v55 = vsel %vm933_vm7, %v1290_v1, %v1298_v39  ;;  %v5566_v27 = vld [vmem:[#allocation96_spill] sm:$0xff] }
 0x23e   :  { %v1259_v22 = vadd.f32 %v1243_v20, %v1147_v61  ;;  %v1239_v60 = vmul.f32 %v4232_v58, %v1207_v62  ;;  %v1316_v24 = vsel %vm933_vm7, %v1298_v39, %v5558_v2  ;;  %v1262_v28 = vadd.f32 %v1246_v19, %v1150_v44  ;;  %v1296_v31 = vpop.permute.xlu0 %1295  ;;  %v5567_v62 = vld [vmem:[#allocation35_spill] sm:$0xff]  ;;  %v5606_v30 = vld [vmem:[#allocation100_spill] sm:$0xff] }
 0x23f   :  { %v1326_v56 = vsel %vm654_vm9, %v1316_v24, 0.0  ;;  %v1357_v11 = vmul.f32 %v4248_v17, %v1304_v55  ;;  %v1601_v23 = vadd.f32 %v1585_v4, %v1489_v13  ;;  %v1303_v1 = vsel %vm933_vm7, %v1288_v51, %v1296_v31  ;;  %v5570_v55 = vld [vmem:[#allocation86_spill] sm:$0xff] }
 0x240   :  { %v1371_v21 = vadd.f32 %v1355_v48, %v1259_v22  ;;  %v1255_v61 = vadd.f32 %v1239_v60, %v4222_v57  ;;  %v1358_v7 = vmul.f32 %v4264_v59, %v1326_v56  ;;  %v1258_v16 = vadd.f32 %v1242_v29, %v1146_v34  ;;  %v803_v49 = vpop.permute.xlu1 %802  ;;  %v5568_v22 = vld [vmem:[#allocation59_spill] sm:$0xff]  ;;  %v5569_v60 = vld [vmem:[#allocation29_spill] sm:$0xff] }
 0x241   :  { %v1373_v45 = vadd.f32 %v1357_v11, %v1261_v63  ;;  %v1315_v44 = vsel %vm933_vm7, %v1296_v31, %v5560_v18  ;;  %v1353_v2 = vmul.f32 %v4248_v17, %v1303_v1  ;;  %v820_v57 = vsel %vm812_vm6, %v5561_v10, %v803_v49  ;;  %v5565_v63 = vld [vmem:[#allocation94_spill] sm:$0xff] }
 0x242   :  { %v1367_v43 = vadd.f32 %v1351_v37, %v1255_v61  ;;  %v1374_v19 = vadd.f32 %v1358_v7, %v1262_v28  ;;  %v1322_v48 = vsel %vm654_vm9, %v1315_v44, 0.0  ;;  %v883_v4 = vmul.f32 %v4107_v47, %v820_v57  ;;  %v1521_v5 = vpop.permute.xlu0 %1520  ;;  %v5573_v61 = vld [vmem:[#allocation62_spill] sm:$0xff]  ;;  %v5574_v44 = vld [vmem:[#allocation68_spill] sm:$0xff] }
 0x243   :  { %v1354_v51 = vmul.f32 %v4264_v59, %v1322_v48  ;;  %v1369_v34 = vadd.f32 %v1353_v2, %v1257_v53  ;;  %v4400_v18 = vadd.f32 %v4164_v26, %v1373_v45  ;;  %v1540_v37 = vsel %vm812_vm6, %v5563_v8, %v1521_v5  ;;  %v5601_v59 = vld [vmem:[#allocation75_spill] sm:$0xff]  ;;  %v5604_v17 = vld [vmem:[#allocation70_spill] sm:$0xff] }
 0x244   :  { %v1488_v20 = vadd.f32 %v5565_v63, %v1367_v43  ;;  %v4407_v36 = vadd.f32 %v4172_v9, %v1374_v19  ;;  %v4410_v10 = vadd.f32 %v5566_v27, %v1371_v21  ;;  %v899_v53 = vadd.f32 %v883_v4, %v4239_v15  ;;  %v924_v39 = vpop.permute.xlu1 %923  ;;  %v5571_v9 = vld [vmem:[#allocation101_spill] sm:$0xff] }
 0x245   :  { %v1370_v13 = vadd.f32 %v1354_v51, %v1258_v16  ;;  %v1490_v29 = vadd.f32 %v5567_v62, %v1369_v34  ;;  %v1586_v26 = vmul.f32 %v4307_v46, %v1540_v37  ;;  %v941_v8 = vsel %vm933_vm7, %v5568_v22, %v924_v39  ;;  %v5572_v15 = vld [vmem:[#allocation37_spill] sm:$0xff] }
 0x246   :  { %v747_v24 = vmul.f32 %v5570_v55, %v5569_v60  ;;  %v898_v28 = vadd.f32 %v882_v33, %v5571_v9  ;;  %v1003_v11 = vmul.f32 %v4121_v3, %v941_v8  ;;  %v1633_v31 = vpop.permute.xlu0 %1632  ;;  %v4440_v2 = vrot.slane %v5574_v44, %v4051_v40  ;;  %v5577_v19 = vld [vmem:[#allocation89_spill] sm:$0xff] }
 0x247   :  { %v4421_v56 = vadd.f32 %v1586_v26, %v1490_v29  ;;  %v4425_v21 = vadd.f32 %v5572_v15, %v1370_v13  ;;  %v1652_v7 = vsel %vm933_vm7, %v5573_v61, %v1633_v31  ;;  %v5578_v34 = vld [vmem:[#allocation69_spill] sm:$0xff] }
 0x248   :  { %v4430_v1 = vadd.f32 %v1003_v11, %v898_v28  ;;  %v1697_v16 = vmul.f32 %v4313_v42, %v1652_v7  ;;  %v4433_v45 = vpop.permute.xlu1 %810  ;;  %5575 = vst [vmem:[#allocation46_spill] sm:$0xff] %v4440_v2  ;;  %v779_v48 = vadd.f32 %v5577_v19, %v747_v24  ;;  %v4448_v4 = vrot.slane %v5578_v34, %v3425_v14  ;;  %v5581_v26 = vld [vmem:[#allocation17_spill] sm:$0xff]  ;;  %v5585_v7 = vld [vmem:[#allocation67_spill] sm:$0xff] }
 0x249   :  { %v816_v33 = vsel %vm812_vm6, %v803_v49, %v4433_v45  ;;  %v5579_v49 = vld [vmem:[#allocation58_spill] sm:$0xff]  ;;  %v5583_v9 = vld [vmem:[#allocation25_spill] sm:$0xff] }
 0x24a   :  { %v4442_v43 = vadd.f32 %v1697_v16, %v1601_v23  ;;  %v884_v57 = vmul.f32 %v4194_v35, %v816_v33  ;;  %v1529_v51 = vpop.permute.xlu0 %1528  ;;  %v1656_v63 = vsel %vm933_vm7, %v5579_v49, %v5573_v61  ;;  %v5584_v28 = vld [vmem:[#allocation85_spill] sm:$0xff] }
 0x24b   :  { %v1548_v37 = vsel %vm812_vm6, %v1529_v51, %v5564_v50  ;;  %v5582_v50 = vld [vmem:[#allocation76_spill] sm:$0xff]  ;;  %v742_v11 = vmul.f32 %v5584_v28, %v5583_v9  ;;  %v1696_v15 = vmul.f32 %v4448_v4, %v1656_v63  ;;  %v5586_v16 = vld [vmem:[#allocation61_spill] sm:$0xff]  ;;  %v5593_v9 = vld [vmem:[#allocation79_spill] sm:$0xff] }
 0x24c   :  { %5576 = vst [vmem:[#allocation41_spill] sm:$0xff] %v4442_v43  ;;  %v4457_v23 = vadd.f32 %v884_v57, %v779_v48  ;;  %v1552_v27 = vsel %vm647_vm8, %v1548_v37, 0.0  ;;  %v4461_v13 = vpop.permute.xlu1 %931  ;;  %v740_v8 = vmul.f32 %v5582_v50, %v5581_v26  ;;  %v1545_v33 = vsel %vm812_vm6, %v5586_v16, %v5585_v7  ;;  %v5588_v48 = vld [vmem:[#allocation30_spill] sm:$0xff]  ;;  %v5589_v57 = vld [vmem:[#allocation72_spill] sm:$0xff] }
 0x24d   :  { %v1584_v62 = vmul.f32 %v4440_v2, %v1552_v27  ;;  %v937_v29 = vsel %vm933_vm7, %v924_v39, %v4461_v13  ;;  %v1136_v34 = vmul.f32 %v5589_v57, %v5588_v48  ;;  %v5590_v37 = vld [vmem:[#allocation48_spill] sm:$0xff]  ;;  %v5591_v27 = vld [vmem:[#allocation77_spill] sm:$0xff] }
 0x24e   :  { %5580 = vst [vmem:[#allocation50_spill] sm:$0xff] %v4457_v23  ;;  %v1004_v60 = vmul.f32 %v4200_v38, %v937_v29  ;;  %v1641_v24 = vpop.permute.xlu0 %1640  ;;  %v4483_v29 = vmul.f32 %v5591_v27, %v5590_v37  ;;  %v772_v63 = vadd.f32 %v5593_v9, %v740_v8  ;;  %v5597_v28 = vld [vmem:[#allocation88_spill] sm:$0xff]  ;;  %v1536_v8 = vsel %vm812_vm6, %v1521_v5, %v1529_v51 }
 0x24f   :  { %v1600_v61 = vadd.f32 %v1584_v62, %v1488_v20  ;;  %v4490_v20 = vrot.slane %v3937_v12, %v4051_v40  ;;  %v5595_v62 = vld [vmem:[#allocation80_spill] sm:$0xff]  ;;  %v774_v48 = vadd.f32 %v5597_v28, %v742_v11  ;;  %v5598_v12 = vld [vmem:[#allocation81_spill] sm:$0xff]  ;;  %v1648_v5 = vsel %vm933_vm7, %v1633_v31, %v1641_v24 }
 0x250   :  { %v4477_v44 = vadd.f32 %v1004_v60, %v899_v53  ;;  %v1523_v39 = vpop.permute.xlu1 %1522  ;;  %v4494_v53 = vrot.slane %v5595_v62, %v3425_v14  ;;  %v1660_v60 = vsel %vm933_vm7, %v1641_v24, %v5579_v49  ;;  %v4507_v40 = vrot.slane %v5598_v12, %v3425_v14  ;;  %v5602_v49 = vld [vmem:[#allocation63_spill] sm:$0xff]  ;;  %v5603_v28 = vld [vmem:[#allocation93_spill] sm:$0xff] }
 0x251   :  { %v4485_v26 = vadd.f32 %v1696_v15, %v1600_v61  ;;  %5594 = vst [vmem:[#allocation49_spill] sm:$0xff] %v4490_v20  ;;  %v1589_v15 = vmul.f32 %v4099_v0, %v1545_v33  ;;  %v5600_v61 = vld [vmem:[#allocation83_spill] sm:$0xff]  ;;  %v1657_v11 = vsel %vm933_vm7, %v5602_v49, %v5601_v59  ;;  %v944_v33 = vsel %vm933_vm7, %v5604_v17, %v5603_v28 }
 0x252   :  { %5587 = vst [vmem:[#allocation45_spill] sm:$0xff] %v4477_v44  ;;  %5596 = vst [vmem:[#allocation44_spill] sm:$0xff] %v4494_v53  ;;  %v4500_v37 = vpop.permute.xlu0 %800  ;;  %v5605_v14 = vld [vmem:[#allocation43_spill] sm:$0xff]  ;;  %v1667_v0 = vsel %vm654_vm9, %v1660_v60, 0.0  ;;  %v1587_v44 = vmul.f32 %v4490_v20, %v1536_v8  ;;  %v998_v60 = vmul.f32 %v5607_v25, %v944_v33 }
 0x253   :  { %5592 = vst [vmem:[#allocation66_spill] sm:$0xff] %v4485_v26  ;;  %5599 = vst [vmem:[#allocation53_spill] sm:$0xff] %v4507_v40  ;;  %v819_v62 = vsel %vm812_vm6, %v5600_v61, %v4500_v37  ;;  %v1201_v61 = vsel %vm812_vm6, %v5606_v30, %v5605_v14  ;;  %v1605_v58 = vadd.f32 %v1589_v15, %v4360_v32  ;;  %v5608_v15 = vld [vmem:[#allocation98_spill] sm:$0xff] }
 0x254   :  { %v879_v51 = vmul.f32 %v4107_v47, %v819_v62  ;;  %v1635_v12 = vpop.permute.xlu1 %1634  ;;  %v1541_v47 = vsel %vm812_vm6, %v5585_v7, %v1523_v39  ;;  %v1700_v30 = vmul.f32 %v4448_v4, %v1657_v11  ;;  %v1698_v32 = vmul.f32 %v4494_v53, %v1648_v5 }
 0x255   :  { %v1653_v52 = vsel %vm933_vm7, %v5601_v59, %v1635_v12  ;;  %v1248_v8 = vmul.f32 %v5608_v15, %v1201_v61  ;;  %v1699_v23 = vmul.f32 %v4507_v40, %v1667_v0  ;;  %v1590_v11 = vmul.f32 %v4307_v46, %v1541_v47  ;;  %v5655_v46 = vld [vmem:[#allocation87_spill] sm:$0xff] }
 0x256   :  { %v895_v31 = vadd.f32 %v879_v51, %v774_v48  ;;  %v1701_v24 = vmul.f32 %v4313_v42, %v1653_v52  ;;  %v922_v62 = vpop.permute.xlu0 %921  ;;  %v5381_v48 = vmax.f32 %v4442_v43, 0.0  ;;  %v1603_v5 = vadd.f32 %v1587_v44, %v4425_v21 }
 0x257   :  { %v940_v59 = vsel %vm933_vm7, %v5603_v28, %v922_v62  ;;  %v4565_v47 = vadd.f32 %v1698_v32, %v4421_v56 }
 0x258   :  { %v4547_v19 = vadd.f32 %v1701_v24, %v1605_v58  ;;  %v999_v7 = vmul.f32 %v4121_v3, %v940_v59  ;;  %v1531_v52 = vpop.permute.xlu1 %1530  ;;  %v5610_v58 = vld [vmem:[#allocation92_spill] sm:$0xff] }
 0x259   :  { %v1537_v33 = vsel %vm812_vm6, %v1523_v39, %v1531_v52  ;;  %v1549_v28 = vsel %vm812_vm6, %v1531_v52, %v5586_v16  ;;  %5611 = vst [vmem:[#allocation57_spill] sm:$0xff] %v4565_v47  ;;  %v5612_v59 = vld [vmem:[#allocation64_spill] sm:$0xff]  ;;  %v4573_v16 = vadd.f32 %v1699_v23, %v1603_v5  ;;  %v1606_v52 = vadd.f32 %v1590_v11, %v4400_v18 }
 0x25a   :  { %5609 = vst [vmem:[#allocation47_spill] sm:$0xff] %v4547_v19  ;;  %v5378_v0 = vmax.f32 %v4547_v19, 0.0  ;;  %v1015_v51 = vadd.f32 %v999_v7, %v5610_v58  ;;  %v1556_v3 = vsel %vm647_vm8, %v1549_v28, 0.0  ;;  %v4562_v61 = vpop.permute.xlu0 %808  ;;  %v1591_v24 = vmul.f32 %v4490_v20, %v1537_v33  ;;  %v5614_v28 = vld [vmem:[#allocation102_spill] sm:$0xff] }
 0x25b   :  { %v1588_v39 = vmul.f32 %v4440_v2, %v1556_v3  ;;  %v827_v21 = vsel %vm812_vm6, %v4562_v61, %v5612_v59  ;;  %5613 = vst [vmem:[#allocation60_spill] sm:$0xff] %v4573_v16 }
 0x25c   :  { %v1780_v44 = vadd.f32 %v5378_v0, %v5381_v48  ;;  %v1152_v7 = vadd.f32 %v1136_v34, %v1015_v51  ;;  %v845_v56 = vsel %vm647_vm8, %v827_v21, 0.0  ;;  %v1643_v32 = vpop.permute.xlu1 %1642  ;;  %v1607_v18 = vadd.f32 %v1591_v24, %v4407_v36  ;;  %v5625_v48 = vld [vmem:[#allocation73_spill] sm:$0xff] }
 0x25d   :  { %v1604_v33 = vadd.f32 %v1588_v39, %v4410_v10  ;;  %v877_v58 = vmul.f32 %v5614_v28, %v845_v56  ;;  %v1649_v23 = vsel %vm933_vm7, %v1635_v12, %v1643_v32  ;;  %v1661_v3 = vsel %vm933_vm7, %v1643_v32, %v5602_v49 }
 0x25e   :  { %v1781_v5 = vrot.slane %v1780_v44, 4  ;;  %v1702_v34 = vmul.f32 %v4494_v53, %v1649_v23  ;;  %v4590_v51 = vpop.permute.xlu0 %929  ;;  %v4592_v59 = vadd.f32 %v1248_v8, %v1152_v7  ;;  %v1671_v39 = vsel %vm654_vm9, %v1661_v3, 0.0 }
 0x25f   :  { %v4595_v11 = vadd.f32 %v1700_v30, %v1604_v33  ;;  %v893_v10 = vadd.f32 %v877_v58, %v772_v63  ;;  %v1703_v21 = vmul.f32 %v4507_v40, %v1671_v39  ;;  %v936_v49 = vsel %vm933_vm7, %v922_v62, %v4590_v51  ;;  %v5619_v39 = vld [vmem:[#allocation71_spill] sm:$0xff] }
 0x260   :  { %v1782_v12 = vadd.f32 %v1781_v5, %v1780_v44  ;;  %v4600_v56 = vadd.f32 %v1702_v34, %v1606_v52  ;;  %v4605_v32 = vpop.permute.xlu1 %1277  ;;  %v5377_v8 = vmax.f32 %v4485_v26, 0.0  ;;  %v1000_v63 = vmul.f32 %v4200_v38, %v936_v49 }
 0x261   :  { %5615 = vst [vmem:[#allocation56_spill] sm:$0xff] %v4595_v11  ;;  %v5374_v30 = vmax.f32 %v4595_v11, 0.0  ;;  %v1014_v36 = vadd.f32 %v998_v60, %v893_v10  ;;  %v5376_v24 = vmax.f32 %v4565_v47, 0.0  ;;  %v4611_v7 = vadd.f32 %v1703_v21, %v1607_v18  ;;  %v5618_v10 = vld [vmem:[#allocation24_spill] sm:$0xff]  ;;  %v5634_v47 = vld [vmem:[#allocation31_spill] sm:$0xff] }
 0x262   :  { %5616 = vst [vmem:[#allocation94_spill] sm:$0xff] %v4600_v56  ;;  %v1783_v44 = vrot.slane %v1782_v12, 2  ;;  %v5375_v52 = vmax.f32 %v4600_v56, 0.0  ;;  %v4614_v33 = vpop.permute.xlu0 %1179  ;;  %v5380_v62 = vmax.f32 %v4573_v16, 0.0  ;;  %v1016_v23 = vadd.f32 %v1000_v63, %v895_v31  ;;  %v5620_v63 = vld [vmem:[#allocation19_spill] sm:$0xff] }
 0x263   :  { %5617 = vst [vmem:[#allocation96_spill] sm:$0xff] %v4611_v7  ;;  %v1773_v58 = vadd.f32 %v5374_v30, %v5377_v8  ;;  %v1197_v38 = vsel %vm812_vm6, %v5605_v14, %v4614_v33  ;;  %v5379_v5 = vmax.f32 %v4611_v7, 0.0  ;;  %v1135_v31 = vmul.f32 %v5619_v39, %v5618_v10  ;;  %v5635_v7 = vld [vmem:[#allocation65_spill] sm:$0xff] }
 0x264   :  { %v1784_v60 = vadd.f32 %v1783_v44, %v1782_v12  ;;  %v1787_v3 = vadd.f32 %v5375_v52, %v5376_v24  ;;  %v1249_v34 = vmul.f32 %v4208_v6, %v1197_v38  ;;  %v4631_v18 = vpop.permute.xlu1 %1285  ;;  %v1153_v49 = vadd.f32 %v4483_v29, %v1016_v23  ;;  %v5621_v12 = vld [vmem:[#allocation18_spill] sm:$0xff]  ;;  %v5622_v24 = vld [vmem:[#allocation20_spill] sm:$0xff] }
 0x265   :  { %v1774_v21 = vrot.slane %v1773_v58, 4  ;;  %v4638_v14 = vmul.f32 %v5619_v39, %v5620_v63  ;;  %v744_v44 = vmul.f32 %v5582_v50, %v5621_v12  ;;  %v1794_v38 = vadd.f32 %v5379_v5, %v5380_v62  ;;  %v5623_v63 = vld [vmem:[#allocation51_spill] sm:$0xff]  ;;  %v5624_v62 = vld [vmem:[#allocation52_spill] sm:$0xff] }
 0x266   :  { %v1788_v30 = vrot.slane %v1787_v3, 4  ;;  %v4646_v52 = vpop.permute.xlu0 %1283  ;;  %v4650_v10 = vmul.f32 %v5589_v57, %v5622_v24  ;;  %v4652_v23 = vadd.f32 %v1249_v34, %v1153_v49  ;;  %v4654_v39 = vadd.f32 %v1135_v31, %v1014_v36  ;;  %v5627_v57 = vld [vmem:[#allocation55_spill] sm:$0xff]  ;;  %v5628_v24 = vld [vmem:[#allocation74_spill] sm:$0xff]  ;;  %v5630_v36 = vld [vmem:[#allocation21_spill] sm:$0xff] }
 0x267   :  { %v1775_v29 = vadd.f32 %v1774_v21, %v1773_v58  ;;  %v828_v50 = vsel %vm812_vm6, %v4433_v45, %v5623_v63  ;;  %v1785_v12 = vrot.slane %v1784_v60, 1  ;;  %v1795_v0 = vrot.slane %v1794_v38, 4  ;;  %v5632_v21 = vld [vmem:[#allocation22_spill] sm:$0xff] }
 0x268   :  { %v1789_v8 = vadd.f32 %v1788_v30, %v1787_v3  ;;  %v4660_v5 = vpop.permute.xlu1 %1510  ;;  %v4664_v56 = vmul.f32 %v5625_v48, %v5624_v62  ;;  %v4668_v58 = vmul.f32 %v5628_v24, %v5627_v57  ;;  %v4672_v34 = vmul.f32 %v5625_v48, %v5630_v36  ;;  %v5633_v62 = vld [vmem:[#allocation54_spill] sm:$0xff] }
 0x269   :  { %v1776_v31 = vrot.slane %v1775_v29, 2  ;;  %v4676_v45 = vmul.f32 %v5628_v24, %v5632_v21  ;;  %v776_v30 = vadd.f32 %v5593_v9, %v744_v44  ;;  %v1796_v49 = vadd.f32 %v1795_v0, %v1794_v38 }
 0x26a   :  { %5626 = vst [vmem:[#allocation35_spill] sm:$0xff] %v4664_v56  ;;  %5629 = vst [vmem:[#allocation59_spill] sm:$0xff] %v4668_v58  ;;  %v1790_v3 = vrot.slane %v1789_v8, 2  ;;  %v4679_v63 = vpop.permute.xlu0 %1291  ;;  %v945_v57 = vsel %vm933_vm7, %v5633_v62, %v5568_v22  ;;  %v4687_v48 = vmul.f32 %v5591_v27, %v5634_v47  ;;  %v849_v36 = vsel %vm647_vm8, %v828_v50, 0.0  ;;  %v5636_v22 = vld [vmem:[#allocation78_spill] sm:$0xff]  ;;  %v5637_v27 = vld [vmem:[#allocation32_spill] sm:$0xff] }
 0x26b   :  { %5631 = vst [vmem:[#allocation29_spill] sm:$0xff] %v4672_v34  ;;  %v1777_v24 = vadd.f32 %v1776_v31, %v1775_v29  ;;  %v949_v9 = vsel %vm933_vm7, %v4461_v13, %v5633_v62  ;;  %v1786_v0 = vadd.f32 %v1785_v12, %v1784_v60  ;;  %v1797_v38 = vrot.slane %v1796_v49, 2  ;;  %v5638_v47 = vld [vmem:[#allocation82_spill] sm:$0xff]  ;;  %v5640_v29 = vld [vmem:[#allocation27_spill] sm:$0xff]  ;;  %v4712_v13 = vld [vmem:[%s5248_s8 + $0x28] sm:$0xff] }
 0x26c   :  { %v1791_v44 = vadd.f32 %v1790_v3, %v1789_v8  ;;  %v4695_v21 = vpop.permute.xlu1 %1518  ;;  %v4699_v16 = vmul.f32 %v5636_v22, %v5635_v7  ;;  %v4703_v11 = vmul.f32 %v5638_v47, %v5637_v27  ;;  %v4707_v31 = vmul.f32 %v5570_v55, %v5640_v29  ;;  %5641 = vst [vmem:[#allocation101_spill] sm:$0xff] %v4712_v13  ;;  %v4717_v8 = vld [vmem:[%s5248_s8 + $0x8] sm:$0xff]  ;;  %v4733_v27 = vld [vmem:[%s5248_s8 + $0x20] sm:$0xff] }
 0x26d   :  { %v1778_v50 = vrot.slane %v1777_v24, 1  ;;  %5642 = vst [vmem:[#allocation37_spill] sm:$0xff] %v4717_v8  ;;  %v4722_v7 = vld [vmem:[%s5248_s8 + $0x48] sm:$0xff]  ;;  %v4725_v60 = vmul.f32 %v5607_v25, %v945_v57  ;;  %v881_v55 = vmul.f32 %v5614_v28, %v849_v36  ;;  %v1798_v3 = vadd.f32 %v1797_v38, %v1796_v49  ;;  %5644 = vst [vmem:[#allocation68_spill] sm:$0xff] %v4733_v27  ;;  %v4738_v29 = vld [vmem:[%s5248_s8] sm:$0xff] }
 0x26e   :  { %5639 = vst [vmem:[#allocation86_spill] sm:$0xff] %v4703_v11  ;;  %5643 = vst [vmem:[#allocation62_spill] sm:$0xff] %v4722_v7  ;;  %v1792_v12 = vrot.slane %v1791_v44, 1  ;;  %v4728_v62 = vpop.permute.xlu0 %1508  ;;  %v4743_v25 = vld [vmem:[%s5248_s8 + $0x40] sm:$0xff]  ;;  %v973_v28 = vsel %vm654_vm9, %v949_v9, 0.0  ;;  %v815_v49 = vsel %vm812_vm6, %v4500_v37, %v4562_v61  ;;  %v948_v57 = vsel %vm933_vm7, %v4590_v51, %v5604_v17  ;;  %v4758_v36 = vld [vmem:[%s5248_s8 + $0x30] sm:$0xff] }
 0x26f   :  { %5645 = vst [vmem:[#allocation69_spill] sm:$0xff] %v4738_v29  ;;  %5646 = vst [vmem:[#allocation58_spill] sm:$0xff] %v4743_v25  ;;  %v1779_v38 = vadd.f32 %v1778_v50, %v1777_v24  ;;  %v4763_v9 = vld [vmem:[%s5248_s8 + $0x10] sm:$0xff]  ;;  %v1799_v17 = vrot.slane %v1798_v3, 1  ;;  %v1806_v51 = vmul.f32 %v1786_v0, %v4712_v13  ;;  %v1802_v19 = vmul.f32 %v1786_v0, %v4717_v8  ;;  %v4777_v24 = vld [vmem:[%s5248_s8 + $0x60] sm:$0xff] }
 0x270   :  { %5647 = vst [vmem:[#allocation17_spill] sm:$0xff] %v4758_v36  ;;  %5648 = vst [vmem:[#allocation76_spill] sm:$0xff] %v4763_v9  ;;  %v4768_v37 = vld [vmem:[%s5248_s8 + $0x50] sm:$0xff]  ;;  %v1793_v61 = vadd.f32 %v1792_v12, %v1791_v44  ;;  %v4770_v26 = vpop.permute.xlu1 %1622  ;;  %v1810_v44 = vmul.f32 %v1786_v0, %v4722_v7  ;;  %v4786_v12 = vld [vmem:[%s5248_s8 + $0x68] sm:$0xff] }
 0x271   :  { %5649 = vst [vmem:[#allocation25_spill] sm:$0xff] %v4768_v37  ;;  %5650 = vst [vmem:[#allocation85_spill] sm:$0xff] %v4777_v24  ;;  %v1805_v50 = vmul.f32 %v1779_v38, %v4733_v27  ;;  %v1801_v43 = vmul.f32 %v1779_v38, %v4738_v29  ;;  %v1809_v40 = vmul.f32 %v1779_v38, %v4743_v25  ;;  %v4793_v8 = vld [vmem:[%s5248_s8 + $0x38] sm:$0xff]  ;;  %v5654_v34 = vld [vmem:[#allocation95_spill] sm:$0xff] }
 0x272   :  { %5651 = vst [vmem:[#allocation67_spill] sm:$0xff] %v4786_v12  ;;  %v4788_v13 = vpop.permute.xlu0 %1516  ;;  %5652 = vst [vmem:[#allocation61_spill] sm:$0xff] %v4793_v8  ;;  %v1800_v53 = vadd.f32 %v1799_v17, %v1798_v3  ;;  %v1807_v27 = vmul.f32 %v1793_v61, %v4758_v36  ;;  %v4799_v25 = vld [vmem:[%s5248_s8 + $0x18] sm:$0xff]  ;;  %v1803_v7 = vmul.f32 %v1793_v61, %v4763_v9  ;;  %v969_v36 = vsel %vm654_vm9, %v948_v57, 0.0  ;;  %v5659_v58 = vld [vmem:[#allocation91_spill] sm:$0xff] }
 0x273   :  { %5653 = vst [vmem:[#allocation30_spill] sm:$0xff] %v4799_v25  ;;  %v1811_v29 = vmul.f32 %v1793_v61, %v4768_v37  ;;  %v1822_v42 = vadd.f32 %v1806_v51, %v1805_v50  ;;  %v1817_v56 = vadd.f32 %v1802_v19, %v1801_v43  ;;  %v1827_v20 = vadd.f32 %v1810_v44, %v1809_v40  ;;  %v4815_v37 = vld [vmem:[%s5248_s8 + $0x70] sm:$0xff]  ;;  %v5656_v50 = vld [vmem:[#allocation26_spill] sm:$0xff] }
 0x274   :  { %v1813_v2 = vmul.f32 %v1779_v38, %v4777_v24  ;;  %v1202_v3 = vsel %vm812_vm6, %v5655_v46, %v5654_v34  ;;  %v897_v17 = vadd.f32 %v881_v55, %v776_v30  ;;  %v4810_v11 = vpop.permute.xlu1 %1630  ;;  %v1814_v43 = vmul.f32 %v1786_v0, %v4786_v12  ;;  %v4831_v0 = vld [vmem:[%s5248_s8 + $0x58] sm:$0xff] }
 0x275   :  { %v1808_v19 = vmul.f32 %v1800_v53, %v4793_v8  ;;  %v1823_v40 = vadd.f32 %v1822_v42, %v1807_v27  ;;  %v1804_v38 = vmul.f32 %v1800_v53, %v4799_v25  ;;  %v1818_v51 = vadd.f32 %v1817_v56, %v1803_v7  ;;  %v5658_v25 = vld [vmem:[#allocation89_spill] sm:$0xff] }
 0x276   :  { %v1005_v30 = vmul.f32 %v5656_v50, %v973_v28  ;;  %v880_v55 = vmul.f32 %v4194_v35, %v815_v49  ;;  %v1309_v57 = vsel %vm933_vm7, %v4646_v52, %v4679_v63  ;;  %v4826_v44 = vpop.permute.xlu0 %1620  ;;  %v1828_v42 = vadd.f32 %v1827_v20, %v1811_v29  ;;  %v5657_v28 = vld [vmem:[#allocation33_spill] sm:$0xff] }
 0x277   :  { %v1824_v27 = vadd.f32 %v1823_v40, %v1808_v19  ;;  %v1819_v8 = vadd.f32 %v1818_v51, %v1804_v38  ;;  %v1815_v56 = vmul.f32 %v1793_v61, %v4815_v37  ;;  %v1832_v7 = vadd.f32 %v1814_v43, %v1813_v2  ;;  %v5660_v61 = vld [vmem:[#allocation50_spill] sm:$0xff]  ;;  %v5661_v43 = vld [vmem:[#allocation28_spill] sm:$0xff]  ;;  %v5665_v40 = vld [vmem:[#allocation45_spill] sm:$0xff] }
 0x278   :  { %v1142_v35 = vmul.f32 %v5636_v22, %v5657_v28  ;;  %v1156_v49 = vadd.f32 %v4650_v10, %v4430_v1  ;;  %v775_v9 = vadd.f32 %v5658_v25, %v4707_v31  ;;  %v1001_v12 = vmul.f32 %v5656_v50, %v969_v36  ;;  %v1182_v24 = vpop.permute.xlu1 %1181 }
 0x279   :  { %v4843_v20 = vmul.f32 %v5638_v47, %v5659_v58  ;;  %v1018_v29 = vadd.f32 %v4725_v60, %v897_v17  ;;  %1825 = vadd.xlane.f32.xlu1 %v1824_v27  ;;  %1820 = vadd.xlane.f32.xlu0 %v1819_v8  ;;  %v1812_v2 = vmul.f32 %v1800_v53, %v4831_v0  ;;  %v4855_v58 = vld [vmem:[%s5248_s8 + $0x78] sm:$0xff]  ;;  %v5663_v60 = vld [vmem:[#allocation84_spill] sm:$0xff] }
 0x27a   :  { %v1252_v22 = vmul.f32 %v5608_v15, %v1202_v3  ;;  %v1021_v1 = vadd.f32 %v1005_v30, %v5660_v61  ;;  %v896_v10 = vadd.f32 %v880_v55, %v775_v9  ;;  %v1360_v31 = vmul.f32 %v5661_v43, %v1309_v57  ;;  %v4850_v25 = vpop.permute.xlu0 %1628  ;;  %v5662_v47 = vld [vmem:[#allocation34_spill] sm:$0xff]  ;;  %v5664_v3 = vld [vmem:[#allocation97_spill] sm:$0xff]  ;;  %v5666_v30 = vld [vmem:[#allocation104_spill] sm:$0xff] }
 0x27b   :  { %v4859_v36 = vmul.f32 %v5663_v60, %v5662_v47  ;;  %v1314_v15 = vsel %vm933_vm7, %v4605_v32, %v4631_v18  ;;  %v1829_v8 = vadd.f32 %v1828_v42, %v1812_v2  ;;  %v1833_v9 = vadd.f32 %v1832_v7, %v1815_v56 }
 0x27c   :  { %v4867_v17 = vmul.f32 %v5663_v60, %v5664_v3  ;;  %v1017_v19 = vadd.f32 %v1001_v12, %v896_v10  ;;  %v1157_v38 = vadd.f32 %v4687_v48, %v5665_v40  ;;  %v1268_v51 = vadd.f32 %v1252_v22, %v1156_v49  ;;  %v1294_v50 = vpop.permute.xlu1 %1293  ;;  %v5667_v12 = vld [vmem:[#allocation99_spill] sm:$0xff]  ;;  %v5669_v10 = vld [vmem:[#allocation38_spill] sm:$0xff] }
 0x27d   :  { %v1313_v55 = vsel %vm933_vm7, %v5666_v30, %v4646_v52  ;;  %v1198_v57 = vsel %vm812_vm6, %v5654_v34, %v1182_v24  ;;  %1830 = vadd.xlane.f32.xlu0 %v1829_v8  ;;  %v1155_v42 = vadd.f32 %v4638_v14, %v1018_v29  ;;  %v1816_v27 = vmul.f32 %v1800_v53, %v4855_v58  ;;  %v5668_v14 = vld [vmem:[#allocation100_spill] sm:$0xff] }
 0x27e   :  { %v1363_v56 = vmul.f32 %v5667_v12, %v1314_v15  ;;  %v1376_v48 = vadd.f32 %v1360_v31, %v4592_v59  ;;  %v1310_v7 = vsel %vm933_vm7, %v4631_v18, %v1294_v50  ;;  %v1188_v28 = vpop.permute.xlu0 %1187  ;;  %v1158_v49 = vadd.f32 %v1142_v35, %v1021_v1 }
 0x27f   :  { %v1547_v52 = vsel %vm812_vm6, %v4660_v5, %v4695_v21  ;;  %v1546_v53 = vsel %vm812_vm6, %v4728_v62, %v4788_v13  ;;  %v1205_v59 = vsel %vm812_vm6, %v1188_v28, %v5668_v14  ;;  %v1834_v34 = vadd.f32 %v1833_v9, %v1816_v27 }
 0x280   :  { %v1359_v29 = vmul.f32 %v5667_v12, %v1313_v55  ;;  %v1253_v18 = vmul.f32 %v4208_v6, %v1198_v57  ;;  %v1154_v35 = vadd.f32 %v4699_v16, %v1017_v19  ;;  %v1215_v2 = vsel %vm647_vm8, %v1205_v59, 0.0  ;;  %v1190_v22 = vpop.permute.xlu1 %1189  ;;  %v5670_v6 = vld [vmem:[#allocation103_spill] sm:$0xff]  ;;  %v5671_v19 = vld [vmem:[#allocation42_spill] sm:$0xff] }
 0x281   :  { %v1364_v61 = vmul.f32 %v5661_v43, %v1310_v7  ;;  %v1193_v1 = vsel %vm812_vm6, %v4614_v33, %v1188_v28  ;;  %v1247_v31 = vmul.f32 %v5669_v10, %v1215_v2  ;;  %v1206_v47 = vsel %vm812_vm6, %v1190_v22, %v5655_v46  ;;  %1835 = vadd.xlane.f32.xlu0 %v1834_v34  ;;  %v5672_v55 = vld [vmem:[#allocation23_spill] sm:$0xff] }
 0x282   :  { %v1597_v60 = vmul.f32 %v5670_v6, %v1547_v52  ;;  %v1497_v16 = vadd.f32 %v4676_v45, %v1376_v48  ;;  %v1593_v15 = vmul.f32 %v5670_v6, %v1546_v53  ;;  %v1219_v43 = vsel %vm647_vm8, %v1206_v47, 0.0  ;;  %v1300_v8 = vpop.permute.xlu0 %1299 }
 0x283   :  { %v1194_v33 = vsel %vm812_vm6, %v1182_v24, %v1190_v22  ;;  %v1251_v9 = vmul.f32 %v5669_v10, %v1219_v43  ;;  %v1305_v46 = vsel %vm933_vm7, %v4679_v63, %v1300_v8  ;;  %v1317_v3 = vsel %vm933_vm7, %v1300_v8, %v5666_v30  ;;  %v5675_v43 = vld [vmem:[#allocation86_spill] sm:$0xff] }
 0x284   :  { %v1659_v45 = vsel %vm933_vm7, %v4770_v26, %v4810_v11  ;;  %v1250_v40 = vmul.f32 %v5671_v19, %v1193_v1  ;;  %v1330_v24 = vsel %vm654_vm9, %v1317_v3, 0.0  ;;  %v1361_v57 = vmul.f32 %v5672_v55, %v1305_v46  ;;  %v1302_v27 = vpop.permute.xlu1 %1301  ;;  %v5677_v3 = vld [vmem:[#allocation29_spill] sm:$0xff] }
 0x285   :  { %v1269_v12 = vadd.f32 %v1253_v18, %v1157_v38  ;;  %v1380_v48 = vadd.f32 %v1364_v61, %v1268_v51  ;;  %v1263_v63 = vadd.f32 %v1247_v31, %v4654_v39  ;;  %v1306_v30 = vsel %vm933_vm7, %v1294_v50, %v1302_v27  ;;  %v5673_v51 = vld [vmem:[#allocation39_spill] sm:$0xff] }
 0x286   :  { %v1254_v7 = vmul.f32 %v5671_v19, %v1194_v33  ;;  %v1267_v28 = vadd.f32 %v1251_v9, %v1155_v42  ;;  %v1318_v52 = vsel %vm933_vm7, %v1302_v27, %v4605_v32  ;;  %v1365_v53 = vmul.f32 %v5672_v55, %v1306_v30  ;;  %v1525_v14 = vpop.permute.xlu0 %1524  ;;  %v5674_v31 = vld [vmem:[#allocation59_spill] sm:$0xff]  ;;  %v5676_v33 = vld [vmem:[#allocation40_spill] sm:$0xff]  ;;  %v5678_v19 = vld [vmem:[#allocation46_spill] sm:$0xff] }
 0x287   :  { %v1658_v38 = vsel %vm933_vm7, %v4826_v44, %v4850_v25  ;;  %v1362_v39 = vmul.f32 %v5673_v51, %v1330_v24  ;;  %v1377_v59 = vadd.f32 %v1361_v57, %v4652_v23  ;;  %v1334_v50 = vsel %vm654_vm9, %v1318_v52, 0.0  ;;  %v5680_v57 = vld [vmem:[#allocation35_spill] sm:$0xff] }
 0x288   :  { %v1609_v42 = vadd.f32 %v1593_v15, %v1497_v16  ;;  %v1708_v34 = vmul.f32 %v4448_v4, %v1659_v45  ;;  %v1266_v18 = vadd.f32 %v1250_v40, %v1154_v35  ;;  %v1381_v32 = vadd.f32 %v1365_v53, %v1269_v12  ;;  %v1527_v2 = vpop.permute.xlu1 %1526 }
 0x289   :  { %v1375_v22 = vadd.f32 %v1359_v29, %v1263_v63  ;;  %v1366_v61 = vmul.f32 %v5673_v51, %v1334_v50  ;;  %v1542_v1 = vsel %vm812_vm6, %v4788_v13, %v1525_v14  ;;  %v1543_v23 = vsel %vm812_vm6, %v4695_v21, %v1527_v2 }
 0x28a   :  { %v1704_v10 = vmul.f32 %v4448_v4, %v1658_v38  ;;  %v1501_v47 = vadd.f32 %v5674_v31, %v1380_v48  ;;  %v1270_v6 = vadd.f32 %v1254_v7, %v1158_v49  ;;  %v1379_v16 = vadd.f32 %v1363_v56, %v1267_v28  ;;  %v1533_v35 = vpop.permute.xlu0 %1532 }
 0x28b   :  { %v1378_v15 = vadd.f32 %v1362_v39, %v1266_v18  ;;  %v1498_v29 = vadd.f32 %v5675_v43, %v1377_v59  ;;  %v1538_v8 = vsel %vm812_vm6, %v1525_v14, %v1533_v35  ;;  %v1550_v13 = vsel %vm812_vm6, %v1533_v35, %v4728_v62  ;;  %v5679_v62 = vld [vmem:[#allocation49_spill] sm:$0xff]  ;;  %v5681_v14 = vld [vmem:[#allocation36_spill] sm:$0xff] }
 0x28c   :  { %v1594_v9 = vmul.f32 %v5676_v33, %v1542_v1  ;;  %v1502_v21 = vadd.f32 %v4843_v20, %v1381_v32  ;;  %v1598_v4 = vmul.f32 %v5676_v33, %v1543_v23  ;;  %v1560_v56 = vsel %vm647_vm8, %v1550_v13, 0.0  ;;  %v1535_v49 = vpop.permute.xlu1 %1534 }
 0x28d   :  { %v1382_v46 = vadd.f32 %v1366_v61, %v1270_v6  ;;  %v1496_v45 = vadd.f32 %v5677_v3, %v1375_v22  ;;  %v1592_v40 = vmul.f32 %v5678_v19, %v1560_v56  ;;  %v1551_v24 = vsel %vm812_vm6, %v1535_v49, %v4660_v5  ;;  %v5683_v6 = vld [vmem:[#allocation53_spill] sm:$0xff] }
 0x28e   :  { %v1595_v55 = vmul.f32 %v5679_v62, %v1538_v8  ;;  %v1500_v27 = vadd.f32 %v5680_v57, %v1379_v16  ;;  %v1564_v20 = vsel %vm647_vm8, %v1551_v24, 0.0  ;;  %v1637_v12 = vpop.permute.xlu0 %1636  ;;  %v1613_v48 = vadd.f32 %v1597_v60, %v1501_v47 }
 0x28f   :  { %v1608_v63 = vadd.f32 %v1592_v40, %v1496_v45  ;;  %v1539_v30 = vsel %vm812_vm6, %v1527_v2, %v1535_v49  ;;  %v1596_v7 = vmul.f32 %v5678_v19, %v1564_v20  ;;  %v1654_v28 = vsel %vm933_vm7, %v4850_v25, %v1637_v12 }
 0x290   :  { %v1610_v5 = vadd.f32 %v1594_v9, %v1498_v29  ;;  %v1614_v52 = vadd.f32 %v1598_v4, %v1502_v21  ;;  %v1499_v53 = vadd.f32 %v4859_v36, %v1378_v15  ;;  %v1705_v38 = vmul.f32 %v5681_v14, %v1654_v28  ;;  %v1639_v51 = vpop.permute.xlu1 %1638 }
 0x291   :  { %v4985_v39 = vadd.f32 %v1704_v10, %v1608_v63  ;;  %v1503_v60 = vadd.f32 %v4867_v17, %v1382_v46  ;;  %v1612_v59 = vadd.f32 %v1596_v7, %v1500_v27  ;;  %v1655_v50 = vsel %vm933_vm7, %v4810_v11, %v1639_v51  ;;  %v5682_v10 = vld [vmem:[#allocation44_spill] sm:$0xff] }
 0x292   :  { %v1611_v18 = vadd.f32 %v1595_v55, %v1499_v53  ;;  %v1599_v32 = vmul.f32 %v5679_v62, %v1539_v30  ;;  %v4992_v25 = vadd.f32 %v1705_v38, %v1609_v42  ;;  %v1709_v2 = vmul.f32 %v5681_v14, %v1655_v50  ;;  %v1645_v36 = vpop.permute.xlu0 %1644  ;;  %v5685_v50 = vld [vmem:[#allocation68_spill] sm:$0xff] }
 0x293   :  { %v1736_v22 = vmax.f32 %v4985_v39, 0.0  ;;  %v4996_v61 = vadd.f32 %v1708_v34, %v1612_v59  ;;  %v1650_v17 = vsel %vm933_vm7, %v1637_v12, %v1645_v36  ;;  %v1662_v1 = vsel %vm933_vm7, %v1645_v36, %v4826_v44  ;;  %v5710_v39 = vld [vmem:[#allocation57_spill] sm:$0xff] }
 0x294   :  { %v1737_v11 = vmax.f32 %v4992_v25, 0.0  ;;  %v5004_v23 = vadd.f32 %v1709_v2, %v1613_v48  ;;  %v1675_v42 = vsel %vm654_vm9, %v1662_v1, 0.0  ;;  %v1706_v31 = vmul.f32 %v5682_v10, %v1650_v17  ;;  %v1647_v47 = vpop.permute.xlu1 %1646  ;;  %v5686_v2 = vld [vmem:[#allocation37_spill] sm:$0xff] }
 0x295   :  { %v1740_v34 = vmax.f32 %v4996_v61, 0.0  ;;  %v1707_v16 = vmul.f32 %v5683_v6, %v1675_v42  ;;  %v1651_v35 = vsel %vm933_vm7, %v1639_v51, %v1647_v47  ;;  %v1663_v44 = vsel %vm933_vm7, %v1647_v47, %v4770_v26  ;;  %v5687_v17 = vld [vmem:[#allocation101_spill] sm:$0xff] }
 0x296   :  { %v1741_v15 = vmax.f32 %v5004_v23, 0.0  ;;  %v5017_v43 = vadd.f32 %v1706_v31, %v1610_v5  ;;  %v1679_v29 = vsel %vm654_vm9, %v1663_v44, 0.0  ;;  %v1710_v8 = vmul.f32 %v5682_v10, %v1651_v35  ;;  %v5688_v10 = vld [vmem:[#allocation58_spill] sm:$0xff]  ;;  %v5690_v35 = vld [vmem:[#allocation85_spill] sm:$0xff] }
 0x297   :  { %v1615_v13 = vadd.f32 %v1599_v32, %v1503_v60  ;;  %v1985_v33 = vadd.f32 %v1740_v34, %v1736_v22  ;;  %v5026_v9 = vadd.f32 %v1707_v16, %v1611_v18  ;;  %v1711_v54 = vmul.f32 %v5683_v6, %v1679_v29  ;;  %v5684_v60 = vld [vmem:[#allocation69_spill] sm:$0xff]  ;;  %v5689_v6 = vld [vmem:[#allocation62_spill] sm:$0xff]  ;;  %v5691_v29 = vld [vmem:[#allocation67_spill] sm:$0xff] }
 0x298   :  { %v1992_v26 = vadd.f32 %v1741_v15, %v1737_v11  ;;  %v5033_v21 = vadd.f32 %v1710_v8, %v1614_v52  ;;  %v1738_v49 = vmax.f32 %v5017_v43, 0.0  ;;  %v3097_v23 = vld [vmem:[#allocation8 + $0x1f0] ss:$8 sps:$4 sm:$0xff]   ;;  %v3148_v43 = vld [vmem:[#allocation2] sm:$0xff] }
 0x299   :  { %v1986_v41 = vrot.slane %v1985_v33, 4  ;;  %v5035_v4 = vadd.f32 %v1711_v54, %v1615_v13  ;;  %v1739_v45 = vmax.f32 %v5026_v9, 0.0  ;;  %v2268_v9 = vld [vmem:[%s5250_s10] sm:$0x3]  ;;  %s3286_s10 = smov [#allocation10]  }
 0x29a   :  { %v1993_v56 = vrot.slane %v1992_v26, 4  ;;  %v1742_v46 = vmax.f32 %v5033_v21, 0.0  ;;  %s2727_s13 = sshll.u32 %s3286_s10, 4  ;;  %s2728_s13 = int_to_ptr.vmem [resolvable:$true] %s2727_s13 }
 0x29b   :  { %v1987_v3 = vadd.f32 %v1986_v41, %v1985_v33  ;;  %v1743_v19 = vmax.f32 %v5035_v4, 0.0  ;;  %s3244_s14 = scalar_lea.vmem %s2728_s13, 1024  ;;  %p3249_p5 = scmp.lt.s32.totalorder %s2728_s13, %s2728_s13 }
 0x29c   :  { %v1994_v40 = vadd.f32 %v1993_v56, %v1992_v26  ;;  %v1999_v24 = vadd.f32 %v1742_v46, %v1738_v49  ;;  %v5692_v26 = vld [vmem:[#allocation76_spill] sm:$0xff]  ;;  %v5693_v56 = vld [vmem:[#allocation17_spill] sm:$0xff]  ;;  %p3245_p4 = scmp.ne.s32.totalorder %s2728_s13, %s3244_s14  ;;  %p3250_p6 = scmp.lt.s32.totalorder %s3244_s14, %s3244_s14 }
 0x29d   :  { %v1988_v62 = vrot.slane %v1987_v3, 2  ;;  %v2006_v55 = vadd.f32 %v1743_v19, %v1739_v45 }
 0x29e   :  { %v1995_v57 = vrot.slane %v1994_v40, 2  ;;  %v2000_v27 = vrot.slane %v1999_v24, 4  ;;  %p3251_p7 = por %p3250_p6, %p3249_p5 }
 0x29f   :  { %v1989_v20 = vadd.f32 %v1988_v62, %v1987_v3  ;;  %v2007_v12 = vrot.slane %v2006_v55, 4 }
 0x2a0   :  { %v1996_v48 = vadd.f32 %v1995_v57, %v1994_v40  ;;  %v2001_v63 = vadd.f32 %v2000_v27, %v1999_v24  ;;  %v5694_v40 = vld [vmem:[#allocation25_spill] sm:$0xff]  ;;  %p3252_p8 = pnand %p3251_p7, %p3245_p4 }
 0x2a1   :  { %v1990_v30 = vrot.slane %v1989_v20, 1  ;;  %v2008_v7 = vadd.f32 %v2007_v12, %v2006_v55  ;;  %v5695_v55 = vld [vmem:[#allocation30_spill] sm:$0xff]  ;;  %v5696_v27 = vld [vmem:[#allocation61_spill] sm:$0xff] }
 0x2a2   :  { %v1997_v28 = vrot.slane %v1996_v48, 1  ;;  %v2002_v5 = vrot.slane %v2001_v63, 2 }
 0x2a3   :  { %v1991_v52 = vadd.f32 %v1990_v30, %v1989_v20  ;;  %v2009_v53 = vrot.slane %v2008_v7, 2 }
 0x2a4   :  { %v1998_v14 = vadd.f32 %v1997_v28, %v1996_v48  ;;  %v2003_v38 = vadd.f32 %v2002_v5, %v2001_v63 }
 0x2a5   :  { %v2010_v51 = vadd.f32 %v2009_v53, %v2008_v7  ;;  %v2013_v59 = vmul.f32 %v1991_v52, %v5684_v60  ;;  %v2017_v18 = vmul.f32 %v1991_v52, %v5685_v50  ;;  %v2021_v31 = vmul.f32 %v1991_v52, %v5688_v10 }
 0x2a6   :  { %v2004_v32 = vrot.slane %v2003_v38, 1  ;;  %v2014_v36 = vmul.f32 %v1998_v14, %v5686_v2  ;;  %v2018_v1 = vmul.f32 %v1998_v14, %v5687_v17  ;;  %v2022_v16 = vmul.f32 %v1998_v14, %v5689_v6 }
 0x2a7   :  { %v2011_v42 = vrot.slane %v2010_v51, 1  ;;  %v2025_v44 = vmul.f32 %v1991_v52, %v5690_v35  ;;  %v2026_v8 = vmul.f32 %v1998_v14, %v5691_v29 }
 0x2a8   :  { %v2005_v47 = vadd.f32 %v2004_v32, %v2003_v38  ;;  %v2029_v33 = vadd.f32 %v2014_v36, %v2013_v59  ;;  %v2034_v54 = vadd.f32 %v2018_v1, %v2017_v18  ;;  %v2039_v63 = vadd.f32 %v2022_v16, %v2021_v31  ;;  %v1761_v59 = vld [vmem:[%s5244_s4 + $0x8] sm:$0xff]  ;;  %v1760_v18 = vld [vmem:[%s5244_s4] sm:$0xff]  ;;  %v1762_v31 = vld [vmem:[%s5244_s4 + $0x10] sm:$0xff] }
 0x2a9   :  { %v2012_v13 = vadd.f32 %v2011_v42, %v2010_v51  ;;  %v2044_v30 = vadd.f32 %v2026_v8, %v2025_v44 }
 0x2aa   :  { %v2015_v41 = vmul.f32 %v2005_v47, %v5692_v26  ;;  %v2019_v3 = vmul.f32 %v2005_v47, %v5693_v56  ;;  %v2023_v24 = vmul.f32 %v2005_v47, %v5694_v40  ;;  %v2027_v62 = vmul.f32 %v2005_v47, %v4815_v37 }
 0x2ab   :  { %v2016_v57 = vmul.f32 %v2012_v13, %v5695_v55  ;;  %v2020_v20 = vmul.f32 %v2012_v13, %v5696_v27  ;;  %v2024_v7 = vmul.f32 %v2012_v13, %v4831_v0  ;;  %v2028_v28 = vmul.f32 %v2012_v13, %v4855_v58  ;;  %v1763_v13 = vld [vmem:[%s5244_s4 + $0x18] sm:$0xff] }
 0x2ac   :  { %v2030_v12 = vadd.f32 %v2029_v33, %v2015_v41  ;;  %v2035_v48 = vadd.f32 %v2034_v54, %v2019_v3  ;;  %v2040_v53 = vadd.f32 %v2039_v63, %v2023_v24  ;;  %v2045_v14 = vadd.f32 %v2044_v30, %v2027_v62  ;;  %v1764_v63 = vld [vmem:[%s5245_s5] sm:$0x1] }
 0x2ae   :  { %v2031_v5 = vadd.f32 %v2030_v12, %v2016_v57  ;;  %v2036_v52 = vadd.f32 %v2035_v48, %v2020_v20  ;;  %v2041_v38 = vadd.f32 %v2040_v53, %v2024_v7  ;;  %v2046_v51 = vadd.f32 %v2045_v14, %v2028_v28  ;;  %v5697_v53 = vld [vmem:[#allocation15_spill] sm:$0xff] }
 0x2af   :  { %v2273_v4 = vrot.slane %v2268_v9, %v5697_v53 }
 0x2b0   :  { %2032 = vadd.xlane.f32.xlu1 %v2031_v5  ;;  %2037 = vadd.xlane.f32.xlu0 %v2036_v52  ;;  %v1766_v5 = vld [vmem:[%s5246_s6 + $0x8] sm:$0xff]  ;;  %v1765_v52 = vld [vmem:[%s5246_s6] sm:$0xff] }
 0x2b4   :  { %2042 = vadd.xlane.f32.xlu1 %v2041_v38  ;;  %2047 = vadd.xlane.f32.xlu0 %v2046_v51  ;;  %v1768_v38 = vld [vmem:[%s5246_s6 + $0x18] sm:$0xff]  ;;  %v1767_v51 = vld [vmem:[%s5246_s6 + $0x10] sm:$0xff] }
 0x306   :  { %v1826_v32 = vpop.xlane.xlu1 %1825  ;;  %v1821_v36 = vpop.xlane.xlu0 %1820 }
 0x307   :  { %v1838_v1 = vmul.f32 %v1826_v32, %v1761_v59  ;;  %v1837_v42 = vmul.f32 %v1821_v36, %v1760_v18 }
 0x309   :  { %v1843_v16 = vsel %vm1841_vm10, %v1838_v1, 0.0  ;;  %v1842_v44 = vsel %vm1841_vm10, %v1837_v42, 0.0 }
 0x30a   :  { %v1831_v47 = vpop.xlane.xlu0 %1830  ;;  %v1844_v54 = vadd.f32 %v1843_v16, %v1842_v44 }
 0x30b   :  { %v1839_v8 = vmul.f32 %v1831_v47, %v1762_v31 }
 0x30d   :  { %v1845_v33 = vsel %vm1841_vm10, %v1839_v8, 0.0 }
 0x30e   :  { %v1836_v41 = vpop.xlane.xlu0 %1835  ;;  %v1846_v24 = vadd.f32 %v1845_v33, %v1844_v54 }
 0x30f   :  { %v1840_v3 = vmul.f32 %v1836_v41, %v1763_v13 }
 0x311   :  { %v1847_v62 = vsel %vm1841_vm10, %v1840_v3, 0.0 }
 0x312   :  { %v1848_v55 = vadd.f32 %v1847_v62, %v1846_v24 }
 0x314   :  { %v1849_v57 = vrot.slane %v1848_v55, 4 }
 0x316   :  { %v1850_v27 = vadd.f32 %v1849_v57, %v1848_v55 }
 0x318   :  { %v1851_v20 = vrot.slane %v1850_v27, 2 }
 0x31a   :  { %v1852_v12 = vadd.f32 %v1851_v20, %v1850_v27 }
 0x31c   :  { %v1853_v48 = vrot.slane %v1852_v12, 1 }
 0x31e   :  { %v1854_v30 = vadd.f32 %v1853_v48, %v1852_v12 }
 0x320   :  { %v1855_v7 = vadd.f32 %v1854_v30, %v1764_v63 }
 0x322   :  { %v1856_v28 = vmax.f32 %v1855_v7, 0.0 }
 0x324   :  { %v1860_v14 = vrot.slane %v1856_v28, %v5697_v53 }
 0x326   :  { %v1862_v32 = vmul.f32 %v1860_v14, %v1766_v5  ;;  %v1861_v36 = vmul.f32 %v1860_v14, %v1765_v52  ;;  %v1864_v47 = vmul.f32 %v1860_v14, %v1768_v38  ;;  %v1863_v16 = vmul.f32 %v1860_v14, %v1767_v51 }
 0x328   :  { %v1868_v1 = vsel %vm1841_vm10, %v1862_v32, 0.0  ;;  %v1865_v42 = vsel %vm1841_vm10, %v1861_v36, 0.0  ;;  %v1874_v44 = vsel %vm1841_vm10, %v1864_v47, 0.0  ;;  %v1871_v8 = vsel %vm1841_vm10, %v1863_v16, 0.0 }
 0x329   :  { %1869 = vadd.xlane.f32.xlu0 %v1868_v1  ;;  %1866 = vadd.xlane.f32.xlu1 %v1865_v42 }
 0x32d   :  { %1875 = vadd.xlane.f32.xlu0 %v1874_v44  ;;  %1872 = vadd.xlane.f32.xlu1 %v1871_v8 }
 0x33d   :  { %v2033_v33 = vpop.xlane.xlu1 %2032  ;;  %v2038_v54 = vpop.xlane.xlu0 %2037 }
 0x33e   :  { %v2049_v41 = vmul.f32 %v2033_v33, %v1760_v18  ;;  %v2050_v3 = vmul.f32 %v2038_v54, %v1761_v59  ;;  %v3285_v18 = vmov 0  }
 0x33f   :  { %2907 = vset.pattern.permute.xlu0 %v3285_v18  ;;  %2906 = vset.pattern.permute.xlu1 %v3285_v18  ;;  %v1769_v18 = vld [vmem:[%s5247_s7] sm:$0xff] }
 0x340   :  { %v2053_v24 = vsel %vm1841_vm10, %v2049_v41, 0.0  ;;  %v2054_v62 = vsel %vm1841_vm10, %v2050_v3, 0.0 }
 0x341   :  { %v2043_v55 = vpop.xlane.xlu1 %2042  ;;  %v2048_v57 = vpop.xlane.xlu0 %2047  ;;  %v2055_v12 = vadd.f32 %v2054_v62, %v2053_v24  ;;  %v3006_v62 = vld [vmem:[#allocation8] ss:$8 sps:$4 sm:$0xff]  }
 0x342   :  { %v2051_v27 = vmul.f32 %v2043_v55, %v1762_v31  ;;  %v2052_v20 = vmul.f32 %v2048_v57, %v1763_v13  ;;  %v3007_v55 = vld [vmem:[#allocation8 + $0x14] ss:$8 sps:$4 sm:$0xff]   ;;  %v3012_v57 = vld [vmem:[#allocation8 + $0x20] ss:$8 sps:$4 sm:$0xff]  }
 0x344   :  { %v2056_v48 = vsel %vm1841_vm10, %v2051_v27, 0.0  ;;  %v2058_v7 = vsel %vm1841_vm10, %v2052_v20, 0.0  ;;  %v3016_v27 = vld [vmem:[#allocation8 + $0x44] ss:$8 sps:$4 sm:$0xff]   ;;  %v3018_v20 = vld [vmem:[#allocation8 + $0x40] ss:$8 sps:$4 sm:$0xff]  }
 0x345   :  { %v2057_v30 = vadd.f32 %v2056_v48, %v2055_v12  ;;  %v3019_v12 = vld [vmem:[#allocation8 + $0x54] ss:$8 sps:$4 sm:$0xff]   ;;  %v3021_v48 = vld [vmem:[#allocation8 + $0x50] ss:$8 sps:$4 sm:$0xff]  }
 0x347   :  { %v2059_v28 = vadd.f32 %v2058_v7, %v2057_v30  ;;  %v3022_v30 = vld [vmem:[#allocation8 + $0x64] ss:$8 sps:$4 sm:$0xff]   ;;  %v3024_v7 = vld [vmem:[#allocation8 + $0x60] ss:$8 sps:$4 sm:$0xff]  }
 0x349   :  { %v2060_v14 = vrot.slane %v2059_v28, 4 }
 0x34b   :  { %v2061_v32 = vadd.f32 %v2060_v14, %v2059_v28  ;;  %v3025_v28 = vld [vmem:[#allocation8 + $0x74] ss:$8 sps:$4 sm:$0xff]   ;;  %v3027_v14 = vld [vmem:[#allocation8 + $0x70] ss:$8 sps:$4 sm:$0xff]  }
 0x34d   :  { %v2062_v36 = vrot.slane %v2061_v32, 2 }
 0x34f   :  { %v2063_v59 = vadd.f32 %v2062_v36, %v2061_v32  ;;  %v3028_v32 = vld [vmem:[#allocation8 + $0x84] ss:$8 sps:$4 sm:$0xff]   ;;  %v3030_v36 = vld [vmem:[#allocation8 + $0x80] ss:$8 sps:$4 sm:$0xff]  }
 0x351   :  { %v2064_v1 = vrot.slane %v2063_v59, 1 }
 0x353   :  { %v2065_v42 = vadd.f32 %v2064_v1, %v2063_v59  ;;  %v1770_v59 = vld [vmem:[%s5247_s7 + $0x8] sm:$0xff] }
 0x355   :  { %v2066_v47 = vadd.f32 %v2065_v42, %v1764_v63  ;;  %v3004_v63 = vld [vmem:[#allocation8 + $0x4] ss:$8 sps:$4 sm:$0xff]  }
 0x356   :  { %2600 = vmatprep.subr.bf16.mxu0 %v3004_v63 }
 0x357   :  { %v2067_v16 = vmax.f32 %v2066_v47, 0.0  ;;  %2601 = vmatpush1.bf16.msra.mxu0 %v3006_v62 }
 0x358   :  { %2602 = vmatprep.subr.bf16.mxu0 %v3007_v55 }
 0x359   :  { %v2071_v31 = vrot.slane %v2067_v16, %v5697_v53 }
 0x35b   :  { %v2073_v13 = vmul.f32 %v2071_v31, %v1766_v5  ;;  %v2072_v44 = vmul.f32 %v2071_v31, %v1765_v52  ;;  %v2075_v54 = vmul.f32 %v2071_v31, %v1768_v38  ;;  %v2074_v41 = vmul.f32 %v2071_v31, %v1767_v51  ;;  %v3009_v5 = vld [vmem:[#allocation8 + $0x10] ss:$8 sps:$4 sm:$0xff]   ;;  %v3010_v52 = vld [vmem:[#allocation8 + $0x24] ss:$8 sps:$4 sm:$0xff]   ;;  %v3013_v38 = vld [vmem:[#allocation8 + $0x34] ss:$8 sps:$4 sm:$0xff]  }
 0x35c   :  { %2603 = vmatpush1.bf16.msra.mxu0 %v3009_v5  ;;  %v3015_v51 = vld [vmem:[#allocation8 + $0x30] ss:$8 sps:$4 sm:$0xff]  }
 0x35d   :  { %v2079_v8 = vsel %vm1841_vm10, %v2073_v13, 0.0  ;;  %v2076_v33 = vsel %vm1841_vm10, %v2072_v44, 0.0  ;;  %v2085_v3 = vsel %vm1841_vm10, %v2075_v54, 0.0  ;;  %v2082_v24 = vsel %vm1841_vm10, %v2074_v41, 0.0  ;;  %2604 = vmatprep.subr.bf16.mxu0 %v3010_v52  ;;  %v1771_v31 = vld [vmem:[%s5247_s7 + $0x10] sm:$0xff]  ;;  %v1772_v13 = vld [vmem:[%s5247_s7 + $0x18] sm:$0xff] }
 0x35e   :  { %2080 = vadd.xlane.f32.xlu0 %v2079_v8  ;;  %2077 = vadd.xlane.f32.xlu1 %v2076_v33 }
 0x360   :  { %2605 = vmatpush1.bf16.msra.mxu0 %v3012_v57 }
 0x361   :  { %2606 = vmatprep.subr.bf16.mxu0 %v3013_v38 }
 0x362   :  { %2086 = vadd.xlane.f32.xlu0 %v2085_v3  ;;  %2083 = vadd.xlane.f32.xlu1 %v2082_v24 }
 0x364   :  { %2607 = vmatpush1.bf16.msra.mxu0 %v3015_v51 }
 0x365   :  { %2608 = vmatprep.subr.bf16.mxu0 %v3016_v27 }
 0x368   :  { %2609 = vmatpush1.bf16.msra.mxu0 %v3018_v20 }
 0x369   :  { %2610 = vmatprep.subr.bf16.mxu0 %v3019_v12 }
 0x36c   :  { %2611 = vmatpush1.bf16.msra.mxu0 %v3021_v48 }
 0x36d   :  { %2612 = vmatprep.subr.bf16.mxu0 %v3022_v30  ;;  %v3031_v30 = vld [vmem:[#allocation8 + $0x94] ss:$8 sps:$4 sm:$0xff]  }
 0x370   :  { %2613 = vmatpush1.bf16.msra.mxu0 %v3024_v7  ;;  %v3033_v7 = vld [vmem:[#allocation8 + $0x90] ss:$8 sps:$4 sm:$0xff]  }
 0x371   :  { %2614 = vmatprep.subr.bf16.mxu0 %v3025_v28  ;;  %v3034_v28 = vld [vmem:[#allocation8 + $0xa4] ss:$8 sps:$4 sm:$0xff]  }
 0x374   :  { %2615 = vmatpush1.bf16.msra.mxu0 %v3027_v14  ;;  %v3036_v14 = vld [vmem:[#allocation8 + $0xa0] ss:$8 sps:$4 sm:$0xff]  }
 0x375   :  { %2616 = vmatprep.subr.bf16.mxu0 %v3028_v32 }
 0x378   :  { %2617 = vmatpush1.bf16.msra.mxu0 %v3030_v36  ;;  %v3037_v36 = vld [vmem:[#allocation8 + $0xb4] ss:$8 sps:$4 sm:$0xff]  }
 0x379   :  { %2618 = vmatprep.subr.bf16.mxu0 %v3031_v30 }
 0x37c   :  { %2619 = vmatpush1.bf16.msra.mxu0 %v3033_v7 }
 0x37d   :  { %2620 = vmatprep.subr.bf16.mxu0 %v3034_v28 }
 0x380   :  { %2621 = vmatpush1.bf16.msra.mxu0 %v3036_v14 }
 0x381   :  { %2622 = vmatprep.subr.bf16.mxu0 %v3037_v36 }
 0x3b6   :  { %v1867_v1 = vpop.xlane.xlu1 %1866  ;;  %v1870_v42 = vpop.xlane.xlu0 %1869 }
 0x3b7   :  { %v1877_v47 = vadd.f32 %v1867_v1, %v1769_v18  ;;  %v1878_v16 = vadd.f32 %v1870_v42, %v1770_v59  ;;  %v3039_v1 = vld [vmem:[#allocation8 + $0xb0] ss:$8 sps:$4 sm:$0xff]   ;;  %v3040_v42 = vld [vmem:[#allocation8 + $0xc4] ss:$8 sps:$4 sm:$0xff]  }
 0x3b8   :  { %2623 = vmatpush1.bf16.msra.mxu0 %v3039_v1 }
 0x3b9   :  { %v2805_v44 = vmul.f32 -1.442695, %v1877_v47  ;;  %v2806_v8 = vmul.f32 -1.442695, %v1878_v16  ;;  %2624 = vmatprep.subr.bf16.mxu0 %v3040_v42 }
 0x3ba   :  { %v1873_v33 = vpop.xlane.xlu1 %1872  ;;  %v1876_v54 = vpop.xlane.xlu0 %1875 }
 0x3bb   :  { %3100 = vpow2.f32 %v2805_v44  ;;  %v1879_v41 = vadd.f32 %v1873_v33, %v1771_v31  ;;  %v1880_v3 = vadd.f32 %v1876_v54, %v1772_v13  ;;  %v3042_v33 = vld [vmem:[#allocation8 + $0xc0] ss:$8 sps:$4 sm:$0xff]   ;;  %v3043_v54 = vld [vmem:[#allocation8 + $0xd4] ss:$8 sps:$4 sm:$0xff]  }
 0x3bc   :  { %3102 = vpow2.f32 %v2806_v8  ;;  %2625 = vmatpush1.bf16.msra.mxu0 %v3042_v33 }
 0x3bd   :  { %v2807_v24 = vmul.f32 -1.442695, %v1879_v41  ;;  %v2808_v63 = vmul.f32 -1.442695, %v1880_v3  ;;  %2626 = vmatprep.subr.bf16.mxu0 %v3043_v54 }
 0x3bf   :  { %3104 = vpow2.f32 %v2807_v24 }
 0x3c0   :  { %3106 = vpow2.f32 %v2808_v63 }
 0x3c5   :  { %v3101_v62 = vpop.eup %3100 }
 0x3c6   :  { %v3103_v55 = vpop.eup %3102  ;;  %v1893_v5 = vadd.f32 1.0, %v3101_v62 }
 0x3c7   :  { %v1894_v52 = vadd.f32 1.0, %v3103_v55 }
 0x3c8   :  { %3108 = vrcp.f32 %v1893_v5  ;;  %v3045_v5 = vld [vmem:[#allocation8 + $0xd0] ss:$8 sps:$4 sm:$0xff]  }
 0x3c9   :  { %v3105_v57 = vpop.eup %3104  ;;  %3110 = vrcp.f32 %v1894_v52  ;;  %v3046_v52 = vld [vmem:[#allocation8 + $0xe4] ss:$8 sps:$4 sm:$0xff]   ;;  %2627 = vmatpush1.bf16.msra.mxu0 %v3045_v5 }
 0x3ca   :  { %v3107_v38 = vpop.eup %3106  ;;  %v1895_v51 = vadd.f32 1.0, %v3105_v57  ;;  %2628 = vmatprep.subr.bf16.mxu0 %v3046_v52 }
 0x3cb   :  { %v1896_v27 = vadd.f32 1.0, %v3107_v38  ;;  %v3049_v38 = vld [vmem:[#allocation8 + $0xf4] ss:$8 sps:$4 sm:$0xff]  }
 0x3cc   :  { %3112 = vrcp.f32 %v1895_v51  ;;  %v3051_v51 = vld [vmem:[#allocation8 + $0xf0] ss:$8 sps:$4 sm:$0xff]  }
 0x3cd   :  { %3114 = vrcp.f32 %v1896_v27  ;;  %v3054_v27 = vld [vmem:[#allocation8 + $0x104] ss:$8 sps:$4 sm:$0xff]  }
 0x3d2   :  { %v3109_v20 = vpop.eup %3108 }
 0x3d3   :  { %v3111_v12 = vpop.eup %3110  ;;  %1907 = vperm.xlu1 %2906, %v3109_v20  }
 0x3d4   :  { %1912 = vperm.xlu0 %2907, %v3111_v12  }
 0x3d6   :  { %v3113_v48 = vpop.eup %3112 }
 0x3d7   :  { %1917 = vperm.xlu1 %2906, %v3113_v48   ;;  %v3115_v32 = vpop.eup %3114 }
 0x3db   :  { %1922 = vperm.xlu1 %2906, %v3115_v32  }
 0x3eb   :  { %v2078_v47 = vpop.xlane.xlu1 %2077  ;;  %v2081_v16 = vpop.xlane.xlu0 %2080 }
 0x3ec   :  { %v2088_v44 = vadd.f32 %v2078_v47, %v1769_v18  ;;  %v2089_v8 = vadd.f32 %v2081_v16, %v1770_v59  ;;  %v3048_v59 = vld [vmem:[#allocation8 + $0xe0] ss:$8 sps:$4 sm:$0xff]  }
 0x3ed   :  { %2629 = vmatpush1.bf16.msra.mxu0 %v3048_v59 }
 0x3ee   :  { %v2809_v41 = vmul.f32 -1.442695, %v2088_v44  ;;  %v2810_v3 = vmul.f32 -1.442695, %v2089_v8  ;;  %2630 = vmatprep.subr.bf16.mxu0 %v3049_v38 }
 0x3ef   :  { %v2084_v24 = vpop.xlane.xlu1 %2083  ;;  %v2087_v63 = vpop.xlane.xlu0 %2086 }
 0x3f0   :  { %3116 = vpow2.f32 %v2809_v41  ;;  %v2090_v62 = vadd.f32 %v2084_v24, %v1771_v31  ;;  %v2091_v55 = vadd.f32 %v2087_v63, %v1772_v13 }
 0x3f1   :  { %3118 = vpow2.f32 %v2810_v3  ;;  %2631 = vmatpush1.bf16.msra.mxu0 %v3051_v51 }
 0x3f2   :  { %v2811_v57 = vmul.f32 -1.442695, %v2090_v62  ;;  %v2812_v18 = vmul.f32 -1.442695, %v2091_v55  ;;  %2653 = vmatprep.subr.bf16.mxu0 %v3054_v27 }
 0x3f4   :  { %3120 = vpow2.f32 %v2811_v57 }
 0x3f5   :  { %3122 = vpow2.f32 %v2812_v18 }
 0x3fa   :  { %v3117_v20 = vpop.eup %3116 }
 0x3fb   :  { %v3119_v31 = vpop.eup %3118  ;;  %v2104_v13 = vadd.f32 1.0, %v3117_v20 }
 0x3fc   :  { %v2105_v12 = vadd.f32 1.0, %v3119_v31 }
 0x3fd   :  { %3124 = vrcp.f32 %v2104_v13 }
 0x3fe   :  { %v3121_v48 = vpop.eup %3120  ;;  %3126 = vrcp.f32 %v2105_v12 }
 0x3ff   :  { %v2106_v30 = vadd.f32 1.0, %v3121_v48  ;;  %v3123_v7 = vpop.eup %3122 }
 0x400   :  { %v2107_v28 = vadd.f32 1.0, %v3123_v7  ;;  %v5698_v7 = vld [vmem:[#allocation41_spill] sm:$0xff] }
 0x401   :  { %3128 = vrcp.f32 %v2106_v30 }
 0x402   :  { %3130 = vrcp.f32 %v2107_v28 }
 0x407   :  { %v3125_v14 = vpop.eup %3124 }
 0x408   :  { %2118 = vperm.xlu1 %2906, %v3125_v14   ;;  %v3127_v32 = vpop.eup %3126 }
 0x40b   :  { %v3129_v36 = vpop.eup %3128 }
 0x40c   :  { %2123 = vperm.xlu1 %2906, %v3127_v32   ;;  %v3131_v1 = vpop.eup %3130 }
 0x410   :  { %2128 = vperm.xlu1 %2906, %v3129_v36   ;;  %v5702_v36 = vld [vmem:[#allocation66_spill] sm:$0xff] }
 0x414   :  { %2133 = vperm.xlu1 %2906, %v3131_v1   ;;  %v5703_v1 = vmax.f32 %v5702_v36, 0.0  ;;  %v3137_v36 = vld [vmem:[%s5248_s8 + $0x8] sm:$0xff] }
 0x452   :  { %v1908_v42 = vpop.permute.xlu1 %1907 }
 0x453   :  { %v1927_v47 = vmul.f32 %v1908_v42, %v5692_v26  ;;  %v1913_v16 = vpop.permute.xlu0 %1912  ;;  %v1925_v44 = vmul.f32 %v1908_v42, %v5684_v60  ;;  %v1926_v54 = vmul.f32 %v1908_v42, %v5686_v2 }
 0x454   :  { %v1929_v8 = vmul.f32 %v1913_v16, %v5685_v50  ;;  %v1931_v33 = vmul.f32 %v1913_v16, %v5693_v56  ;;  %v1930_v41 = vmul.f32 %v1913_v16, %v5687_v17 }
 0x456   :  { %v1959_v3 = vadd.f32 %v1931_v33, %v1927_v47  ;;  %v1918_v24 = vpop.permute.xlu1 %1917  ;;  %v1941_v26 = vadd.f32 %v1929_v8, %v1925_v44  ;;  %v1950_v5 = vadd.f32 %v1930_v41, %v1926_v54  ;;  %v5704_v44 = vld [vmem:[#allocation56_spill] sm:$0xff] }
 0x457   :  { %v1933_v63 = vmul.f32 %v1918_v24, %v5688_v10  ;;  %v1934_v62 = vmul.f32 %v1918_v24, %v5689_v6  ;;  %v1935_v55 = vmul.f32 %v1918_v24, %v5694_v40  ;;  %v5705_v8 = vmax.f32 %v5704_v44, 0.0  ;;  %v3138_v44 = vld [vmem:[%s5248_s8 + $0x30] sm:$0xff] }
 0x459   :  { %v1960_v52 = vadd.f32 %v1959_v3, %v1935_v55  ;;  %v1942_v60 = vadd.f32 %v1941_v26, %v1933_v63  ;;  %v1951_v50 = vadd.f32 %v1950_v5, %v1934_v62  ;;  %v3052_v3 = vld [vmem:[#allocation8 + $0x100] ss:$8 sps:$4 sm:$0xff]   ;;  %v3057_v63 = vld [vmem:[#allocation8 + $0x114] ss:$8 sps:$4 sm:$0xff]   ;;  %v3055_v62 = vld [vmem:[#allocation8 + $0x110] ss:$8 sps:$4 sm:$0xff]  }
 0x45a   :  { %v1923_v57 = vpop.permute.xlu1 %1922  ;;  %v3060_v55 = vld [vmem:[#allocation8 + $0x124] ss:$8 sps:$4 sm:$0xff]   ;;  %v3058_v26 = vld [vmem:[#allocation8 + $0x120] ss:$8 sps:$4 sm:$0xff]   ;;  %v3063_v5 = vld [vmem:[#allocation8 + $0x134] ss:$8 sps:$4 sm:$0xff]  }
 0x45b   :  { %v1937_v56 = vmul.f32 %v1923_v57, %v5690_v35  ;;  %v1938_v2 = vmul.f32 %v1923_v57, %v5691_v29  ;;  %v1939_v17 = vmul.f32 %v1923_v57, %v4815_v37  ;;  %v5699_v29 = vmax.f32 %v5698_v7, 0.0  ;;  %v5700_v37 = vld [vmem:[#allocation47_spill] sm:$0xff] }
 0x45c   :  { %v5701_v14 = vmax.f32 %v5700_v37, 0.0  ;;  %v3081_v37 = vld [vmem:[#allocation8 + $0x194] ss:$8 sps:$4 sm:$0xff]  }
 0x45d   :  { %v1943_v18 = vadd.f32 %v1942_v60, %v1937_v56  ;;  %v1952_v59 = vadd.f32 %v1951_v50, %v1938_v2  ;;  %v5134_v38 = vadd.f32 %v1960_v52, %v1939_v17  ;;  %v3061_v52 = vld [vmem:[#allocation8 + $0x130] ss:$8 sps:$4 sm:$0xff]   ;;  %v3066_v60 = vld [vmem:[#allocation8 + $0x144] ss:$8 sps:$4 sm:$0xff]   ;;  %v3064_v50 = vld [vmem:[#allocation8 + $0x140] ss:$8 sps:$4 sm:$0xff]  }
 0x45e   :  { %v3132_v56 = vld [vmem:[%s5248_s8 + $0x18] sm:$0xff] }
 0x45f   :  { %v1944_v10 = vrot.slane %v1943_v18, 4  ;;  %v1953_v6 = vrot.slane %v1952_v59, 4  ;;  %v1928_v2 = vmul.f32 %v3132_v56, %v1908_v42  ;;  %v3133_v17 = vld [vmem:[%s5248_s8 + $0x38] sm:$0xff] }
 0x461   :  { %v1945_v51 = vadd.f32 %v1944_v10, %v1943_v18  ;;  %v1954_v40 = vadd.f32 %v1953_v6, %v1952_v59  ;;  %v1932_v18 = vmul.f32 %v3133_v17, %v1913_v16  ;;  %v3069_v59 = vld [vmem:[#allocation8 + $0x154] ss:$8 sps:$4 sm:$0xff]   ;;  %v1936_v10 = vmul.f32 %v1918_v24, %v4831_v0  ;;  %v3067_v6 = vld [vmem:[#allocation8 + $0x150] ss:$8 sps:$4 sm:$0xff]   ;;  %v3134_v24 = vld [vmem:[%s5248_s8 + $0x20] sm:$0xff] }
 0x462   :  { %v3073_v16 = vld [vmem:[#allocation8 + $0x170] ss:$8 sps:$4 sm:$0xff]  }
 0x463   :  { %v1946_v27 = vrot.slane %v1945_v51, 2  ;;  %v1955_v20 = vrot.slane %v1954_v40, 2 }
 0x465   :  { %v1956_v31 = vadd.f32 %v1955_v20, %v1954_v40  ;;  %v1947_v13 = vadd.f32 %v1946_v27, %v1945_v51  ;;  %v1968_v51 = vadd.f32 %v1932_v18, %v1928_v2  ;;  %v1940_v40 = vmul.f32 %v1923_v57, %v4855_v58  ;;  %v3072_v27 = vld [vmem:[#allocation8 + $0x164] ss:$8 sps:$4 sm:$0xff]  }
 0x466   :  { %v3135_v57 = vld [vmem:[%s5248_s8 + $0x28] sm:$0xff]  ;;  %v1962_v18 = vrot.slane %v5134_v38, 4 }
 0x467   :  { %v1957_v12 = vrot.slane %v1956_v31, 1  ;;  %v1948_v48 = vrot.slane %v1947_v13, 1  ;;  %v1969_v20 = vadd.f32 %v1968_v51, %v1936_v10  ;;  %v3084_v10 = vld [vmem:[#allocation8 + $0x1a4] ss:$8 sps:$4 sm:$0xff]  }
 0x469   :  { %v1958_v30 = vadd.f32 %v1957_v12, %v1956_v31  ;;  %v1949_v35 = vadd.f32 %v1948_v48, %v1947_v13  ;;  %v3070_v31 = vld [vmem:[#allocation8 + $0x160] ss:$8 sps:$4 sm:$0xff]   ;;  %v1970_v42 = vadd.f32 %v1969_v20, %v1940_v40  ;;  %v3075_v13 = vld [vmem:[#allocation8 + $0x174] ss:$8 sps:$4 sm:$0xff]  }
 0x46b   :  { %v1978_v28 = vmul.f32 %v1958_v30, %v5699_v29  ;;  %v1982_v32 = vmul.f32 %v1958_v30, %v5701_v14  ;;  %v1977_v47 = vmul.f32 %v1949_v35, %v5703_v1  ;;  %v1981_v33 = vmul.f32 %v1949_v35, %v5705_v8  ;;  %v3078_v30 = vld [vmem:[#allocation8 + $0x184] ss:$8 sps:$4 sm:$0xff]   ;;  %v3076_v29 = vld [vmem:[#allocation8 + $0x180] ss:$8 sps:$4 sm:$0xff]  }
 0x46c   :  { %v1971_v48 = vrot.slane %v1970_v42, 4  ;;  %v3136_v14 = vld [vmem:[%s5248_s8] sm:$0xff] }
 0x46d   :  { %v2197_v54 = vpack.c.bf16 %v1982_v32, %v1978_v28  ;;  %v2196_v41 = vpack.c.bf16 %v1981_v33, %v1977_v47 }
 0x46e   :  { %v1972_v28 = vadd.f32 %v1971_v48, %v1970_v42 }
 0x46f   :  { %2632 = vmatprep.mubr.bf16.mxu0 %v2197_v54  ;;  %v3139_v54 = vld [vmem:[%s5248_s8 + $0x10] sm:$0xff] }
 0x470   :  { %2633 = vmatmul.mubr.bf16.vlgmr.msra.gmra.mrb[0].mxu0 %v2196_v41 }
 0x471   :  { %2654 = vmatpush1.bf16.msra.mxu0 %v3052_v3  ;;  %v3140_v3 = vld [vmem:[%s5248_s8 + $0x40] sm:$0xff] }
 0x472   :  { %2655 = vmatprep.subr.bf16.mxu0 %v3057_v63 }
 0x475   :  { %2656 = vmatpush1.bf16.msra.mxu0 %v3055_v62  ;;  %v3141_v62 = vld [vmem:[%s5248_s8 + $0x48] sm:$0xff] }
 0x476   :  { %2657 = vmatprep.subr.bf16.mxu0 %v3060_v55 }
 0x479   :  { %2658 = vmatpush1.bf16.msra.mxu0 %v3058_v26  ;;  %v3142_v26 = vld [vmem:[%s5248_s8 + $0x58] sm:$0xff] }
 0x47a   :  { %2659 = vmatprep.subr.bf16.mxu0 %v3063_v5 }
 0x47d   :  { %2660 = vmatpush1.bf16.msra.mxu0 %v3061_v52 }
 0x47e   :  { %2661 = vmatprep.subr.bf16.mxu0 %v3066_v60 }
 0x481   :  { %2662 = vmatpush1.bf16.msra.mxu0 %v3064_v50 }
 0x482   :  { %2663 = vmatprep.subr.bf16.mxu0 %v3069_v59  ;;  %v1973_v59 = vrot.slane %v1972_v28, 2 }
 0x485   :  { %2664 = vmatpush1.bf16.msra.mxu0 %v3067_v6 }
 0x486   :  { %2665 = vmatprep.subr.bf16.mxu0 %v3072_v27 }
 0x487   :  { %v2119_v12 = vpop.permute.xlu1 %2118 }
 0x488   :  { %v2136_v32 = vmul.f32 %v3136_v14, %v2119_v12  ;;  %v2137_v1 = vmul.f32 %v3137_v36, %v2119_v12  ;;  %v2139_v47 = vmul.f32 %v3132_v56, %v2119_v12  ;;  %v2138_v41 = vmul.f32 %v3139_v54, %v2119_v12  ;;  %v3143_v56 = vld [vmem:[%s5248_s8 + $0x50] sm:$0xff] }
 0x489   :  { %2666 = vmatpush1.bf16.msra.mxu0 %v3070_v31  ;;  %v3144_v31 = vld [vmem:[%s5248_s8 + $0x60] sm:$0xff] }
 0x48a   :  { %2667 = vmatprep.subr.bf16.mxu0 %v3075_v13  ;;  %v3145_v13 = vld [vmem:[%s5248_s8 + $0x68] sm:$0xff] }
 0x48b   :  { %v2124_v0 = vpop.permute.xlu1 %2123 }
 0x48c   :  { %v2140_v58 = vmul.f32 %v3134_v24, %v2124_v0  ;;  %v2141_v35 = vmul.f32 %v3135_v57, %v2124_v0  ;;  %v2143_v7 = vmul.f32 %v3133_v17, %v2124_v0  ;;  %v2142_v8 = vmul.f32 %v3138_v44, %v2124_v0  ;;  %v3079_v17 = vld [vmem:[#allocation8 + $0x190] ss:$8 sps:$4 sm:$0xff]  }
 0x48d   :  { %2668 = vmatpush1.bf16.msra.mxu0 %v3073_v16  ;;  %v3146_v16 = vld [vmem:[%s5248_s8 + $0x70] sm:$0xff]  ;;  %v1963_v57 = vadd.f32 %v1962_v18, %v5134_v38 }
 0x48e   :  { %2669 = vmatprep.subr.bf16.mxu0 %v3078_v30  ;;  %v2152_v52 = vadd.f32 %v2140_v58, %v2136_v32  ;;  %v2161_v60 = vadd.f32 %v2141_v35, %v2137_v1  ;;  %v2179_v50 = vadd.f32 %v2143_v7, %v2139_v47  ;;  %v2170_v6 = vadd.f32 %v2142_v8, %v2138_v41  ;;  %v3147_v30 = vld [vmem:[%s5248_s8 + $0x78] sm:$0xff]  ;;  %v3082_v58 = vld [vmem:[#allocation8 + $0x1a0] ss:$8 sps:$4 sm:$0xff]  }
 0x48f   :  { %v2129_v33 = vpop.permute.xlu1 %2128  ;;  %v1974_v32 = vadd.f32 %v1973_v59, %v1972_v28  ;;  %v3085_v44 = vld [vmem:[#allocation8 + $0x1b0] ss:$8 sps:$4 sm:$0xff]   ;;  %v1964_v8 = vrot.slane %v1963_v57, 2 }
 0x490   :  { %v2144_v63 = vmul.f32 %v3140_v3, %v2129_v33  ;;  %v2145_v55 = vmul.f32 %v3141_v62, %v2129_v33  ;;  %v2147_v5 = vmul.f32 %v3142_v26, %v2129_v33  ;;  %v2146_v2 = vmul.f32 %v3143_v56, %v2129_v33  ;;  %v3090_v3 = vld [vmem:[#allocation8 + $0x1c4] ss:$8 sps:$4 sm:$0xff]  }
 0x491   :  { %2670 = vmatpush1.bf16.msra.mxu0 %v3076_v29  ;;  %v1975_v38 = vrot.slane %v1974_v32, 1 }
 0x492   :  { %2671 = vmatprep.subr.bf16.mxu0 %v3081_v37  ;;  %v2153_v51 = vadd.f32 %v2152_v52, %v2144_v63  ;;  %v2162_v40 = vadd.f32 %v2161_v60, %v2145_v55  ;;  %v2180_v27 = vadd.f32 %v2179_v50, %v2147_v5  ;;  %v2171_v24 = vadd.f32 %v2170_v6, %v2146_v2  ;;  %v3087_v37 = vld [vmem:[#allocation8 + $0x1b4] ss:$8 sps:$4 sm:$0xff]   ;;  %v3088_v5 = vld [vmem:[#allocation8 + $0x1c0] ss:$8 sps:$4 sm:$0xff]  }
 0x493   :  { %v2134_v20 = vpop.permute.xlu1 %2133  ;;  %v1965_v52 = vadd.f32 %v1964_v8, %v1963_v57  ;;  %v3093_v50 = vld [vmem:[#allocation8 + $0x1d4] ss:$8 sps:$4 sm:$0xff]  }
 0x494   :  { %v2148_v42 = vmul.f32 %v3144_v31, %v2134_v20  ;;  %v2149_v12 = vmul.f32 %v3145_v13, %v2134_v20  ;;  %v2150_v48 = vmul.f32 %v3146_v16, %v2134_v20  ;;  %v2151_v0 = vmul.f32 %v3147_v30, %v2134_v20  ;;  %v5706_v31 = vld [vmem:[#allocation60_spill] sm:$0xff] }
 0x495   :  { %2672 = vmatpush1.bf16.msra.mxu0 %v3079_v17  ;;  %v1976_v17 = vadd.f32 %v1975_v38, %v1974_v32  ;;  %v1966_v6 = vrot.slane %v1965_v52, 1  ;;  %v3099_v32 = vld [vmem:[#allocation8 + $0x1f4] ss:$8 sps:$4 sm:$0xff]  }
 0x496   :  { %v2154_v35 = vadd.f32 %v2153_v51, %v2148_v42  ;;  %v2163_v7 = vadd.f32 %v2162_v40, %v2149_v12  ;;  %v2181_v29 = vadd.f32 %v2180_v27, %v2151_v0  ;;  %2673 = vmatprep.subr.bf16.mxu0 %v3084_v10  ;;  %v2172_v14 = vadd.f32 %v2171_v24, %v2150_v48  ;;  %v3091_v10 = vld [vmem:[#allocation8 + $0x1d0] ss:$8 sps:$4 sm:$0xff]   ;;  %v3096_v27 = vld [vmem:[#allocation8 + $0x1e4] ss:$8 sps:$4 sm:$0xff]  }
 0x497   :  { %v5707_v42 = vmax.f32 %v5706_v31, 0.0  ;;  %v5708_v12 = vld [vmem:[#allocation96_spill] sm:$0xff] }
 0x498   :  { %v2155_v36 = vrot.slane %v2154_v35, 4  ;;  %v2164_v1 = vrot.slane %v2163_v7, 4  ;;  %v2182_v47 = vrot.slane %v2181_v29, 4  ;;  %v2173_v63 = vrot.slane %v2172_v14, 4  ;;  %v3153_v31 = vld [vmem:[#allocation2 + $0x28] sm:$0xff] }
 0x499   :  { %2674 = vmatpush1.bf16.msra.mxu0 %v3082_v58  ;;  %v1980_v13 = vmul.f32 %v1976_v17, %v5707_v42  ;;  %v5709_v16 = vmax.f32 %v5708_v12, 0.0  ;;  %v3154_v12 = vld [vmem:[#allocation2 + $0x30] sm:$0xff] }
 0x49a   :  { %v2156_v33 = vadd.f32 %v2155_v36, %v2154_v35  ;;  %v2165_v54 = vadd.f32 %v2164_v1, %v2163_v7  ;;  %v2183_v41 = vadd.f32 %v2182_v47, %v2181_v29  ;;  %2675 = vmatprep.subr.bf16.mxu0 %v3087_v37  ;;  %v2174_v56 = vadd.f32 %v2173_v63, %v2172_v14  ;;  %v3094_v29 = vld [vmem:[#allocation8 + $0x1e0] ss:$8 sps:$4 sm:$0xff]  }
 0x49b   :  { %v1984_v48 = vmul.f32 %v1976_v17, %v5709_v16  ;;  %v1967_v37 = vadd.f32 %v1966_v6, %v1965_v52 }
 0x49c   :  { %v2157_v62 = vrot.slane %v2156_v33, 2  ;;  %v2166_v55 = vrot.slane %v2165_v54, 2  ;;  %v2184_v26 = vrot.slane %v2183_v41, 2  ;;  %v2175_v20 = vrot.slane %v2174_v56, 2 }
 0x49d   :  { %2676 = vmatpush1.bf16.msra.mxu0 %v3085_v44  ;;  %v2199_v25 = vpack.c.bf16 %v1984_v48, %v1980_v13  ;;  %v3155_v48 = vld [vmem:[#allocation2 + $0x38] sm:$0xff] }
 0x49e   :  { %v2158_v28 = vadd.f32 %v2157_v62, %v2156_v33  ;;  %v2167_v60 = vadd.f32 %v2166_v55, %v2165_v54  ;;  %2677 = vmatprep.subr.bf16.mxu0 %v3090_v3  ;;  %v2185_v2 = vadd.f32 %v2184_v26, %v2183_v41  ;;  %v2176_v14 = vadd.f32 %v2175_v20, %v2174_v56 }
 0x4a0   :  { %v2168_v18 = vrot.slane %v2167_v60, 1  ;;  %v2159_v59 = vrot.slane %v2158_v28, 1  ;;  %v2186_v30 = vrot.slane %v2185_v2, 1  ;;  %v2177_v1 = vrot.slane %v2176_v14, 1 }
 0x4a1   :  { %2678 = vmatpush1.bf16.msra.mxu0 %v3088_v5 }
 0x4a2   :  { %2679 = vmatprep.subr.bf16.mxu0 %v3093_v50  ;;  %v2169_v51 = vadd.f32 %v2168_v18, %v2167_v60  ;;  %v2160_v40 = vadd.f32 %v2159_v59, %v2158_v28  ;;  %v2178_v33 = vadd.f32 %v2177_v1, %v2176_v14  ;;  %v3150_v50 = vld [vmem:[#allocation2 + $0x10] sm:$0xff] }
 0x4a4   :  { %v2189_v0 = vmul.f32 %v2169_v51, %v1737_v11  ;;  %v2193_v24 = vmul.f32 %v2169_v51, %v1741_v15  ;;  %v2188_v58 = vmul.f32 %v2160_v40, %v1736_v22  ;;  %v2192_v57 = vmul.f32 %v2160_v40, %v1740_v34  ;;  %v5712_v34 = vld [vmem:[#allocation94_spill] sm:$0xff]  ;;  %v3152_v51 = vld [vmem:[#allocation2 + $0x20] sm:$0xff] }
 0x4a5   :  { %2680 = vmatpush1.bf16.msra.mxu0 %v3091_v10  ;;  %v2187_v11 = vadd.f32 %v2186_v30, %v2185_v2  ;;  %v5711_v22 = vmax.f32 %v5710_v39, 0.0  ;;  %v5713_v15 = vmax.f32 %v5712_v34, 0.0  ;;  %v2190_v41 = vmul.f32 %v2178_v33, %v1738_v49  ;;  %v3151_v2 = vld [vmem:[#allocation2 + $0x18] sm:$0xff] }
 0x4a6   :  { %v2201_v35 = vpack.c.bf16 %v2193_v24, %v2189_v0  ;;  %v2200_v7 = vpack.c.bf16 %v2192_v57, %v2188_v58  ;;  %2681 = vmatprep.subr.bf16.mxu0 %v3096_v27  ;;  %v2194_v3 = vmul.f32 %v2178_v33, %v1742_v46  ;;  %v3149_v46 = vld [vmem:[#allocation2 + $0x8] sm:$0xff] }
 0x4a7   :  { %v1979_v61 = vmul.f32 %v1967_v37, %v5711_v22  ;;  %v1983_v36 = vmul.f32 %v1967_v37, %v5713_v15  ;;  %v2191_v47 = vmul.f32 %v2187_v11, %v1739_v45  ;;  %v2195_v44 = vmul.f32 %v2187_v11, %v1743_v19  ;;  %v5714_v45 = vld [vmem:[#allocation16_spill] sm:$0xff] }
 0x4a8   :  { %2642 = vmatprep.mubr.bf16.mxu0 %v2201_v35  ;;  %v2202_v63 = vpack.c.bf16 %v2194_v3, %v2190_v41  ;;  %v2277_v19 = vrot.slane %v2268_v9, %v5714_v45 }
 0x4a9   :  { %2643 = vmatmul.mubr.bf16.gmra.mrb[4].mxu0 %v2200_v7  ;;  %v2198_v8 = vpack.c.bf16 %v1983_v36, %v1979_v61  ;;  %v2203_v54 = vpack.c.bf16 %v2195_v44, %v2191_v47 }
 0x4aa   :  { %2682 = vmatpush1.bf16.msra.mxu0 %v3094_v29  ;;  %2685 = vmatprep.mubr.bf16.mxu0 %v2199_v25 }
 0x4ab   :  { %2683 = vmatprep.subr.bf16.mxu0 %v3099_v32 }
 0x4ae   :  { %2684 = vmatpush1.bf16.msra.mxu0 %v3097_v23 }
 0x4b1   :  { %2686 = vmatmul.mubr.bf16.vlgmr.msra.gmra.mrb[0].mxu0 %v2198_v8 }
 0x4b2   :  { %2695 = vmatprep.mubr.bf16.mxu0 %v2203_v54 }
 0x4b9   :  { %2696 = vmatmul.mubr.bf16.gmra.mrb[4].mxu0 %v2202_v63 }
 0x584   :  { %v2687_v38 = vpop.f32.mrb[0].mxu0 }
 0x585   :  { %v2877_v62 = vadd.f32 %v2687_v38, %v2273_v4  ;;  %v2689_v55 = vpop.f32.mrb[1].mxu0 }
 0x586   :  { %v2878_v26 = vadd.f32 %v2689_v55, %v2277_v19  ;;  %v2691_v5 = vpop.f32.mrb[2].mxu0 }
 0x587   :  { %v2706_v49 = vadd.f32 %v3148_v43, %v2877_v62  ;;  %v2879_v52 = vadd.f32 %v2691_v5, %v2273_v4  ;;  %v2693_v21 = vpop.f32.mrb[3].mxu0 }
 0x588   :  { %v2707_v28 = vadd.f32 %v3149_v46, %v2878_v26  ;;  %v2880_v60 = vadd.f32 %v2693_v21, %v2277_v19 }
 0x589   :  { %2714 = vst [vmem:[#allocation10] sm:$0xff] %v2706_v49  ;;  %v2708_v56 = vadd.f32 %v3150_v50, %v2879_v52 }
 0x58a   :  { %2715 = vst [vmem:[#allocation10 + $0x8] sm:$0xff] %v2707_v28  ;;  %v2709_v53 = vadd.f32 %v3151_v2, %v2880_v60 }
 0x58b   :  { %2716 = vst [vmem:[#allocation10 + $0x10] sm:$0xff] %v2708_v56 }
 0x58c   :  { %2717 = vst [vmem:[#allocation10 + $0x18] sm:$0xff] %v2709_v53  ;;  %v2697_v17 = vpop.f32.mrb[4].mxu0 }
 0x58d   :  { %v2881_v18 = vadd.f32 %v2697_v17, %v2273_v4  ;;  %v2699_v59 = vpop.f32.mrb[5].mxu0 }
 0x58e   :  { %v2882_v10 = vadd.f32 %v2699_v59, %v2277_v19  ;;  %v2701_v6 = vpop.f32.mrb[6].mxu0 }
 0x58f   :  { %v2710_v40 = vadd.f32 %v3152_v51, %v2881_v18  ;;  %v2883_v27 = vadd.f32 %v2701_v6, %v2273_v4  ;;  %v2703_v20 = vpop.f32.mrb[7].mxu0 }
 0x590   :  { %v2711_v42 = vadd.f32 %v3153_v31, %v2882_v10  ;;  %v2884_v13 = vadd.f32 %v2703_v20, %v2277_v19 }
 0x591   :  { %2718 = vst [vmem:[#allocation10 + $0x20] sm:$0xff] %v2710_v40  ;;  %v2712_v16 = vadd.f32 %v3154_v12, %v2883_v27 }
 0x592   :  { %2719 = vst [vmem:[#allocation10 + $0x28] sm:$0xff] %v2711_v42  ;;  %v2713_v30 = vadd.f32 %v3155_v48, %v2884_v13 }
 0x593   :  { %2720 = vst [vmem:[#allocation10 + $0x30] sm:$0xff] %v2712_v16 }
 0x594   :  { %2721 = vst [vmem:[#allocation10 + $0x38] sm:$0xff] %v2713_v30 }
 0x595   :  { %3255 = shalt.err (!%p3252_p8)
}
 0x596   :  { %s3256_s15 = scalar_lea.hbm %s5251_s11, 1024 }
 0x597   :  { %p3257_p9 = scmp.ne.s32.totalorder %s5251_s11, %s3256_s15  ;;  %p3260_p10 = scmp.lt.u32.totalorder %s3256_s15, %s5251_s11 }
 0x599   :  { %p3262_p11 = pnand %p3260_p10, %p3257_p9 }
 0x59b   :  { %3265 = shalt.err (!%p3262_p11)
}
 0x59c   :  { %2733 = dma.vmem_to_hbm [thread:$0]  %s2728_s13, 1024, %s5251_s11, [#allocation4], %s3276_s29, %s3276_s29, %s3277_s30  }
 0x59d   :  { %3272 = dma.done.wait [#allocation4], 1024  }
 0x59e   :  { %3273 = vsyncadd [#allocation4], 4294966272 }
 0x59f   :  { %2737 = vsyncpa [#allocation3], 1 }
 0x5a0   :  { %2738 = vsyncpa [#allocation6], 1 }
 0x5a1   :  { %2739 = vsyncpa [#allocation9], 1 }
 0x5a2   :  { %2740 = vsyncpa [#allocation4], 1 }

</bundles_post_ra>
